<compile_context>
chip_gen: v7x
topology: tpu7x:2x2x1
jax: 0.10.0
libtpu: 0.0.40
codegen_flags: <defaults>
</compile_context>

<pallas_src>
import jax
import jax.numpy as jnp
import numpy as np
from jax.experimental import pallas as pl
from jax.experimental.pallas import tpu as pltpu

LANE = 128        # TPU lane width (hard layout unit)
BT_PREF = 256     # preferred batch-tile lane width (review: 256; sweep 384/512 w/ spill check)
BT_MAX = 512


def _round_up(x, m):
    return ((x + m - 1) // m) * m


def _choose_batch_tile(batch, bt_pref=BT_PREF, bt_max=BT_MAX):
    """Pick the batch-tile lane width Bt (multiple of 128).

    Small batches: single tile covering the (128-padded) batch -> minimal wasted lanes.
    Larger batches: widest tile <= bt_max that yields an even tile count (best effort)
    so v7x's two TensorCores split the 'parallel' grid axis evenly; harmless on
    single-TC v5e/v6e.
    """
    bp = _round_up(batch, LANE)
    if bp <= bt_pref:
        return bp
    for n in range(2, bp // LANE + 2, 2):          # try even tile counts, widest first
        bt = _round_up(pl.cdiv(bp, n), LANE)
        if bt <= bt_max:
            return bt
    return LANE


def ode_rk4_kernel(t_ref, y0_ref, w1t_ref, w1y_ref, b1_ref,
                   w2_ref, b2_ref, w3_ref, b3_ref, out_ref):
    """Integrates one batch tile (Bt lanes) over its time grid with fixed-step RK4.

    Layout (batch on lanes):
      t_ref:   (T, Bt)       time grid, one column per batch element
      y0_ref:  (size, Bt)    initial state
      w1t_ref: (H, 1)        fc1 weight column multiplying the scalar time input
      w1y_ref: (H, size)     fc1 weight for the state part
      b1, b2:  (H, 1); w2: (H, H); w3: (size, H); b3: (size, 1)
      out_ref: (T, size, Bt) integrated trajectory for this batch tile
    """
    T, size, Bt = out_ref.shape
    H = w2_ref.shape[0]

    w1y = w1y_ref[...]
    w2 = w2_ref[...]
    w3 = w3_ref[...]

    # Hoisted lane-broadcasts: emitted exactly once per tile instead of once per
    # f_eval inside the unrolled loop (JAX does not CSE broadcast_in_dim).
    w1t_b = jnp.broadcast_to(w1t_ref[...], (H, Bt))
    b1_b = jnp.broadcast_to(b1_ref[...], (H, Bt))
    b2_b = jnp.broadcast_to(b2_ref[...], (H, Bt))
    b3_b = jnp.broadcast_to(b3_ref[...], (size, Bt))

    # Whole time tile in registers (a handful of vregs); rows sliced statically below,
    # so no per-step vld or dynamic address math on the critical path.
    t_all = t_ref[...]                      # (T, Bt)

    def f_eval(tc, y):
        # tc = w1t*t + b1, already (H, Bt).  Matmuls contract over size/H (tiny K)
        # with the batch on lanes; f32 accumulation on the MXU, tanh on the EUP.
        h = jnp.tanh(jnp.dot(w1y, y, preferred_element_type=jnp.float32) + tc)
        h = jnp.tanh(jnp.dot(w2, h, preferred_element_type=jnp.float32) + b2_b)
        return jnp.tanh(jnp.dot(w3, h, preferred_element_type=jnp.float32) + b3_b)

    y = y0_ref[...]                         # (size, Bt)
    out_ref[0] = y                          # output at t[0] is y0
    t0 = t_all[0:1, :]                      # (1, Bt)

    # T is static and small -> fully unrolled static Python loop (register-resident t
    # rows, static store indices -> lane-dense unmasked stores).
    # TODO(synk): for large T, switch to a time-chunk grid axis + VMEM-carried state
    # and partial unroll instead of full unroll (vreg-spill / VMEM pressure on v7x).
    for j in range(1, T):
        t1 = t_all[j:j + 1, :]              # (1, Bt)
        dt = t1 - t0
        half = dt * 0.5
        tmid = t0 + half
        dt_b = jnp.broadcast_to(dt, (size, Bt))
        half_b = dt_b * 0.5
        sixth_b = dt_b * (1.0 / 6.0)
        # One time-contribution per distinct RK4 time value (k2/k3 share tmid).
        tc0 = w1t_b * t0 + b1_b
        tcm = w1t_b * tmid + b1_b
        tc1 = w1t_b * t1 + b1_b
        k1 = f_eval(tc0, y)
        k2 = f_eval(tcm, y + half_b * k1)
        k3 = f_eval(tcm, y + half_b * k2)
        k4 = f_eval(tc1, y + dt_b * k3)
        y = y + sixth_b * (k1 + 2.0 * k2 + 2.0 * k3 + k4)
        out_ref[j] = y                      # lane-dense (size, Bt) store
        t0 = t1


@jax.jit
def custom_odeint(y0, t, w1, b1, w2, b2, w3, b3):
    """output[i] = RK4-odeint(f, y0[i], t[i]).

    Weights in PyTorch nn.Linear layout: w (out_features, in_features), b (out,).
    """
    B, size = y0.shape
    Bt_, T = t.shape
    assert B == Bt_
    H = w2.shape[0]

    # Pad the batch onto the lane axis.
    Bt = _choose_batch_tile(B)
    n_tiles = pl.cdiv(_round_up(B, LANE), Bt)
    Bp = n_tiles * Bt
    pad = Bp - B
    y0T = jnp.pad(y0.astype(jnp.float32), ((0, pad), (0, 0))).T      # (size, Bp)
    tT = jnp.pad(t.astype(jnp.float32), ((0, pad), (0, 0))).T        # (T, Bp)

    # fc1: column 0 multiplies the time scalar (torch.cat puts t first), the rest the
    # state. Biases reshaped to columns; lane-broadcast happens once inside the kernel.
    w1t = w1[:, :1]                      # (H, 1)
    w1y = w1[:, 1:]                      # (H, size)
    b1c = b1.reshape(H, 1)
    b2c = b2.reshape(H, 1)
    b3c = b3.reshape(size, 1)

    out = pl.pallas_call(
        ode_rk4_kernel,
        out_shape=jax.ShapeDtypeStruct((T, size, Bp), jnp.float32),
        grid=(n_tiles,),
        in_specs=[
            pl.BlockSpec((T, Bt), lambda i: (0, i)),          # t      (T, Bp)
            pl.BlockSpec((size, Bt), lambda i: (0, i)),       # y0     (size, Bp)
            pl.BlockSpec((H, 1), lambda i: (0, 0)),           # w1t    (resident)
            pl.BlockSpec((H, size), lambda i: (0, 0)),        # w1y
            pl.BlockSpec((H, 1), lambda i: (0, 0)),           # b1
            pl.BlockSpec((H, H), lambda i: (0, 0)),           # w2
            pl.BlockSpec((H, 1), lambda i: (0, 0)),           # b2
            pl.BlockSpec((size, H), lambda i: (0, 0)),        # w3
            pl.BlockSpec((size, 1), lambda i: (0, 0)),        # b3
        ],
        out_specs=pl.BlockSpec((T, size, Bt), lambda i: (0, 0, i)),
        compiler_params=pltpu.CompilerParams(
            # Batch tiles are independent: v7x's two TensorCores split them.
            dimension_semantics=("parallel",)),
    )(tT, y0T, w1t, w1y, b1c, w2, b2c, w3, b3c)

    # (T, size, Bp) -> (B, T, size); drop lane padding.  If a downstream consumer can
    # take (T, size, B) directly, this transpose (an extra HBM round-trip) can be
    # dropped; the kernel's lane-dense output layout should NOT be changed.
    return jnp.transpose(out, (2, 0, 1))[:B]


# ---------------- pure-numpy reference (same math, no Pallas) ----------------
def custom_odeint_ref(y0, t, params):
    w1, b1, w2, b2, w3, b3 = params

    def f(ts, y):  # ts: (B,), y: (B, size)
        x = np.concatenate([ts[:, None], y], axis=1).astype(np.float32)
        h = np.tanh(x @ w1.T + b1)
        h = np.tanh(h @ w2.T + b2)
        return np.tanh(h @ w3.T + b3)

    B, size = y0.shape
    T = t.shape[1]
    out = np.zeros((B, T, size), dtype=np.float32)
    y = y0.astype(np.float32)
    out[:, 0] = y
    for j in range(1, T):
        t0, t1 = t[:, j - 1], t[:, j]
        dt = (t1 - t0)[:, None]
        k1 = f(t0, y)
        k2 = f(t0 + (t1 - t0) / 2, y + dt / 2 * k1)
        k3 = f(t0 + (t1 - t0) / 2, y + dt / 2 * k2)
        k4 = f(t1, y + dt * k3)
        y = y + (dt / 6.0) * (k1 + 2 * k2 + 2 * k3 + k4)
        out[:, j] = y
    return out


if __name__ == "__main__":
    SIZE, HIDDEN = 8, 32  # module's `size` and `hidden_size`

    key = jax.random.PRNGKey(0)
    k1_, k2_, k3_, k4_, k5_, k6_, kc1, kc2 = jax.random.split(key, 8)

    # PyTorch nn.Linear layout: weight (out_features, in_features), bias (out_features,)
    w1 = 0.2 * jax.random.normal(k1_, (HIDDEN, SIZE + 1), jnp.float32)
    b1 = 0.1 * jax.random.normal(k2_, (HIDDEN,), jnp.float32)
    w2 = 0.2 * jax.random.normal(k3_, (HIDDEN, HIDDEN), jnp.float32)
    b2 = 0.1 * jax.random.normal(k4_, (HIDDEN,), jnp.float32)
    w3 = 0.2 * jax.random.normal(k5_, (SIZE, HIDDEN), jnp.float32)
    b3 = 0.1 * jax.random.normal(k6_, (SIZE,), jnp.float32)
    params_np = tuple(np.asarray(p) for p in (w1, b1, w2, b2, w3, b3))

    def run_case(B, T, case_key):
        ky, kt = jax.random.split(case_key)
        y0 = jax.random.normal(ky, (B, SIZE), jnp.float32)
        # strictly increasing time grids per batch element, starting at 0
        dts = 0.1 + 0.2 * jax.random.uniform(kt, (B, T), jnp.float32)
        t = jnp.cumsum(dts, axis=1) - dts[:, :1]
        out = jax.block_until_ready(custom_odeint(y0, t, w1, b1, w2, b2, w3, b3))
        ref = custom_odeint_ref(np.asarray(y0), np.asarray(t), params_np)
        assert out.shape == (B, T, SIZE)
        np.testing.assert_allclose(np.asarray(out), ref, rtol=2e-5, atol=2e-5)

    # Tiny case from the module spec: single 128-lane tile.
    run_case(2, 8, kc1)
    # Larger batch: exercises the 256-lane tiles + multi-tile "parallel" grid path.
    run_case(260, 8, kc2)

    print("KERNEL_OK")
</pallas_src>

<mosaic_0001>
module attributes {stable_mosaic.version = 11 : i64} {
  func.func @ode_rk4_kernel(%arg0: i32, %arg1: memref<8x128xf32, #tpu.memory_space<vmem>>, %arg2: memref<8x128xf32, #tpu.memory_space<vmem>>, %arg3: memref<32x1xf32, #tpu.memory_space<vmem>>, %arg4: memref<32x8xf32, #tpu.memory_space<vmem>>, %arg5: memref<32x1xf32, #tpu.memory_space<vmem>>, %arg6: memref<32x32xf32, #tpu.memory_space<vmem>>, %arg7: memref<32x1xf32, #tpu.memory_space<vmem>>, %arg8: memref<8x32xf32, #tpu.memory_space<vmem>>, %arg9: memref<8x1xf32, #tpu.memory_space<vmem>>, %arg10: memref<8x8x128xf32, #tpu.memory_space<vmem>>) attributes {dimension_semantics = [#tpu.dimension_semantics<parallel>], iteration_bounds = array<i64: 1>, scalar_prefetch = 0 : i64, scratch_operands = 0 : i64, tpu.core_type = #tpu.core_type<tc>, window_params = [{transform_indices = @transform_0, window_bounds = array<i64: 8, 128>}, {transform_indices = @transform_1, window_bounds = array<i64: 8, 128>}, {pipeline_mode = #tpu.pipeline_mode<synchronous>, transform_indices = @transform_2, window_bounds = array<i64: 32, 1>}, {pipeline_mode = #tpu.pipeline_mode<synchronous>, transform_indices = @transform_3, window_bounds = array<i64: 32, 8>}, {pipeline_mode = #tpu.pipeline_mode<synchronous>, transform_indices = @transform_4, window_bounds = array<i64: 32, 1>}, {pipeline_mode = #tpu.pipeline_mode<synchronous>, transform_indices = @transform_5, window_bounds = array<i64: 32, 32>}, {pipeline_mode = #tpu.pipeline_mode<synchronous>, transform_indices = @transform_6, window_bounds = array<i64: 32, 1>}, {pipeline_mode = #tpu.pipeline_mode<synchronous>, transform_indices = @transform_7, window_bounds = array<i64: 8, 32>}, {pipeline_mode = #tpu.pipeline_mode<synchronous>, transform_indices = @transform_8, window_bounds = array<i64: 8, 1>}, {transform_indices = @transform_9, window_bounds = array<i64: 8, 8, 128>}]} {
    %c0 = arith.constant 0 : index
    %c0_0 = arith.constant 0 : index
    %0 = vector.load %arg4[%c0, %c0_0] : memref<32x8xf32, #tpu.memory_space<vmem>>, vector<32x8xf32>
    %c0_1 = arith.constant 0 : index
    %c0_2 = arith.constant 0 : index
    %1 = vector.load %arg6[%c0_1, %c0_2] : memref<32x32xf32, #tpu.memory_space<vmem>>, vector<32x32xf32>
    %c0_3 = arith.constant 0 : index
    %c0_4 = arith.constant 0 : index
    %2 = vector.load %arg8[%c0_3, %c0_4] : memref<8x32xf32, #tpu.memory_space<vmem>>, vector<8x32xf32>
    %c0_5 = arith.constant 0 : index
    %c0_6 = arith.constant 0 : index
    %3 = vector.load %arg3[%c0_5, %c0_6] : memref<32x1xf32, #tpu.memory_space<vmem>>, vector<32x1xf32>
    %4 = vector.shape_cast %3 : vector<32x1xf32> to vector<32x1xf32>
    %5 = vector.broadcast %4 : vector<32x1xf32> to vector<32x128xf32>
    %c0_7 = arith.constant 0 : index
    %c0_8 = arith.constant 0 : index
    %6 = vector.load %arg5[%c0_7, %c0_8] : memref<32x1xf32, #tpu.memory_space<vmem>>, vector<32x1xf32>
    %7 = vector.shape_cast %6 : vector<32x1xf32> to vector<32x1xf32>
    %8 = vector.broadcast %7 : vector<32x1xf32> to vector<32x128xf32>
    %c0_9 = arith.constant 0 : index
    %c0_10 = arith.constant 0 : index
    %9 = vector.load %arg7[%c0_9, %c0_10] : memref<32x1xf32, #tpu.memory_space<vmem>>, vector<32x1xf32>
    %10 = vector.shape_cast %9 : vector<32x1xf32> to vector<32x1xf32>
    %11 = vector.broadcast %10 : vector<32x1xf32> to vector<32x128xf32>
    %c0_11 = arith.constant 0 : index
    %c0_12 = arith.constant 0 : index
    %12 = vector.load %arg9[%c0_11, %c0_12] : memref<8x1xf32, #tpu.memory_space<vmem>>, vector<8x1xf32>
    %13 = vector.shape_cast %12 : vector<8x1xf32> to vector<8x1xf32>
    %14 = vector.broadcast %13 : vector<8x1xf32> to vector<8x128xf32>
    %c0_13 = arith.constant 0 : index
    %c0_14 = arith.constant 0 : index
    %15 = vector.load %arg1[%c0_13, %c0_14] : memref<8x128xf32, #tpu.memory_space<vmem>>, vector<8x128xf32>
    %c0_15 = arith.constant 0 : index
    %c0_16 = arith.constant 0 : index
    %16 = vector.load %arg2[%c0_15, %c0_16] : memref<8x128xf32, #tpu.memory_space<vmem>>, vector<8x128xf32>
    %c0_17 = arith.constant 0 : index
    %c0_18 = arith.constant 0 : index
    %c0_19 = arith.constant 0 : index
    %17 = vector.load %arg10[%c0_17, %c0_18, %c0_19] : memref<8x8x128xf32, #tpu.memory_space<vmem>>, vector<1x8x128xf32>
    %18 = vector.shape_cast %17 : vector<1x8x128xf32> to vector<8x128xf32>
    %19 = vector.shape_cast %16 : vector<8x128xf32> to vector<1x8x128xf32>
    tpu.vector_store %arg10[%c0_17, %c0_18, %c0_19], %19 {strides = array<i32>} : memref<8x8x128xf32, #tpu.memory_space<vmem>>, vector<1x8x128xf32>,
    %20 = vector.extract_strided_slice %15 {offsets = [0, 0], sizes = [1, 128], strides = [1, 1]} : vector<8x128xf32> to vector<1x128xf32>
    %21 = vector.extract_strided_slice %15 {offsets = [1, 0], sizes = [1, 128], strides = [1, 1]} : vector<8x128xf32> to vector<1x128xf32>
    %22 = arith.subf %21, %20 : vector<1x128xf32>
    %cst = arith.constant 5.000000e-01 : f32
    %23 = vector.broadcast %cst : f32 to vector<1x128xf32>
    %24 = arith.mulf %22, %23 : vector<1x128xf32>
    %25 = arith.addf %20, %24 : vector<1x128xf32>
    %26 = vector.shape_cast %22 : vector<1x128xf32> to vector<1x128xf32>
    %27 = vector.broadcast %26 : vector<1x128xf32> to vector<8x128xf32>
    %cst_20 = arith.constant 5.000000e-01 : f32
    %28 = vector.broadcast %cst_20 : f32 to vector<8x128xf32>
    %29 = arith.mulf %27, %28 : vector<8x128xf32>
    %cst_21 = arith.constant 0.166666672 : f32
    %30 = vector.broadcast %cst_21 : f32 to vector<8x128xf32>
    %31 = arith.mulf %27, %30 : vector<8x128xf32>
    %32 = vector.broadcast %20 : vector<1x128xf32> to vector<32x128xf32>
    %33 = arith.mulf %5, %32 : vector<32x128xf32>
    %34 = arith.addf %33, %8 : vector<32x128xf32>
    %35 = vector.broadcast %25 : vector<1x128xf32> to vector<32x128xf32>
    %36 = arith.mulf %5, %35 : vector<32x128xf32>
    %37 = arith.addf %36, %8 : vector<32x128xf32>
    %38 = vector.broadcast %21 : vector<1x128xf32> to vector<32x128xf32>
    %39 = arith.mulf %5, %38 : vector<32x128xf32>
    %40 = arith.addf %39, %8 : vector<32x128xf32>
    %cst_22 = arith.constant dense<0.000000e+00> : vector<32x128xf32>
    %41 = tpu.matmul %0, %16, %cst_22 {dimension_numbers = #tpu.dot_dimension_numbers<[1], [0], [0], [1], [0, 0, 1, 1], [], []>} : vector<32x8xf32>, vector<8x128xf32>, vector<32x128xf32> -> vector<32x128xf32>
    %42 = arith.addf %41, %34 : vector<32x128xf32>
    %43 = math.tanh %42 : vector<32x128xf32>
    %cst_23 = arith.constant dense<0.000000e+00> : vector<32x128xf32>
    %44 = tpu.matmul %1, %43, %cst_23 {dimension_numbers = #tpu.dot_dimension_numbers<[1], [0], [0], [1], [0, 0, 1, 1], [], []>} : vector<32x32xf32>, vector<32x128xf32>, vector<32x128xf32> -> vector<32x128xf32>
    %45 = arith.addf %44, %11 : vector<32x128xf32>
    %46 = math.tanh %45 : vector<32x128xf32>
    %cst_24 = arith.constant dense<0.000000e+00> : vector<8x128xf32>
    %47 = tpu.matmul %2, %46, %cst_24 {dimension_numbers = #tpu.dot_dimension_numbers<[1], [0], [0], [1], [0, 0, 1, 1], [], []>} : vector<8x32xf32>, vector<32x128xf32>, vector<8x128xf32> -> vector<8x128xf32>
    %48 = arith.addf %47, %14 : vector<8x128xf32>
    %49 = math.tanh %48 : vector<8x128xf32>
    %50 = arith.mulf %29, %49 : vector<8x128xf32>
    %51 = arith.addf %16, %50 : vector<8x128xf32>
    %cst_25 = arith.constant dense<0.000000e+00> : vector<32x128xf32>
    %52 = tpu.matmul %0, %51, %cst_25 {dimension_numbers = #tpu.dot_dimension_numbers<[1], [0], [0], [1], [0, 0, 1, 1], [], []>} : vector<32x8xf32>, vector<8x128xf32>, vector<32x128xf32> -> vector<32x128xf32>
    %53 = arith.addf %52, %37 : vector<32x128xf32>
    %54 = math.tanh %53 : vector<32x128xf32>
    %cst_26 = arith.constant dense<0.000000e+00> : vector<32x128xf32>
    %55 = tpu.matmul %1, %54, %cst_26 {dimension_numbers = #tpu.dot_dimension_numbers<[1], [0], [0], [1], [0, 0, 1, 1], [], []>} : vector<32x32xf32>, vector<32x128xf32>, vector<32x128xf32> -> vector<32x128xf32>
    %56 = arith.addf %55, %11 : vector<32x128xf32>
    %57 = math.tanh %56 : vector<32x128xf32>
    %cst_27 = arith.constant dense<0.000000e+00> : vector<8x128xf32>
    %58 = tpu.matmul %2, %57, %cst_27 {dimension_numbers = #tpu.dot_dimension_numbers<[1], [0], [0], [1], [0, 0, 1, 1], [], []>} : vector<8x32xf32>, vector<32x128xf32>, vector<8x128xf32> -> vector<8x128xf32>
    %59 = arith.addf %58, %14 : vector<8x128xf32>
    %60 = math.tanh %59 : vector<8x128xf32>
    %61 = arith.mulf %29, %60 : vector<8x128xf32>
    %62 = arith.addf %16, %61 : vector<8x128xf32>
    %cst_28 = arith.constant dense<0.000000e+00> : vector<32x128xf32>
    %63 = tpu.matmul %0, %62, %cst_28 {dimension_numbers = #tpu.dot_dimension_numbers<[1], [0], [0], [1], [0, 0, 1, 1], [], []>} : vector<32x8xf32>, vector<8x128xf32>, vector<32x128xf32> -> vector<32x128xf32>
    %64 = arith.addf %63, %37 : vector<32x128xf32>
    %65 = math.tanh %64 : vector<32x128xf32>
    %cst_29 = arith.constant dense<0.000000e+00> : vector<32x128xf32>
    %66 = tpu.matmul %1, %65, %cst_29 {dimension_numbers = #tpu.dot_dimension_numbers<[1], [0], [0], [1], [0, 0, 1, 1], [], []>} : vector<32x32xf32>, vector<32x128xf32>, vector<32x128xf32> -> vector<32x128xf32>
    %67 = arith.addf %66, %11 : vector<32x128xf32>
    %68 = math.tanh %67 : vector<32x128xf32>
    %cst_30 = arith.constant dense<0.000000e+00> : vector<8x128xf32>
    %69 = tpu.matmul %2, %68, %cst_30 {dimension_numbers = #tpu.dot_dimension_numbers<[1], [0], [0], [1], [0, 0, 1, 1], [], []>} : vector<8x32xf32>, vector<32x128xf32>, vector<8x128xf32> -> vector<8x128xf32>
    %70 = arith.addf %69, %14 : vector<8x128xf32>
    %71 = math.tanh %70 : vector<8x128xf32>
    %72 = arith.mulf %27, %71 : vector<8x128xf32>
    %73 = arith.addf %16, %72 : vector<8x128xf32>
    %cst_31 = arith.constant dense<0.000000e+00> : vector<32x128xf32>
    %74 = tpu.matmul %0, %73, %cst_31 {dimension_numbers = #tpu.dot_dimension_numbers<[1], [0], [0], [1], [0, 0, 1, 1], [], []>} : vector<32x8xf32>, vector<8x128xf32>, vector<32x128xf32> -> vector<32x128xf32>
    %75 = arith.addf %74, %40 : vector<32x128xf32>
    %76 = math.tanh %75 : vector<32x128xf32>
    %cst_32 = arith.constant dense<0.000000e+00> : vector<32x128xf32>
    %77 = tpu.matmul %1, %76, %cst_32 {dimension_numbers = #tpu.dot_dimension_numbers<[1], [0], [0], [1], [0, 0, 1, 1], [], []>} : vector<32x32xf32>, vector<32x128xf32>, vector<32x128xf32> -> vector<32x128xf32>
    %78 = arith.addf %77, %11 : vector<32x128xf32>
    %79 = math.tanh %78 : vector<32x128xf32>
    %cst_33 = arith.constant dense<0.000000e+00> : vector<8x128xf32>
    %80 = tpu.matmul %2, %79, %cst_33 {dimension_numbers = #tpu.dot_dimension_numbers<[1], [0], [0], [1], [0, 0, 1, 1], [], []>} : vector<8x32xf32>, vector<32x128xf32>, vector<8x128xf32> -> vector<8x128xf32>
    %81 = arith.addf %80, %14 : vector<8x128xf32>
    %82 = math.tanh %81 : vector<8x128xf32>
    %cst_34 = arith.constant 2.000000e+00 : f32
    %83 = vector.broadcast %cst_34 : f32 to vector<8x128xf32>
    %84 = arith.mulf %83, %60 : vector<8x128xf32>
    %85 = arith.addf %49, %84 : vector<8x128xf32>
    %cst_35 = arith.constant 2.000000e+00 : f32
    %86 = vector.broadcast %cst_35 : f32 to vector<8x128xf32>
    %87 = arith.mulf %86, %71 : vector<8x128xf32>
    %88 = arith.addf %85, %87 : vector<8x128xf32>
    %89 = arith.addf %88, %82 : vector<8x128xf32>
    %90 = arith.mulf %31, %89 : vector<8x128xf32>
    %91 = arith.addf %16, %90 : vector<8x128xf32>
    %c1 = arith.constant 1 : index
    %c0_36 = arith.constant 0 : index
    %c0_37 = arith.constant 0 : index
    %92 = vector.load %arg10[%c1, %c0_36, %c0_37] : memref<8x8x128xf32, #tpu.memory_space<vmem>>, vector<1x8x128xf32>
    %93 = vector.shape_cast %92 : vector<1x8x128xf32> to vector<8x128xf32>
    %94 = vector.shape_cast %91 : vector<8x128xf32> to vector<1x8x128xf32>
    tpu.vector_store %arg10[%c1, %c0_36, %c0_37], %94 {strides = array<i32>} : memref<8x8x128xf32, #tpu.memory_space<vmem>>, vector<1x8x128xf32>,
    %95 = vector.extract_strided_slice %15 {offsets = [2, 0], sizes = [1, 128], strides = [1, 1]} : vector<8x128xf32> to vector<1x128xf32>
    %96 = arith.subf %95, %21 : vector<1x128xf32>
    %cst_38 = arith.constant 5.000000e-01 : f32
    %97 = vector.broadcast %cst_38 : f32 to vector<1x128xf32>
    %98 = arith.mulf %96, %97 : vector<1x128xf32>
    %99 = arith.addf %21, %98 : vector<1x128xf32>
    %100 = vector.shape_cast %96 : vector<1x128xf32> to vector<1x128xf32>
    %101 = vector.broadcast %100 : vector<1x128xf32> to vector<8x128xf32>
    %cst_39 = arith.constant 5.000000e-01 : f32
    %102 = vector.broadcast %cst_39 : f32 to vector<8x128xf32>
    %103 = arith.mulf %101, %102 : vector<8x128xf32>
    %cst_40 = arith.constant 0.166666672 : f32
    %104 = vector.broadcast %cst_40 : f32 to vector<8x128xf32>
    %105 = arith.mulf %101, %104 : vector<8x128xf32>
    %106 = vector.broadcast %21 : vector<1x128xf32> to vector<32x128xf32>
    %107 = arith.mulf %5, %106 : vector<32x128xf32>
    %108 = arith.addf %107, %8 : vector<32x128xf32>
    %109 = vector.broadcast %99 : vector<1x128xf32> to vector<32x128xf32>
    %110 = arith.mulf %5, %109 : vector<32x128xf32>
    %111 = arith.addf %110, %8 : vector<32x128xf32>
    %112 = vector.broadcast %95 : vector<1x128xf32> to vector<32x128xf32>
    %113 = arith.mulf %5, %112 : vector<32x128xf32>
    %114 = arith.addf %113, %8 : vector<32x128xf32>
    %cst_41 = arith.constant dense<0.000000e+00> : vector<32x128xf32>
    %115 = tpu.matmul %0, %91, %cst_41 {dimension_numbers = #tpu.dot_dimension_numbers<[1], [0], [0], [1], [0, 0, 1, 1], [], []>} : vector<32x8xf32>, vector<8x128xf32>, vector<32x128xf32> -> vector<32x128xf32>
    %116 = arith.addf %115, %108 : vector<32x128xf32>
    %117 = math.tanh %116 : vector<32x128xf32>
    %cst_42 = arith.constant dense<0.000000e+00> : vector<32x128xf32>
    %118 = tpu.matmul %1, %117, %cst_42 {dimension_numbers = #tpu.dot_dimension_numbers<[1], [0], [0], [1], [0, 0, 1, 1], [], []>} : vector<32x32xf32>, vector<32x128xf32>, vector<32x128xf32> -> vector<32x128xf32>
    %119 = arith.addf %118, %11 : vector<32x128xf32>
    %120 = math.tanh %119 : vector<32x128xf32>
    %cst_43 = arith.constant dense<0.000000e+00> : vector<8x128xf32>
    %121 = tpu.matmul %2, %120, %cst_43 {dimension_numbers = #tpu.dot_dimension_numbers<[1], [0], [0], [1], [0, 0, 1, 1], [], []>} : vector<8x32xf32>, vector<32x128xf32>, vector<8x128xf32> -> vector<8x128xf32>
    %122 = arith.addf %121, %14 : vector<8x128xf32>
    %123 = math.tanh %122 : vector<8x128xf32>
    %124 = arith.mulf %103, %123 : vector<8x128xf32>
    %125 = arith.addf %91, %124 : vector<8x128xf32>
    %cst_44 = arith.constant dense<0.000000e+00> : vector<32x128xf32>
    %126 = tpu.matmul %0, %125, %cst_44 {dimension_numbers = #tpu.dot_dimension_numbers<[1], [0], [0], [1], [0, 0, 1, 1], [], []>} : vector<32x8xf32>, vector<8x128xf32>, vector<32x128xf32> -> vector<32x128xf32>
    %127 = arith.addf %126, %111 : vector<32x128xf32>
    %128 = math.tanh %127 : vector<32x128xf32>
    %cst_45 = arith.constant dense<0.000000e+00> : vector<32x128xf32>
    %129 = tpu.matmul %1, %128, %cst_45 {dimension_numbers = #tpu.dot_dimension_numbers<[1], [0], [0], [1], [0, 0, 1, 1], [], []>} : vector<32x32xf32>, vector<32x128xf32>, vector<32x128xf32> -> vector<32x128xf32>
    %130 = arith.addf %129, %11 : vector<32x128xf32>
    %131 = math.tanh %130 : vector<32x128xf32>
    %cst_46 = arith.constant dense<0.000000e+00> : vector<8x128xf32>
    %132 = tpu.matmul %2, %131, %cst_46 {dimension_numbers = #tpu.dot_dimension_numbers<[1], [0], [0], [1], [0, 0, 1, 1], [], []>} : vector<8x32xf32>, vector<32x128xf32>, vector<8x128xf32> -> vector<8x128xf32>
    %133 = arith.addf %132, %14 : vector<8x128xf32>
    %134 = math.tanh %133 : vector<8x128xf32>
    %135 = arith.mulf %103, %134 : vector<8x128xf32>
    %136 = arith.addf %91, %135 : vector<8x128xf32>
    %cst_47 = arith.constant dense<0.000000e+00> : vector<32x128xf32>
    %137 = tpu.matmul %0, %136, %cst_47 {dimension_numbers = #tpu.dot_dimension_numbers<[1], [0], [0], [1], [0, 0, 1, 1], [], []>} : vector<32x8xf32>, vector<8x128xf32>, vector<32x128xf32> -> vector<32x128xf32>
    %138 = arith.addf %137, %111 : vector<32x128xf32>
    %139 = math.tanh %138 : vector<32x128xf32>
    %cst_48 = arith.constant dense<0.000000e+00> : vector<32x128xf32>
    %140 = tpu.matmul %1, %139, %cst_48 {dimension_numbers = #tpu.dot_dimension_numbers<[1], [0], [0], [1], [0, 0, 1, 1], [], []>} : vector<32x32xf32>, vector<32x128xf32>, vector<32x128xf32> -> vector<32x128xf32>
    %141 = arith.addf %140, %11 : vector<32x128xf32>
    %142 = math.tanh %141 : vector<32x128xf32>
    %cst_49 = arith.constant dense<0.000000e+00> : vector<8x128xf32>
    %143 = tpu.matmul %2, %142, %cst_49 {dimension_numbers = #tpu.dot_dimension_numbers<[1], [0], [0], [1], [0, 0, 1, 1], [], []>} : vector<8x32xf32>, vector<32x128xf32>, vector<8x128xf32> -> vector<8x128xf32>
    %144 = arith.addf %143, %14 : vector<8x128xf32>
    %145 = math.tanh %144 : vector<8x128xf32>
    %146 = arith.mulf %101, %145 : vector<8x128xf32>
    %147 = arith.addf %91, %146 : vector<8x128xf32>
    %cst_50 = arith.constant dense<0.000000e+00> : vector<32x128xf32>
    %148 = tpu.matmul %0, %147, %cst_50 {dimension_numbers = #tpu.dot_dimension_numbers<[1], [0], [0], [1], [0, 0, 1, 1], [], []>} : vector<32x8xf32>, vector<8x128xf32>, vector<32x128xf32> -> vector<32x128xf32>
    %149 = arith.addf %148, %114 : vector<32x128xf32>
    %150 = math.tanh %149 : vector<32x128xf32>
    %cst_51 = arith.constant dense<0.000000e+00> : vector<32x128xf32>
    %151 = tpu.matmul %1, %150, %cst_51 {dimension_numbers = #tpu.dot_dimension_numbers<[1], [0], [0], [1], [0, 0, 1, 1], [], []>} : vector<32x32xf32>, vector<32x128xf32>, vector<32x128xf32> -> vector<32x128xf32>
    %152 = arith.addf %151, %11 : vector<32x128xf32>
    %153 = math.tanh %152 : vector<32x128xf32>
    %cst_52 = arith.constant dense<0.000000e+00> : vector<8x128xf32>
    %154 = tpu.matmul %2, %153, %cst_52 {dimension_numbers = #tpu.dot_dimension_numbers<[1], [0], [0], [1], [0, 0, 1, 1], [], []>} : vector<8x32xf32>, vector<32x128xf32>, vector<8x128xf32> -> vector<8x128xf32>
    %155 = arith.addf %154, %14 : vector<8x128xf32>
    %156 = math.tanh %155 : vector<8x128xf32>
    %cst_53 = arith.constant 2.000000e+00 : f32
    %157 = vector.broadcast %cst_53 : f32 to vector<8x128xf32>
    %158 = arith.mulf %157, %134 : vector<8x128xf32>
    %159 = arith.addf %123, %158 : vector<8x128xf32>
    %cst_54 = arith.constant 2.000000e+00 : f32
    %160 = vector.broadcast %cst_54 : f32 to vector<8x128xf32>
    %161 = arith.mulf %160, %145 : vector<8x128xf32>
    %162 = arith.addf %159, %161 : vector<8x128xf32>
    %163 = arith.addf %162, %156 : vector<8x128xf32>
    %164 = arith.mulf %105, %163 : vector<8x128xf32>
    %165 = arith.addf %91, %164 : vector<8x128xf32>
    %c2 = arith.constant 2 : index
    %c0_55 = arith.constant 0 : index
    %c0_56 = arith.constant 0 : index
    %166 = vector.load %arg10[%c2, %c0_55, %c0_56] : memref<8x8x128xf32, #tpu.memory_space<vmem>>, vector<1x8x128xf32>
    %167 = vector.shape_cast %166 : vector<1x8x128xf32> to vector<8x128xf32>
    %168 = vector.shape_cast %165 : vector<8x128xf32> to vector<1x8x128xf32>
    tpu.vector_store %arg10[%c2, %c0_55, %c0_56], %168 {strides = array<i32>} : memref<8x8x128xf32, #tpu.memory_space<vmem>>, vector<1x8x128xf32>,
    %169 = vector.extract_strided_slice %15 {offsets = [3, 0], sizes = [1, 128], strides = [1, 1]} : vector<8x128xf32> to vector<1x128xf32>
    %170 = arith.subf %169, %95 : vector<1x128xf32>
    %cst_57 = arith.constant 5.000000e-01 : f32
    %171 = vector.broadcast %cst_57 : f32 to vector<1x128xf32>
    %172 = arith.mulf %170, %171 : vector<1x128xf32>
    %173 = arith.addf %95, %172 : vector<1x128xf32>
    %174 = vector.shape_cast %170 : vector<1x128xf32> to vector<1x128xf32>
    %175 = vector.broadcast %174 : vector<1x128xf32> to vector<8x128xf32>
    %cst_58 = arith.constant 5.000000e-01 : f32
    %176 = vector.broadcast %cst_58 : f32 to vector<8x128xf32>
    %177 = arith.mulf %175, %176 : vector<8x128xf32>
    %cst_59 = arith.constant 0.166666672 : f32
    %178 = vector.broadcast %cst_59 : f32 to vector<8x128xf32>
    %179 = arith.mulf %175, %178 : vector<8x128xf32>
    %180 = vector.broadcast %95 : vector<1x128xf32> to vector<32x128xf32>
    %181 = arith.mulf %5, %180 : vector<32x128xf32>
    %182 = arith.addf %181, %8 : vector<32x128xf32>
    %183 = vector.broadcast %173 : vector<1x128xf32> to vector<32x128xf32>
    %184 = arith.mulf %5, %183 : vector<32x128xf32>
    %185 = arith.addf %184, %8 : vector<32x128xf32>
    %186 = vector.broadcast %169 : vector<1x128xf32> to vector<32x128xf32>
    %187 = arith.mulf %5, %186 : vector<32x128xf32>
    %188 = arith.addf %187, %8 : vector<32x128xf32>
    %cst_60 = arith.constant dense<0.000000e+00> : vector<32x128xf32>
    %189 = tpu.matmul %0, %165, %cst_60 {dimension_numbers = #tpu.dot_dimension_numbers<[1], [0], [0], [1], [0, 0, 1, 1], [], []>} : vector<32x8xf32>, vector<8x128xf32>, vector<32x128xf32> -> vector<32x128xf32>
    %190 = arith.addf %189, %182 : vector<32x128xf32>
    %191 = math.tanh %190 : vector<32x128xf32>
    %cst_61 = arith.constant dense<0.000000e+00> : vector<32x128xf32>
    %192 = tpu.matmul %1, %191, %cst_61 {dimension_numbers = #tpu.dot_dimension_numbers<[1], [0], [0], [1], [0, 0, 1, 1], [], []>} : vector<32x32xf32>, vector<32x128xf32>, vector<32x128xf32> -> vector<32x128xf32>
    %193 = arith.addf %192, %11 : vector<32x128xf32>
    %194 = math.tanh %193 : vector<32x128xf32>
    %cst_62 = arith.constant dense<0.000000e+00> : vector<8x128xf32>
    %195 = tpu.matmul %2, %194, %cst_62 {dimension_numbers = #tpu.dot_dimension_numbers<[1], [0], [0], [1], [0, 0, 1, 1], [], []>} : vector<8x32xf32>, vector<32x128xf32>, vector<8x128xf32> -> vector<8x128xf32>
    %196 = arith.addf %195, %14 : vector<8x128xf32>
    %197 = math.tanh %196 : vector<8x128xf32>
    %198 = arith.mulf %177, %197 : vector<8x128xf32>
    %199 = arith.addf %165, %198 : vector<8x128xf32>
    %cst_63 = arith.constant dense<0.000000e+00> : vector<32x128xf32>
    %200 = tpu.matmul %0, %199, %cst_63 {dimension_numbers = #tpu.dot_dimension_numbers<[1], [0], [0], [1], [0, 0, 1, 1], [], []>} : vector<32x8xf32>, vector<8x128xf32>, vector<32x128xf32> -> vector<32x128xf32>
    %201 = arith.addf %200, %185 : vector<32x128xf32>
    %202 = math.tanh %201 : vector<32x128xf32>
    %cst_64 = arith.constant dense<0.000000e+00> : vector<32x128xf32>
    %203 = tpu.matmul %1, %202, %cst_64 {dimension_numbers = #tpu.dot_dimension_numbers<[1], [0], [0], [1], [0, 0, 1, 1], [], []>} : vector<32x32xf32>, vector<32x128xf32>, vector<32x128xf32> -> vector<32x128xf32>
    %204 = arith.addf %203, %11 : vector<32x128xf32>
    %205 = math.tanh %204 : vector<32x128xf32>
    %cst_65 = arith.constant dense<0.000000e+00> : vector<8x128xf32>
    %206 = tpu.matmul %2, %205, %cst_65 {dimension_numbers = #tpu.dot_dimension_numbers<[1], [0], [0], [1], [0, 0, 1, 1], [], []>} : vector<8x32xf32>, vector<32x128xf32>, vector<8x128xf32> -> vector<8x128xf32>
    %207 = arith.addf %206, %14 : vector<8x128xf32>
    %208 = math.tanh %207 : vector<8x128xf32>
    %209 = arith.mulf %177, %208 : vector<8x128xf32>
    %210 = arith.addf %165, %209 : vector<8x128xf32>
    %cst_66 = arith.constant dense<0.000000e+00> : vector<32x128xf32>
    %211 = tpu.matmul %0, %210, %cst_66 {dimension_numbers = #tpu.dot_dimension_numbers<[1], [0], [0], [1], [0, 0, 1, 1], [], []>} : vector<32x8xf32>, vector<8x128xf32>, vector<32x128xf32> -> vector<32x128xf32>
    %212 = arith.addf %211, %185 : vector<32x128xf32>
    %213 = math.tanh %212 : vector<32x128xf32>
    %cst_67 = arith.constant dense<0.000000e+00> : vector<32x128xf32>
    %214 = tpu.matmul %1, %213, %cst_67 {dimension_numbers = #tpu.dot_dimension_numbers<[1], [0], [0], [1], [0, 0, 1, 1], [], []>} : vector<32x32xf32>, vector<32x128xf32>, vector<32x128xf32> -> vector<32x128xf32>
    %215 = arith.addf %214, %11 : vector<32x128xf32>
    %216 = math.tanh %215 : vector<32x128xf32>
    %cst_68 = arith.constant dense<0.000000e+00> : vector<8x128xf32>
    %217 = tpu.matmul %2, %216, %cst_68 {dimension_numbers = #tpu.dot_dimension_numbers<[1], [0], [0], [1], [0, 0, 1, 1], [], []>} : vector<8x32xf32>, vector<32x128xf32>, vector<8x128xf32> -> vector<8x128xf32>
    %218 = arith.addf %217, %14 : vector<8x128xf32>
    %219 = math.tanh %218 : vector<8x128xf32>
    %220 = arith.mulf %175, %219 : vector<8x128xf32>
    %221 = arith.addf %165, %220 : vector<8x128xf32>
    %cst_69 = arith.constant dense<0.000000e+00> : vector<32x128xf32>
    %222 = tpu.matmul %0, %221, %cst_69 {dimension_numbers = #tpu.dot_dimension_numbers<[1], [0], [0], [1], [0, 0, 1, 1], [], []>} : vector<32x8xf32>, vector<8x128xf32>, vector<32x128xf32> -> vector<32x128xf32>
    %223 = arith.addf %222, %188 : vector<32x128xf32>
    %224 = math.tanh %223 : vector<32x128xf32>
    %cst_70 = arith.constant dense<0.000000e+00> : vector<32x128xf32>
    %225 = tpu.matmul %1, %224, %cst_70 {dimension_numbers = #tpu.dot_dimension_numbers<[1], [0], [0], [1], [0, 0, 1, 1], [], []>} : vector<32x32xf32>, vector<32x128xf32>, vector<32x128xf32> -> vector<32x128xf32>
    %226 = arith.addf %225, %11 : vector<32x128xf32>
    %227 = math.tanh %226 : vector<32x128xf32>
    %cst_71 = arith.constant dense<0.000000e+00> : vector<8x128xf32>
    %228 = tpu.matmul %2, %227, %cst_71 {dimension_numbers = #tpu.dot_dimension_numbers<[1], [0], [0], [1], [0, 0, 1, 1], [], []>} : vector<8x32xf32>, vector<32x128xf32>, vector<8x128xf32> -> vector<8x128xf32>
    %229 = arith.addf %228, %14 : vector<8x128xf32>
    %230 = math.tanh %229 : vector<8x128xf32>
    %cst_72 = arith.constant 2.000000e+00 : f32
    %231 = vector.broadcast %cst_72 : f32 to vector<8x128xf32>
    %232 = arith.mulf %231, %208 : vector<8x128xf32>
    %233 = arith.addf %197, %232 : vector<8x128xf32>
    %cst_73 = arith.constant 2.000000e+00 : f32
    %234 = vector.broadcast %cst_73 : f32 to vector<8x128xf32>
    %235 = arith.mulf %234, %219 : vector<8x128xf32>
    %236 = arith.addf %233, %235 : vector<8x128xf32>
    %237 = arith.addf %236, %230 : vector<8x128xf32>
    %238 = arith.mulf %179, %237 : vector<8x128xf32>
    %239 = arith.addf %165, %238 : vector<8x128xf32>
    %c3 = arith.constant 3 : index
    %c0_74 = arith.constant 0 : index
    %c0_75 = arith.constant 0 : index
    %240 = vector.load %arg10[%c3, %c0_74, %c0_75] : memref<8x8x128xf32, #tpu.memory_space<vmem>>, vector<1x8x128xf32>
    %241 = vector.shape_cast %240 : vector<1x8x128xf32> to vector<8x128xf32>
    %242 = vector.shape_cast %239 : vector<8x128xf32> to vector<1x8x128xf32>
    tpu.vector_store %arg10[%c3, %c0_74, %c0_75], %242 {strides = array<i32>} : memref<8x8x128xf32, #tpu.memory_space<vmem>>, vector<1x8x128xf32>,
    %243 = vector.extract_strided_slice %15 {offsets = [4, 0], sizes = [1, 128], strides = [1, 1]} : vector<8x128xf32> to vector<1x128xf32>
    %244 = arith.subf %243, %169 : vector<1x128xf32>
    %cst_76 = arith.constant 5.000000e-01 : f32
    %245 = vector.broadcast %cst_76 : f32 to vector<1x128xf32>
    %246 = arith.mulf %244, %245 : vector<1x128xf32>
    %247 = arith.addf %169, %246 : vector<1x128xf32>
    %248 = vector.shape_cast %244 : vector<1x128xf32> to vector<1x128xf32>
    %249 = vector.broadcast %248 : vector<1x128xf32> to vector<8x128xf32>
    %cst_77 = arith.constant 5.000000e-01 : f32
    %250 = vector.broadcast %cst_77 : f32 to vector<8x128xf32>
    %251 = arith.mulf %249, %250 : vector<8x128xf32>
    %cst_78 = arith.constant 0.166666672 : f32
    %252 = vector.broadcast %cst_78 : f32 to vector<8x128xf32>
    %253 = arith.mulf %249, %252 : vector<8x128xf32>
    %254 = vector.broadcast %169 : vector<1x128xf32> to vector<32x128xf32>
    %255 = arith.mulf %5, %254 : vector<32x128xf32>
    %256 = arith.addf %255, %8 : vector<32x128xf32>
    %257 = vector.broadcast %247 : vector<1x128xf32> to vector<32x128xf32>
    %258 = arith.mulf %5, %257 : vector<32x128xf32>
    %259 = arith.addf %258, %8 : vector<32x128xf32>
    %260 = vector.broadcast %243 : vector<1x128xf32> to vector<32x128xf32>
    %261 = arith.mulf %5, %260 : vector<32x128xf32>
    %262 = arith.addf %261, %8 : vector<32x128xf32>
    %cst_79 = arith.constant dense<0.000000e+00> : vector<32x128xf32>
    %263 = tpu.matmul %0, %239, %cst_79 {dimension_numbers = #tpu.dot_dimension_numbers<[1], [0], [0], [1], [0, 0, 1, 1], [], []>} : vector<32x8xf32>, vector<8x128xf32>, vector<32x128xf32> -> vector<32x128xf32>
    %264 = arith.addf %263, %256 : vector<32x128xf32>
    %265 = math.tanh %264 : vector<32x128xf32>
    %cst_80 = arith.constant dense<0.000000e+00> : vector<32x128xf32>
    %266 = tpu.matmul %1, %265, %cst_80 {dimension_numbers = #tpu.dot_dimension_numbers<[1], [0], [0], [1], [0, 0, 1, 1], [], []>} : vector<32x32xf32>, vector<32x128xf32>, vector<32x128xf32> -> vector<32x128xf32>
    %267 = arith.addf %266, %11 : vector<32x128xf32>
    %268 = math.tanh %267 : vector<32x128xf32>
    %cst_81 = arith.constant dense<0.000000e+00> : vector<8x128xf32>
    %269 = tpu.matmul %2, %268, %cst_81 {dimension_numbers = #tpu.dot_dimension_numbers<[1], [0], [0], [1], [0, 0, 1, 1], [], []>} : vector<8x32xf32>, vector<32x128xf32>, vector<8x128xf32> -> vector<8x128xf32>
    %270 = arith.addf %269, %14 : vector<8x128xf32>
    %271 = math.tanh %270 : vector<8x128xf32>
    %272 = arith.mulf %251, %271 : vector<8x128xf32>
    %273 = arith.addf %239, %272 : vector<8x128xf32>
    %cst_82 = arith.constant dense<0.000000e+00> : vector<32x128xf32>
    %274 = tpu.matmul %0, %273, %cst_82 {dimension_numbers = #tpu.dot_dimension_numbers<[1], [0], [0], [1], [0, 0, 1, 1], [], []>} : vector<32x8xf32>, vector<8x128xf32>, vector<32x128xf32> -> vector<32x128xf32>
    %275 = arith.addf %274, %259 : vector<32x128xf32>
    %276 = math.tanh %275 : vector<32x128xf32>
    %cst_83 = arith.constant dense<0.000000e+00> : vector<32x128xf32>
    %277 = tpu.matmul %1, %276, %cst_83 {dimension_numbers = #tpu.dot_dimension_numbers<[1], [0], [0], [1], [0, 0, 1, 1], [], []>} : vector<32x32xf32>, vector<32x128xf32>, vector<32x128xf32> -> vector<32x128xf32>
    %278 = arith.addf %277, %11 : vector<32x128xf32>
    %279 = math.tanh %278 : vector<32x128xf32>
    %cst_84 = arith.constant dense<0.000000e+00> : vector<8x128xf32>
    %280 = tpu.matmul %2, %279, %cst_84 {dimension_numbers = #tpu.dot_dimension_numbers<[1], [0], [0], [1], [0, 0, 1, 1], [], []>} : vector<8x32xf32>, vector<32x128xf32>, vector<8x128xf32> -> vector<8x128xf32>
    %281 = arith.addf %280, %14 : vector<8x128xf32>
    %282 = math.tanh %281 : vector<8x128xf32>
    %283 = arith.mulf %251, %282 : vector<8x128xf32>
    %284 = arith.addf %239, %283 : vector<8x128xf32>
    %cst_85 = arith.constant dense<0.000000e+00> : vector<32x128xf32>
    %285 = tpu.matmul %0, %284, %cst_85 {dimension_numbers = #tpu.dot_dimension_numbers<[1], [0], [0], [1], [0, 0, 1, 1], [], []>} : vector<32x8xf32>, vector<8x128xf32>, vector<32x128xf32> -> vector<32x128xf32>
    %286 = arith.addf %285, %259 : vector<32x128xf32>
    %287 = math.tanh %286 : vector<32x128xf32>
    %cst_86 = arith.constant dense<0.000000e+00> : vector<32x128xf32>
    %288 = tpu.matmul %1, %287, %cst_86 {dimension_numbers = #tpu.dot_dimension_numbers<[1], [0], [0], [1], [0, 0, 1, 1], [], []>} : vector<32x32xf32>, vector<32x128xf32>, vector<32x128xf32> -> vector<32x128xf32>
    %289 = arith.addf %288, %11 : vector<32x128xf32>
    %290 = math.tanh %289 : vector<32x128xf32>
    %cst_87 = arith.constant dense<0.000000e+00> : vector<8x128xf32>
    %291 = tpu.matmul %2, %290, %cst_87 {dimension_numbers = #tpu.dot_dimension_numbers<[1], [0], [0], [1], [0, 0, 1, 1], [], []>} : vector<8x32xf32>, vector<32x128xf32>, vector<8x128xf32> -> vector<8x128xf32>
    %292 = arith.addf %291, %14 : vector<8x128xf32>
    %293 = math.tanh %292 : vector<8x128xf32>
    %294 = arith.mulf %249, %293 : vector<8x128xf32>
    %295 = arith.addf %239, %294 : vector<8x128xf32>
    %cst_88 = arith.constant dense<0.000000e+00> : vector<32x128xf32>
    %296 = tpu.matmul %0, %295, %cst_88 {dimension_numbers = #tpu.dot_dimension_numbers<[1], [0], [0], [1], [0, 0, 1, 1], [], []>} : vector<32x8xf32>, vector<8x128xf32>, vector<32x128xf32> -> vector<32x128xf32>
    %297 = arith.addf %296, %262 : vector<32x128xf32>
    %298 = math.tanh %297 : vector<32x128xf32>
    %cst_89 = arith.constant dense<0.000000e+00> : vector<32x128xf32>
    %299 = tpu.matmul %1, %298, %cst_89 {dimension_numbers = #tpu.dot_dimension_numbers<[1], [0], [0], [1], [0, 0, 1, 1], [], []>} : vector<32x32xf32>, vector<32x128xf32>, vector<32x128xf32> -> vector<32x128xf32>
    %300 = arith.addf %299, %11 : vector<32x128xf32>
    %301 = math.tanh %300 : vector<32x128xf32>
    %cst_90 = arith.constant dense<0.000000e+00> : vector<8x128xf32>
    %302 = tpu.matmul %2, %301, %cst_90 {dimension_numbers = #tpu.dot_dimension_numbers<[1], [0], [0], [1], [0, 0, 1, 1], [], []>} : vector<8x32xf32>, vector<32x128xf32>, vector<8x128xf32> -> vector<8x128xf32>
    %303 = arith.addf %302, %14 : vector<8x128xf32>
    %304 = math.tanh %303 : vector<8x128xf32>
    %cst_91 = arith.constant 2.000000e+00 : f32
    %305 = vector.broadcast %cst_91 : f32 to vector<8x128xf32>
    %306 = arith.mulf %305, %282 : vector<8x128xf32>
    %307 = arith.addf %271, %306 : vector<8x128xf32>
    %cst_92 = arith.constant 2.000000e+00 : f32
    %308 = vector.broadcast %cst_92 : f32 to vector<8x128xf32>
    %309 = arith.mulf %308, %293 : vector<8x128xf32>
    %310 = arith.addf %307, %309 : vector<8x128xf32>
    %311 = arith.addf %310, %304 : vector<8x128xf32>
    %312 = arith.mulf %253, %311 : vector<8x128xf32>
    %313 = arith.addf %239, %312 : vector<8x128xf32>
    %c4 = arith.constant 4 : index
    %c0_93 = arith.constant 0 : index
    %c0_94 = arith.constant 0 : index
    %314 = vector.load %arg10[%c4, %c0_93, %c0_94] : memref<8x8x128xf32, #tpu.memory_space<vmem>>, vector<1x8x128xf32>
    %315 = vector.shape_cast %314 : vector<1x8x128xf32> to vector<8x128xf32>
    %316 = vector.shape_cast %313 : vector<8x128xf32> to vector<1x8x128xf32>
    tpu.vector_store %arg10[%c4, %c0_93, %c0_94], %316 {strides = array<i32>} : memref<8x8x128xf32, #tpu.memory_space<vmem>>, vector<1x8x128xf32>,
    %317 = vector.extract_strided_slice %15 {offsets = [5, 0], sizes = [1, 128], strides = [1, 1]} : vector<8x128xf32> to vector<1x128xf32>
    %318 = arith.subf %317, %243 : vector<1x128xf32>
    %cst_95 = arith.constant 5.000000e-01 : f32
    %319 = vector.broadcast %cst_95 : f32 to vector<1x128xf32>
    %320 = arith.mulf %318, %319 : vector<1x128xf32>
    %321 = arith.addf %243, %320 : vector<1x128xf32>
    %322 = vector.shape_cast %318 : vector<1x128xf32> to vector<1x128xf32>
    %323 = vector.broadcast %322 : vector<1x128xf32> to vector<8x128xf32>
    %cst_96 = arith.constant 5.000000e-01 : f32
    %324 = vector.broadcast %cst_96 : f32 to vector<8x128xf32>
    %325 = arith.mulf %323, %324 : vector<8x128xf32>
    %cst_97 = arith.constant 0.166666672 : f32
    %326 = vector.broadcast %cst_97 : f32 to vector<8x128xf32>
    %327 = arith.mulf %323, %326 : vector<8x128xf32>
    %328 = vector.broadcast %243 : vector<1x128xf32> to vector<32x128xf32>
    %329 = arith.mulf %5, %328 : vector<32x128xf32>
    %330 = arith.addf %329, %8 : vector<32x128xf32>
    %331 = vector.broadcast %321 : vector<1x128xf32> to vector<32x128xf32>
    %332 = arith.mulf %5, %331 : vector<32x128xf32>
    %333 = arith.addf %332, %8 : vector<32x128xf32>
    %334 = vector.broadcast %317 : vector<1x128xf32> to vector<32x128xf32>
    %335 = arith.mulf %5, %334 : vector<32x128xf32>
    %336 = arith.addf %335, %8 : vector<32x128xf32>
    %cst_98 = arith.constant dense<0.000000e+00> : vector<32x128xf32>
    %337 = tpu.matmul %0, %313, %cst_98 {dimension_numbers = #tpu.dot_dimension_numbers<[1], [0], [0], [1], [0, 0, 1, 1], [], []>} : vector<32x8xf32>, vector<8x128xf32>, vector<32x128xf32> -> vector<32x128xf32>
    %338 = arith.addf %337, %330 : vector<32x128xf32>
    %339 = math.tanh %338 : vector<32x128xf32>
    %cst_99 = arith.constant dense<0.000000e+00> : vector<32x128xf32>
    %340 = tpu.matmul %1, %339, %cst_99 {dimension_numbers = #tpu.dot_dimension_numbers<[1], [0], [0], [1], [0, 0, 1, 1], [], []>} : vector<32x32xf32>, vector<32x128xf32>, vector<32x128xf32> -> vector<32x128xf32>
    %341 = arith.addf %340, %11 : vector<32x128xf32>
    %342 = math.tanh %341 : vector<32x128xf32>
    %cst_100 = arith.constant dense<0.000000e+00> : vector<8x128xf32>
    %343 = tpu.matmul %2, %342, %cst_100 {dimension_numbers = #tpu.dot_dimension_numbers<[1], [0], [0], [1], [0, 0, 1, 1], [], []>} : vector<8x32xf32>, vector<32x128xf32>, vector<8x128xf32> -> vector<8x128xf32>
    %344 = arith.addf %343, %14 : vector<8x128xf32>
    %345 = math.tanh %344 : vector<8x128xf32>
    %346 = arith.mulf %325, %345 : vector<8x128xf32>
    %347 = arith.addf %313, %346 : vector<8x128xf32>
    %cst_101 = arith.constant dense<0.000000e+00> : vector<32x128xf32>
    %348 = tpu.matmul %0, %347, %cst_101 {dimension_numbers = #tpu.dot_dimension_numbers<[1], [0], [0], [1], [0, 0, 1, 1], [], []>} : vector<32x8xf32>, vector<8x128xf32>, vector<32x128xf32> -> vector<32x128xf32>
    %349 = arith.addf %348, %333 : vector<32x128xf32>
    %350 = math.tanh %349 : vector<32x128xf32>
    %cst_102 = arith.constant dense<0.000000e+00> : vector<32x128xf32>
    %351 = tpu.matmul %1, %350, %cst_102 {dimension_numbers = #tpu.dot_dimension_numbers<[1], [0], [0], [1], [0, 0, 1, 1], [], []>} : vector<32x32xf32>, vector<32x128xf32>, vector<32x128xf32> -> vector<32x128xf32>
    %352 = arith.addf %351, %11 : vector<32x128xf32>
    %353 = math.tanh %352 : vector<32x128xf32>
    %cst_103 = arith.constant dense<0.000000e+00> : vector<8x128xf32>
    %354 = tpu.matmul %2, %353, %cst_103 {dimension_numbers = #tpu.dot_dimension_numbers<[1], [0], [0], [1], [0, 0, 1, 1], [], []>} : vector<8x32xf32>, vector<32x128xf32>, vector<8x128xf32> -> vector<8x128xf32>
    %355 = arith.addf %354, %14 : vector<8x128xf32>
    %356 = math.tanh %355 : vector<8x128xf32>
    %357 = arith.mulf %325, %356 : vector<8x128xf32>
    %358 = arith.addf %313, %357 : vector<8x128xf32>
    %cst_104 = arith.constant dense<0.000000e+00> : vector<32x128xf32>
    %359 = tpu.matmul %0, %358, %cst_104 {dimension_numbers = #tpu.dot_dimension_numbers<[1], [0], [0], [1], [0, 0, 1, 1], [], []>} : vector<32x8xf32>, vector<8x128xf32>, vector<32x128xf32> -> vector<32x128xf32>
    %360 = arith.addf %359, %333 : vector<32x128xf32>
    %361 = math.tanh %360 : vector<32x128xf32>
    %cst_105 = arith.constant dense<0.000000e+00> : vector<32x128xf32>
    %362 = tpu.matmul %1, %361, %cst_105 {dimension_numbers = #tpu.dot_dimension_numbers<[1], [0], [0], [1], [0, 0, 1, 1], [], []>} : vector<32x32xf32>, vector<32x128xf32>, vector<32x128xf32> -> vector<32x128xf32>
    %363 = arith.addf %362, %11 : vector<32x128xf32>
    %364 = math.tanh %363 : vector<32x128xf32>
    %cst_106 = arith.constant dense<0.000000e+00> : vector<8x128xf32>
    %365 = tpu.matmul %2, %364, %cst_106 {dimension_numbers = #tpu.dot_dimension_numbers<[1], [0], [0], [1], [0, 0, 1, 1], [], []>} : vector<8x32xf32>, vector<32x128xf32>, vector<8x128xf32> -> vector<8x128xf32>
    %366 = arith.addf %365, %14 : vector<8x128xf32>
    %367 = math.tanh %366 : vector<8x128xf32>
    %368 = arith.mulf %323, %367 : vector<8x128xf32>
    %369 = arith.addf %313, %368 : vector<8x128xf32>
    %cst_107 = arith.constant dense<0.000000e+00> : vector<32x128xf32>
    %370 = tpu.matmul %0, %369, %cst_107 {dimension_numbers = #tpu.dot_dimension_numbers<[1], [0], [0], [1], [0, 0, 1, 1], [], []>} : vector<32x8xf32>, vector<8x128xf32>, vector<32x128xf32> -> vector<32x128xf32>
    %371 = arith.addf %370, %336 : vector<32x128xf32>
    %372 = math.tanh %371 : vector<32x128xf32>
    %cst_108 = arith.constant dense<0.000000e+00> : vector<32x128xf32>
    %373 = tpu.matmul %1, %372, %cst_108 {dimension_numbers = #tpu.dot_dimension_numbers<[1], [0], [0], [1], [0, 0, 1, 1], [], []>} : vector<32x32xf32>, vector<32x128xf32>, vector<32x128xf32> -> vector<32x128xf32>
    %374 = arith.addf %373, %11 : vector<32x128xf32>
    %375 = math.tanh %374 : vector<32x128xf32>
    %cst_109 = arith.constant dense<0.000000e+00> : vector<8x128xf32>
    %376 = tpu.matmul %2, %375, %cst_109 {dimension_numbers = #tpu.dot_dimension_numbers<[1], [0], [0], [1], [0, 0, 1, 1], [], []>} : vector<8x32xf32>, vector<32x128xf32>, vector<8x128xf32> -> vector<8x128xf32>
    %377 = arith.addf %376, %14 : vector<8x128xf32>
    %378 = math.tanh %377 : vector<8x128xf32>
    %cst_110 = arith.constant 2.000000e+00 : f32
    %379 = vector.broadcast %cst_110 : f32 to vector<8x128xf32>
    %380 = arith.mulf %379, %356 : vector<8x128xf32>
    %381 = arith.addf %345, %380 : vector<8x128xf32>
    %cst_111 = arith.constant 2.000000e+00 : f32
    %382 = vector.broadcast %cst_111 : f32 to vector<8x128xf32>
    %383 = arith.mulf %382, %367 : vector<8x128xf32>
    %384 = arith.addf %381, %383 : vector<8x128xf32>
    %385 = arith.addf %384, %378 : vector<8x128xf32>
    %386 = arith.mulf %327, %385 : vector<8x128xf32>
    %387 = arith.addf %313, %386 : vector<8x128xf32>
    %c5 = arith.constant 5 : index
    %c0_112 = arith.constant 0 : index
    %c0_113 = arith.constant 0 : index
    %388 = vector.load %arg10[%c5, %c0_112, %c0_113] : memref<8x8x128xf32, #tpu.memory_space<vmem>>, vector<1x8x128xf32>
    %389 = vector.shape_cast %388 : vector<1x8x128xf32> to vector<8x128xf32>
    %390 = vector.shape_cast %387 : vector<8x128xf32> to vector<1x8x128xf32>
    tpu.vector_store %arg10[%c5, %c0_112, %c0_113], %390 {strides = array<i32>} : memref<8x8x128xf32, #tpu.memory_space<vmem>>, vector<1x8x128xf32>,
    %391 = vector.extract_strided_slice %15 {offsets = [6, 0], sizes = [1, 128], strides = [1, 1]} : vector<8x128xf32> to vector<1x128xf32>
    %392 = arith.subf %391, %317 : vector<1x128xf32>
    %cst_114 = arith.constant 5.000000e-01 : f32
    %393 = vector.broadcast %cst_114 : f32 to vector<1x128xf32>
    %394 = arith.mulf %392, %393 : vector<1x128xf32>
    %395 = arith.addf %317, %394 : vector<1x128xf32>
    %396 = vector.shape_cast %392 : vector<1x128xf32> to vector<1x128xf32>
    %397 = vector.broadcast %396 : vector<1x128xf32> to vector<8x128xf32>
    %cst_115 = arith.constant 5.000000e-01 : f32
    %398 = vector.broadcast %cst_115 : f32 to vector<8x128xf32>
    %399 = arith.mulf %397, %398 : vector<8x128xf32>
    %cst_116 = arith.constant 0.166666672 : f32
    %400 = vector.broadcast %cst_116 : f32 to vector<8x128xf32>
    %401 = arith.mulf %397, %400 : vector<8x128xf32>
    %402 = vector.broadcast %317 : vector<1x128xf32> to vector<32x128xf32>
    %403 = arith.mulf %5, %402 : vector<32x128xf32>
    %404 = arith.addf %403, %8 : vector<32x128xf32>
    %405 = vector.broadcast %395 : vector<1x128xf32> to vector<32x128xf32>
    %406 = arith.mulf %5, %405 : vector<32x128xf32>
    %407 = arith.addf %406, %8 : vector<32x128xf32>
    %408 = vector.broadcast %391 : vector<1x128xf32> to vector<32x128xf32>
    %409 = arith.mulf %5, %408 : vector<32x128xf32>
    %410 = arith.addf %409, %8 : vector<32x128xf32>
    %cst_117 = arith.constant dense<0.000000e+00> : vector<32x128xf32>
    %411 = tpu.matmul %0, %387, %cst_117 {dimension_numbers = #tpu.dot_dimension_numbers<[1], [0], [0], [1], [0, 0, 1, 1], [], []>} : vector<32x8xf32>, vector<8x128xf32>, vector<32x128xf32> -> vector<32x128xf32>
    %412 = arith.addf %411, %404 : vector<32x128xf32>
    %413 = math.tanh %412 : vector<32x128xf32>
    %cst_118 = arith.constant dense<0.000000e+00> : vector<32x128xf32>
    %414 = tpu.matmul %1, %413, %cst_118 {dimension_numbers = #tpu.dot_dimension_numbers<[1], [0], [0], [1], [0, 0, 1, 1], [], []>} : vector<32x32xf32>, vector<32x128xf32>, vector<32x128xf32> -> vector<32x128xf32>
    %415 = arith.addf %414, %11 : vector<32x128xf32>
    %416 = math.tanh %415 : vector<32x128xf32>
    %cst_119 = arith.constant dense<0.000000e+00> : vector<8x128xf32>
    %417 = tpu.matmul %2, %416, %cst_119 {dimension_numbers = #tpu.dot_dimension_numbers<[1], [0], [0], [1], [0, 0, 1, 1], [], []>} : vector<8x32xf32>, vector<32x128xf32>, vector<8x128xf32> -> vector<8x128xf32>
    %418 = arith.addf %417, %14 : vector<8x128xf32>
    %419 = math.tanh %418 : vector<8x128xf32>
    %420 = arith.mulf %399, %419 : vector<8x128xf32>
    %421 = arith.addf %387, %420 : vector<8x128xf32>
    %cst_120 = arith.constant dense<0.000000e+00> : vector<32x128xf32>
    %422 = tpu.matmul %0, %421, %cst_120 {dimension_numbers = #tpu.dot_dimension_numbers<[1], [0], [0], [1], [0, 0, 1, 1], [], []>} : vector<32x8xf32>, vector<8x128xf32>, vector<32x128xf32> -> vector<32x128xf32>
    %423 = arith.addf %422, %407 : vector<32x128xf32>
    %424 = math.tanh %423 : vector<32x128xf32>
    %cst_121 = arith.constant dense<0.000000e+00> : vector<32x128xf32>
    %425 = tpu.matmul %1, %424, %cst_121 {dimension_numbers = #tpu.dot_dimension_numbers<[1], [0], [0], [1], [0, 0, 1, 1], [], []>} : vector<32x32xf32>, vector<32x128xf32>, vector<32x128xf32> -> vector<32x128xf32>
    %426 = arith.addf %425, %11 : vector<32x128xf32>
    %427 = math.tanh %426 : vector<32x128xf32>
    %cst_122 = arith.constant dense<0.000000e+00> : vector<8x128xf32>
    %428 = tpu.matmul %2, %427, %cst_122 {dimension_numbers = #tpu.dot_dimension_numbers<[1], [0], [0], [1], [0, 0, 1, 1], [], []>} : vector<8x32xf32>, vector<32x128xf32>, vector<8x128xf32> -> vector<8x128xf32>
    %429 = arith.addf %428, %14 : vector<8x128xf32>
    %430 = math.tanh %429 : vector<8x128xf32>
    %431 = arith.mulf %399, %430 : vector<8x128xf32>
    %432 = arith.addf %387, %431 : vector<8x128xf32>
    %cst_123 = arith.constant dense<0.000000e+00> : vector<32x128xf32>
    %433 = tpu.matmul %0, %432, %cst_123 {dimension_numbers = #tpu.dot_dimension_numbers<[1], [0], [0], [1], [0, 0, 1, 1], [], []>} : vector<32x8xf32>, vector<8x128xf32>, vector<32x128xf32> -> vector<32x128xf32>
    %434 = arith.addf %433, %407 : vector<32x128xf32>
    %435 = math.tanh %434 : vector<32x128xf32>
    %cst_124 = arith.constant dense<0.000000e+00> : vector<32x128xf32>
    %436 = tpu.matmul %1, %435, %cst_124 {dimension_numbers = #tpu.dot_dimension_numbers<[1], [0], [0], [1], [0, 0, 1, 1], [], []>} : vector<32x32xf32>, vector<32x128xf32>, vector<32x128xf32> -> vector<32x128xf32>
    %437 = arith.addf %436, %11 : vector<32x128xf32>
    %438 = math.tanh %437 : vector<32x128xf32>
    %cst_125 = arith.constant dense<0.000000e+00> : vector<8x128xf32>
    %439 = tpu.matmul %2, %438, %cst_125 {dimension_numbers = #tpu.dot_dimension_numbers<[1], [0], [0], [1], [0, 0, 1, 1], [], []>} : vector<8x32xf32>, vector<32x128xf32>, vector<8x128xf32> -> vector<8x128xf32>
    %440 = arith.addf %439, %14 : vector<8x128xf32>
    %441 = math.tanh %440 : vector<8x128xf32>
    %442 = arith.mulf %397, %441 : vector<8x128xf32>
    %443 = arith.addf %387, %442 : vector<8x128xf32>
    %cst_126 = arith.constant dense<0.000000e+00> : vector<32x128xf32>
    %444 = tpu.matmul %0, %443, %cst_126 {dimension_numbers = #tpu.dot_dimension_numbers<[1], [0], [0], [1], [0, 0, 1, 1], [], []>} : vector<32x8xf32>, vector<8x128xf32>, vector<32x128xf32> -> vector<32x128xf32>
    %445 = arith.addf %444, %410 : vector<32x128xf32>
    %446 = math.tanh %445 : vector<32x128xf32>
    %cst_127 = arith.constant dense<0.000000e+00> : vector<32x128xf32>
    %447 = tpu.matmul %1, %446, %cst_127 {dimension_numbers = #tpu.dot_dimension_numbers<[1], [0], [0], [1], [0, 0, 1, 1], [], []>} : vector<32x32xf32>, vector<32x128xf32>, vector<32x128xf32> -> vector<32x128xf32>
    %448 = arith.addf %447, %11 : vector<32x128xf32>
    %449 = math.tanh %448 : vector<32x128xf32>
    %cst_128 = arith.constant dense<0.000000e+00> : vector<8x128xf32>
    %450 = tpu.matmul %2, %449, %cst_128 {dimension_numbers = #tpu.dot_dimension_numbers<[1], [0], [0], [1], [0, 0, 1, 1], [], []>} : vector<8x32xf32>, vector<32x128xf32>, vector<8x128xf32> -> vector<8x128xf32>
    %451 = arith.addf %450, %14 : vector<8x128xf32>
    %452 = math.tanh %451 : vector<8x128xf32>
    %cst_129 = arith.constant 2.000000e+00 : f32
    %453 = vector.broadcast %cst_129 : f32 to vector<8x128xf32>
    %454 = arith.mulf %453, %430 : vector<8x128xf32>
    %455 = arith.addf %419, %454 : vector<8x128xf32>
    %cst_130 = arith.constant 2.000000e+00 : f32
    %456 = vector.broadcast %cst_130 : f32 to vector<8x128xf32>
    %457 = arith.mulf %456, %441 : vector<8x128xf32>
    %458 = arith.addf %455, %457 : vector<8x128xf32>
    %459 = arith.addf %458, %452 : vector<8x128xf32>
    %460 = arith.mulf %401, %459 : vector<8x128xf32>
    %461 = arith.addf %387, %460 : vector<8x128xf32>
    %c6 = arith.constant 6 : index
    %c0_131 = arith.constant 0 : index
    %c0_132 = arith.constant 0 : index
    %462 = vector.load %arg10[%c6, %c0_131, %c0_132] : memref<8x8x128xf32, #tpu.memory_space<vmem>>, vector<1x8x128xf32>
    %463 = vector.shape_cast %462 : vector<1x8x128xf32> to vector<8x128xf32>
    %464 = vector.shape_cast %461 : vector<8x128xf32> to vector<1x8x128xf32>
    tpu.vector_store %arg10[%c6, %c0_131, %c0_132], %464 {strides = array<i32>} : memref<8x8x128xf32, #tpu.memory_space<vmem>>, vector<1x8x128xf32>,
    %465 = vector.extract_strided_slice %15 {offsets = [7, 0], sizes = [1, 128], strides = [1, 1]} : vector<8x128xf32> to vector<1x128xf32>
    %466 = arith.subf %465, %391 : vector<1x128xf32>
    %cst_133 = arith.constant 5.000000e-01 : f32
    %467 = vector.broadcast %cst_133 : f32 to vector<1x128xf32>
    %468 = arith.mulf %466, %467 : vector<1x128xf32>
    %469 = arith.addf %391, %468 : vector<1x128xf32>
    %470 = vector.shape_cast %466 : vector<1x128xf32> to vector<1x128xf32>
    %471 = vector.broadcast %470 : vector<1x128xf32> to vector<8x128xf32>
    %cst_134 = arith.constant 5.000000e-01 : f32
    %472 = vector.broadcast %cst_134 : f32 to vector<8x128xf32>
    %473 = arith.mulf %471, %472 : vector<8x128xf32>
    %cst_135 = arith.constant 0.166666672 : f32
    %474 = vector.broadcast %cst_135 : f32 to vector<8x128xf32>
    %475 = arith.mulf %471, %474 : vector<8x128xf32>
    %476 = vector.broadcast %391 : vector<1x128xf32> to vector<32x128xf32>
    %477 = arith.mulf %5, %476 : vector<32x128xf32>
    %478 = arith.addf %477, %8 : vector<32x128xf32>
    %479 = vector.broadcast %469 : vector<1x128xf32> to vector<32x128xf32>
    %480 = arith.mulf %5, %479 : vector<32x128xf32>
    %481 = arith.addf %480, %8 : vector<32x128xf32>
    %482 = vector.broadcast %465 : vector<1x128xf32> to vector<32x128xf32>
    %483 = arith.mulf %5, %482 : vector<32x128xf32>
    %484 = arith.addf %483, %8 : vector<32x128xf32>
    %cst_136 = arith.constant dense<0.000000e+00> : vector<32x128xf32>
    %485 = tpu.matmul %0, %461, %cst_136 {dimension_numbers = #tpu.dot_dimension_numbers<[1], [0], [0], [1], [0, 0, 1, 1], [], []>} : vector<32x8xf32>, vector<8x128xf32>, vector<32x128xf32> -> vector<32x128xf32>
    %486 = arith.addf %485, %478 : vector<32x128xf32>
    %487 = math.tanh %486 : vector<32x128xf32>
    %cst_137 = arith.constant dense<0.000000e+00> : vector<32x128xf32>
    %488 = tpu.matmul %1, %487, %cst_137 {dimension_numbers = #tpu.dot_dimension_numbers<[1], [0], [0], [1], [0, 0, 1, 1], [], []>} : vector<32x32xf32>, vector<32x128xf32>, vector<32x128xf32> -> vector<32x128xf32>
    %489 = arith.addf %488, %11 : vector<32x128xf32>
    %490 = math.tanh %489 : vector<32x128xf32>
    %cst_138 = arith.constant dense<0.000000e+00> : vector<8x128xf32>
    %491 = tpu.matmul %2, %490, %cst_138 {dimension_numbers = #tpu.dot_dimension_numbers<[1], [0], [0], [1], [0, 0, 1, 1], [], []>} : vector<8x32xf32>, vector<32x128xf32>, vector<8x128xf32> -> vector<8x128xf32>
    %492 = arith.addf %491, %14 : vector<8x128xf32>
    %493 = math.tanh %492 : vector<8x128xf32>
    %494 = arith.mulf %473, %493 : vector<8x128xf32>
    %495 = arith.addf %461, %494 : vector<8x128xf32>
    %cst_139 = arith.constant dense<0.000000e+00> : vector<32x128xf32>
    %496 = tpu.matmul %0, %495, %cst_139 {dimension_numbers = #tpu.dot_dimension_numbers<[1], [0], [0], [1], [0, 0, 1, 1], [], []>} : vector<32x8xf32>, vector<8x128xf32>, vector<32x128xf32> -> vector<32x128xf32>
    %497 = arith.addf %496, %481 : vector<32x128xf32>
    %498 = math.tanh %497 : vector<32x128xf32>
    %cst_140 = arith.constant dense<0.000000e+00> : vector<32x128xf32>
    %499 = tpu.matmul %1, %498, %cst_140 {dimension_numbers = #tpu.dot_dimension_numbers<[1], [0], [0], [1], [0, 0, 1, 1], [], []>} : vector<32x32xf32>, vector<32x128xf32>, vector<32x128xf32> -> vector<32x128xf32>
    %500 = arith.addf %499, %11 : vector<32x128xf32>
    %501 = math.tanh %500 : vector<32x128xf32>
    %cst_141 = arith.constant dense<0.000000e+00> : vector<8x128xf32>
    %502 = tpu.matmul %2, %501, %cst_141 {dimension_numbers = #tpu.dot_dimension_numbers<[1], [0], [0], [1], [0, 0, 1, 1], [], []>} : vector<8x32xf32>, vector<32x128xf32>, vector<8x128xf32> -> vector<8x128xf32>
    %503 = arith.addf %502, %14 : vector<8x128xf32>
    %504 = math.tanh %503 : vector<8x128xf32>
    %505 = arith.mulf %473, %504 : vector<8x128xf32>
    %506 = arith.addf %461, %505 : vector<8x128xf32>
    %cst_142 = arith.constant dense<0.000000e+00> : vector<32x128xf32>
    %507 = tpu.matmul %0, %506, %cst_142 {dimension_numbers = #tpu.dot_dimension_numbers<[1], [0], [0], [1], [0, 0, 1, 1], [], []>} : vector<32x8xf32>, vector<8x128xf32>, vector<32x128xf32> -> vector<32x128xf32>
    %508 = arith.addf %507, %481 : vector<32x128xf32>
    %509 = math.tanh %508 : vector<32x128xf32>
    %cst_143 = arith.constant dense<0.000000e+00> : vector<32x128xf32>
    %510 = tpu.matmul %1, %509, %cst_143 {dimension_numbers = #tpu.dot_dimension_numbers<[1], [0], [0], [1], [0, 0, 1, 1], [], []>} : vector<32x32xf32>, vector<32x128xf32>, vector<32x128xf32> -> vector<32x128xf32>
    %511 = arith.addf %510, %11 : vector<32x128xf32>
    %512 = math.tanh %511 : vector<32x128xf32>
    %cst_144 = arith.constant dense<0.000000e+00> : vector<8x128xf32>
    %513 = tpu.matmul %2, %512, %cst_144 {dimension_numbers = #tpu.dot_dimension_numbers<[1], [0], [0], [1], [0, 0, 1, 1], [], []>} : vector<8x32xf32>, vector<32x128xf32>, vector<8x128xf32> -> vector<8x128xf32>
    %514 = arith.addf %513, %14 : vector<8x128xf32>
    %515 = math.tanh %514 : vector<8x128xf32>
    %516 = arith.mulf %471, %515 : vector<8x128xf32>
    %517 = arith.addf %461, %516 : vector<8x128xf32>
    %cst_145 = arith.constant dense<0.000000e+00> : vector<32x128xf32>
    %518 = tpu.matmul %0, %517, %cst_145 {dimension_numbers = #tpu.dot_dimension_numbers<[1], [0], [0], [1], [0, 0, 1, 1], [], []>} : vector<32x8xf32>, vector<8x128xf32>, vector<32x128xf32> -> vector<32x128xf32>
    %519 = arith.addf %518, %484 : vector<32x128xf32>
    %520 = math.tanh %519 : vector<32x128xf32>
    %cst_146 = arith.constant dense<0.000000e+00> : vector<32x128xf32>
    %521 = tpu.matmul %1, %520, %cst_146 {dimension_numbers = #tpu.dot_dimension_numbers<[1], [0], [0], [1], [0, 0, 1, 1], [], []>} : vector<32x32xf32>, vector<32x128xf32>, vector<32x128xf32> -> vector<32x128xf32>
    %522 = arith.addf %521, %11 : vector<32x128xf32>
    %523 = math.tanh %522 : vector<32x128xf32>
    %cst_147 = arith.constant dense<0.000000e+00> : vector<8x128xf32>
    %524 = tpu.matmul %2, %523, %cst_147 {dimension_numbers = #tpu.dot_dimension_numbers<[1], [0], [0], [1], [0, 0, 1, 1], [], []>} : vector<8x32xf32>, vector<32x128xf32>, vector<8x128xf32> -> vector<8x128xf32>
    %525 = arith.addf %524, %14 : vector<8x128xf32>
    %526 = math.tanh %525 : vector<8x128xf32>
    %cst_148 = arith.constant 2.000000e+00 : f32
    %527 = vector.broadcast %cst_148 : f32 to vector<8x128xf32>
    %528 = arith.mulf %527, %504 : vector<8x128xf32>
    %529 = arith.addf %493, %528 : vector<8x128xf32>
    %cst_149 = arith.constant 2.000000e+00 : f32
    %530 = vector.broadcast %cst_149 : f32 to vector<8x128xf32>
    %531 = arith.mulf %530, %515 : vector<8x128xf32>
    %532 = arith.addf %529, %531 : vector<8x128xf32>
    %533 = arith.addf %532, %526 : vector<8x128xf32>
    %534 = arith.mulf %475, %533 : vector<8x128xf32>
    %535 = arith.addf %461, %534 : vector<8x128xf32>
    %c7 = arith.constant 7 : index
    %c0_150 = arith.constant 0 : index
    %c0_151 = arith.constant 0 : index
    %536 = vector.load %arg10[%c7, %c0_150, %c0_151] : memref<8x8x128xf32, #tpu.memory_space<vmem>>, vector<1x8x128xf32>
    %537 = vector.shape_cast %536 : vector<1x8x128xf32> to vector<8x128xf32>
    %538 = vector.shape_cast %535 : vector<8x128xf32> to vector<1x8x128xf32>
    tpu.vector_store %arg10[%c7, %c0_150, %c0_151], %538 {strides = array<i32>} : memref<8x8x128xf32, #tpu.memory_space<vmem>>, vector<1x8x128xf32>,
    return
  }
  func.func @transform_0(%arg0: i32) -> (i32, i32) {
    %c0_i32 = arith.constant 0 : i32
    %c0_i32_0 = arith.constant 0 : i32
    return %c0_i32, %arg0 : i32, i32
  }
  func.func @transform_1(%arg0: i32) -> (i32, i32) {
    %c0_i32 = arith.constant 0 : i32
    %c0_i32_0 = arith.constant 0 : i32
    return %c0_i32, %arg0 : i32, i32
  }
  func.func @transform_2(%arg0: i32) -> (i32, i32) {
    %c0_i32 = arith.constant 0 : i32
    %c0_i32_0 = arith.constant 0 : i32
    %c0_i32_1 = arith.constant 0 : i32
    return %c0_i32, %c0_i32_0 : i32, i32
  }
  func.func @transform_3(%arg0: i32) -> (i32, i32) {
    %c0_i32 = arith.constant 0 : i32
    %c0_i32_0 = arith.constant 0 : i32
    %c0_i32_1 = arith.constant 0 : i32
    return %c0_i32, %c0_i32_0 : i32, i32
  }
  func.func @transform_4(%arg0: i32) -> (i32, i32) {
    %c0_i32 = arith.constant 0 : i32
    %c0_i32_0 = arith.constant 0 : i32
    %c0_i32_1 = arith.constant 0 : i32
    return %c0_i32, %c0_i32_0 : i32, i32
  }
  func.func @transform_5(%arg0: i32) -> (i32, i32) {
    %c0_i32 = arith.constant 0 : i32
    %c0_i32_0 = arith.constant 0 : i32
    %c0_i32_1 = arith.constant 0 : i32
    return %c0_i32, %c0_i32_0 : i32, i32
  }
  func.func @transform_6(%arg0: i32) -> (i32, i32) {
    %c0_i32 = arith.constant 0 : i32
    %c0_i32_0 = arith.constant 0 : i32
    %c0_i32_1 = arith.constant 0 : i32
    return %c0_i32, %c0_i32_0 : i32, i32
  }
  func.func @transform_7(%arg0: i32) -> (i32, i32) {
    %c0_i32 = arith.constant 0 : i32
    %c0_i32_0 = arith.constant 0 : i32
    %c0_i32_1 = arith.constant 0 : i32
    return %c0_i32, %c0_i32_0 : i32, i32
  }
  func.func @transform_8(%arg0: i32) -> (i32, i32) {
    %c0_i32 = arith.constant 0 : i32
    %c0_i32_0 = arith.constant 0 : i32
    %c0_i32_1 = arith.constant 0 : i32
    return %c0_i32, %c0_i32_0 : i32, i32
  }
  func.func @transform_9(%arg0: i32) -> (i32, i32, i32) {
    %c0_i32 = arith.constant 0 : i32
    %c0_i32_0 = arith.constant 0 : i32
    %c0_i32_1 = arith.constant 0 : i32
    return %c0_i32, %c0_i32_0, %arg0 : i32, i32, i32
  }
}

</mosaic_0001>

<bundles_post_ra>
// kernel: custom_odeint.1
= control target key start
LH: loop header
LB: loop body
LE: loop exit
PB: predicated region body
PF: predicated region fallthrough
CT: control target
= control target key end

     0   :  { %vm173_vm0 = vcmask 64512   ;;  %v10079_v3 = vmov 0   ;;  %v131_v20 = vlaneseq  ;;  %vm275_vm1 = vcmask 261120   ;;  %s11756_s1 = inlined_call_operand.vmem [shape: f32[8,128], index: 1, kind: input, shape index: {}]   ;;  %s11757_s3 = inlined_call_operand.vmem [shape: f32[32,8], index: 3, kind: input, shape index: {}]   ;;  %s11758_s2 = inlined_call_operand.vmem [shape: f32[32,1], index: 2, kind: input, shape index: {}]   ;;  %s11759_s4 = inlined_call_operand.vmem [shape: f32[32,1], index: 4, kind: input, shape index: {}]   ;;  %s11760_s9 = inlined_call_operand.vmem [shape: f32[8,8,128], index: 9, kind: output, shape index: {}]   ;;  %s11761_s6 = inlined_call_operand.vmem [shape: f32[32,1], index: 6, kind: input, shape index: {}]   ;;  %s11762_s8 = inlined_call_operand.vmem [shape: f32[8,1], index: 8, kind: input, shape index: {}]   ;;  %s11763_s0 = inlined_call_operand.vmem [shape: f32[8,128], index: 0, kind: input, shape index: {}]   ;;  %s11764_s5 = inlined_call_operand.vmem [shape: f32[32,32], index: 5, kind: input, shape index: {}]   ;;  %s11765_s7 = inlined_call_operand.vmem [shape: f32[8,32], index: 7, kind: input, shape index: {}]  }
   0x1   :  { %v10136_v0 = vld [vmem:[%s11756_s1] sm:$0xff]  ;;  %v10146_v2 = vld [vmem:[%s11757_s3 + $0x8] sm:$0xff]  ;;  %9546 = vset.pattern.permute.xlu0 %v10079_v3  ;;  %9547 = vset.pattern.permute.xlu1 %v10079_v3  ;;  %v10158_v4 = vld [vmem:[%s11757_s3 + $0x10] sm:$0xff]  ;;  %vm10081_vm2 = vmmov 0  }
   0x2   :  { %v10141_v1 = vld [vmem:[%s11757_s3] sm:$0xff]  ;;  %121 = vst [vmem:[%s11760_s9] sm:$0xff] %v10136_v0  ;;  %8226 = vmatprep.subr.mxu0 %v10136_v0  ;;  %v42_v7 = vld [vmem:[%s11758_s2 + $0x8] sm:$0xff]  ;;  %v10177_v8 = vld [vmem:[%s11757_s3 + $0x18] sm:$0xff]  ;;  %v10217_v22 = vshrl.u32 %v131_v20, 7 }
   0x3   :  { %8228 = vmatprep.mubr.msk.f32.mxu0 %vm173_vm0, %v10141_v1  ;;  %v41_v5 = vld [vmem:[%s11758_s2] sm:$0xff]  ;;  %8227 = vmatpush3.msra.mxu0 %v10136_v0  ;;  %v66_v9 = vld [vmem:[%s11759_s4 + $0x8] sm:$0xff]  ;;  %v43_v10 = vld [vmem:[%s11758_s2 + $0x10] sm:$0xff] }
   0x4   :  { %47 = vperm.xlu0 %9546, %v41_v5   ;;  %v65_v6 = vld [vmem:[%s11759_s4] sm:$0xff]  ;;  %8229 = vmatmul.mubr.msk.f32.vlgmr.msra.gmra.mrb[0].mxu0 %vm173_vm0, %v10146_v2  ;;  %v44_v11 = vld [vmem:[%s11758_s2 + $0x18] sm:$0xff]  ;;  %v67_v12 = vld [vmem:[%s11759_s4 + $0x10] sm:$0xff]  ;;  %11799 = vst [vmem:[#allocation2_spill] sm:$0xff] %v10217_v22  ;;  %v11766_v25 = vsub.s32 0, %v10217_v22  ;;  %v10238_v30 = vsub.s32 1, %v10217_v22 }
   0x5   :  { %71 = vperm.xlu1 %9547, %v65_v6   ;;  %8231 = vmatprep.mubr.msk.f32.mxu0 %vm173_vm0, %v10158_v4  ;;  %v68_v13 = vld [vmem:[%s11759_s4 + $0x18] sm:$0xff]  ;;  %v89_v14 = vld [vmem:[%s11761_s6] sm:$0xff]  ;;  %v90_v15 = vld [vmem:[%s11761_s6 + $0x8] sm:$0xff]  ;;  %v10241_v31 = vsub.s32 2, %v10217_v22  ;;  %v10244_v32 = vsub.s32 3, %v10217_v22  ;;  %v10259_v39 = vsub.s32 4, %v10217_v22 }
   0x6   :  { %v91_v16 = vld [vmem:[%s11761_s6 + $0x10] sm:$0xff]  ;;  %v92_v17 = vld [vmem:[%s11761_s6 + $0x18] sm:$0xff]  ;;  %v113_v18 = vld [vmem:[%s11762_s8] sm:$0xff]  ;;  %v10264_v41 = vsub.s32 5, %v10217_v22  ;;  %v10267_v42 = vsub.s32 6, %v10217_v22 }
   0x7   :  { %v10214_v19 = vld [vmem:[%s11763_s0] sm:$0xff]  ;;  %11800 = vst [vmem:[#allocation3_spill] sm:$0xff] %v10259_v39 }
   0x8   :  { %52 = vperm.xlu0 %9546, %v42_v7   ;;  %8232 = vmatmul.mubr.msk.f32.gmra.mrb[2].mxu0 %vm173_vm0, %v10177_v8  ;;  %v123_v21 = vrot.slane %v10214_v19, 7  ;;  %v10233_v29 = vld [vmem:[%s11764_s5] sm:$0xff]  ;;  %v164_v33 = vrot.slane %v10214_v19, %v10238_v30  ;;  %v1234_v35 = vrot.slane %v10214_v19, %v10241_v31  ;;  %v2275_v37 = vrot.slane %v10214_v19, %v10244_v32 }
   0x9   :  { %76 = vperm.xlu1 %9547, %v66_v9   ;;  %8242 = vmatprep.mubr.msk.f32.mxu1 %vm275_vm1, %v10233_v29  ;;  %11801 = vst [vmem:[#allocation4_spill] sm:$0xff] %v10264_v41  ;;  %11802 = vst [vmem:[#allocation5_spill] sm:$0xff] %v10267_v42  ;;  %v3316_v55 = vrot.slane %v10214_v19, %v10259_v39 }
   0xa   :  { %v10220_v23 = vsub.f32 %v10214_v19, %v123_v21 }
   0xc   :  { %57 = vperm.xlu0 %9546, %v43_v10   ;;  %v126_v24 = vmul.f32 0.5, %v10220_v23 }
   0xd   :  { %62 = vperm.xlu1 %9547, %v44_v11  }
   0xe   :  { %v128_v26 = vrot.slane %v126_v24, 1 }
  0x10   :  { %81 = vperm.xlu0 %9546, %v67_v12   ;;  %v10225_v27 = vadd.f32 %v128_v26, %v10214_v19 }
  0x11   :  { %86 = vperm.xlu1 %9547, %v68_v13  }
  0x12   :  { %v152_v28 = vrot.slane %v10225_v27, %v11766_v25  ;;  %v1222_v34 = vrot.slane %v10225_v27, %v10238_v30  ;;  %v2263_v36 = vrot.slane %v10225_v27, %v10241_v31  ;;  %v3304_v38 = vrot.slane %v10225_v27, %v10244_v32 }
  0x13   :  { %v4345_v5 = vrot.slane %v10225_v27, %v10259_v39  ;;  %v6427_v25 = vrot.slane %v10225_v27, %v10267_v42 }
  0x14   :  { %95 = vperm.xlu0 %9546, %v89_v14   ;;  %v4357_v14 = vrot.slane %v10214_v19, %v10264_v41 }
  0x15   :  { %100 = vperm.xlu1 %9547, %v90_v15  }
  0x18   :  { %105 = vperm.xlu0 %9546, %v91_v16  }
  0x19   :  { %110 = vperm.xlu1 %9547, %v92_v17  }
  0x1c   :  { %116 = vperm.xlu0 %9546, %v113_v18  }
  0x83   :  { %v10261_v40 = vpop.permute.xlu0 %47 }
  0x84   :  { %v10269_v43 = vpop.permute.xlu1 %71  ;;  %v153_v44 = vmul.f32 %v152_v28, %v10261_v40  ;;  %v165_v45 = vmul.f32 %v164_v33, %v10261_v40  ;;  %v1223_v46 = vmul.f32 %v1222_v34, %v10261_v40  ;;  %v1235_v48 = vmul.f32 %v1234_v35, %v10261_v40 }
  0x85   :  { %v2264_v49 = vmul.f32 %v2263_v36, %v10261_v40  ;;  %v2276_v50 = vmul.f32 %v2275_v37, %v10261_v40  ;;  %v3305_v51 = vmul.f32 %v3304_v38, %v10261_v40 }
  0x86   :  { %v10280_v52 = vadd.f32 %v153_v44, %v10269_v43  ;;  %v10283_v53 = vadd.f32 %v165_v45, %v10269_v43  ;;  %v10286_v54 = vadd.f32 %v1223_v46, %v10269_v43  ;;  %v10293_v57 = vadd.f32 %v1235_v48, %v10269_v43 }
  0x87   :  { %v10290_v56 = vpop.permute.xlu0 %52  ;;  %v10296_v58 = vadd.f32 %v2264_v49, %v10269_v43  ;;  %v10299_v59 = vadd.f32 %v2276_v50, %v10269_v43  ;;  %v10302_v60 = vadd.f32 %v3305_v51, %v10269_v43  ;;  %v5386_v45 = vrot.slane %v10225_v27, %v10264_v41 }
  0x88   :  { %v10304_v61 = vpop.permute.xlu1 %76  ;;  %v154_v62 = vmul.f32 %v152_v28, %v10290_v56  ;;  %v166_v63 = vmul.f32 %v164_v33, %v10290_v56  ;;  %v1224_v3 = vmul.f32 %v1222_v34, %v10290_v56  ;;  %v1236_v6 = vmul.f32 %v1234_v35, %v10290_v56 }
  0x89   :  { %11803 = vst [vmem:[#allocation6_spill] sm:$0xff] %v10302_v60  ;;  %v2265_v7 = vmul.f32 %v2263_v36, %v10290_v56  ;;  %v2277_v9 = vmul.f32 %v2275_v37, %v10290_v56  ;;  %v3306_v10 = vmul.f32 %v3304_v38, %v10290_v56  ;;  %v5398_v50 = vrot.slane %v10214_v19, %v10267_v42 }
  0x8a   :  { %v10316_v11 = vadd.f32 %v154_v62, %v10304_v61  ;;  %v10319_v12 = vadd.f32 %v166_v63, %v10304_v61  ;;  %v10322_v13 = vadd.f32 %v1224_v3, %v10304_v61  ;;  %v10329_v16 = vadd.f32 %v1236_v6, %v10304_v61 }
  0x8b   :  { %v10326_v15 = vpop.permute.xlu0 %57  ;;  %v10332_v17 = vadd.f32 %v2265_v7, %v10304_v61  ;;  %v10335_v18 = vadd.f32 %v2277_v9, %v10304_v61  ;;  %v10338_v20 = vadd.f32 %v3306_v10, %v10304_v61  ;;  %v4346_v60 = vmul.f32 %v4345_v5, %v10261_v40 }
  0x8c   :  { %v10340_v21 = vpop.permute.xlu1 %62  ;;  %v155_v24 = vmul.f32 %v152_v28, %v10326_v15  ;;  %v167_v26 = vmul.f32 %v164_v33, %v10326_v15  ;;  %v1225_v44 = vmul.f32 %v1222_v34, %v10326_v15  ;;  %v1237_v62 = vmul.f32 %v1234_v35, %v10326_v15 }
  0x8d   :  { %11804 = vst [vmem:[#allocation7_spill] sm:$0xff] %v10338_v20  ;;  %v156_v46 = vmul.f32 %v152_v28, %v10340_v21  ;;  %v168_v48 = vmul.f32 %v164_v33, %v10340_v21  ;;  %v1226_v49 = vmul.f32 %v1222_v34, %v10340_v21  ;;  %v1238_v51 = vmul.f32 %v1234_v35, %v10340_v21 }
  0x8e   :  { %v2267_v63 = vmul.f32 %v2263_v36, %v10340_v21  ;;  %v2266_v3 = vmul.f32 %v2263_v36, %v10326_v15  ;;  %v2279_v7 = vmul.f32 %v2275_v37, %v10340_v21  ;;  %v2278_v28 = vmul.f32 %v2275_v37, %v10326_v15 }
  0x8f   :  { %v10356_v6 = vpop.permute.xlu0 %81  ;;  %v3308_v33 = vmul.f32 %v3304_v38, %v10340_v21  ;;  %v3307_v34 = vmul.f32 %v3304_v38, %v10326_v15  ;;  %v3320_v42 = vmul.f32 %v3316_v55, %v10340_v21  ;;  %v10435_v39 = vadd.f32 %v4346_v60, %v10269_v43 }
  0x90   :  { %v10362_v9 = vpop.permute.xlu1 %86  ;;  %v10365_v10 = vadd.f32 %v155_v24, %v10356_v6  ;;  %v10368_v35 = vadd.f32 %v167_v26, %v10356_v6  ;;  %v10371_v36 = vadd.f32 %v1225_v44, %v10356_v6  ;;  %v11805_v24 = vsub.s32 7, %v10217_v22 }
  0x91   :  { %v10376_v37 = vadd.f32 %v156_v46, %v10362_v9  ;;  %v10379_v47 = vadd.f32 %v168_v48, %v10362_v9  ;;  %v10382_v38 = vadd.f32 %v1226_v49, %v10362_v9  ;;  %v10388_v41 = vadd.f32 %v1238_v51, %v10362_v9  ;;  %11811 = vst [vmem:[#allocation13_spill] sm:$0xff] %v10435_v39 }
  0x92   :  { %v6439_v26 = vrot.slane %v10214_v19, %v11805_v24  ;;  %v10391_v44 = vadd.f32 %v1237_v62, %v10356_v6  ;;  %v10394_v27 = vadd.f32 %v2267_v63, %v10362_v9  ;;  %v10397_v46 = vadd.f32 %v2266_v3, %v10356_v6 }
  0x93   :  { %v10400_v48 = vadd.f32 %v2279_v7, %v10362_v9  ;;  %v10403_v49 = vadd.f32 %v2278_v28, %v10356_v6  ;;  %v10406_v24 = vadd.f32 %v3308_v33, %v10362_v9  ;;  %v10409_v51 = vadd.f32 %v3307_v34, %v10356_v6 }
  0x94   :  { %v3318_v62 = vmul.f32 %v3316_v55, %v10290_v56  ;;  %v3317_v63 = vmul.f32 %v3316_v55, %v10261_v40  ;;  %v3319_v3 = vmul.f32 %v3316_v55, %v10326_v15  ;;  %v4347_v7 = vmul.f32 %v4345_v5, %v10290_v56 }
  0x95   :  { %11806 = vst [vmem:[#allocation8_spill] sm:$0xff] %v10406_v24  ;;  %11807 = vst [vmem:[#allocation9_spill] sm:$0xff] %v10409_v51  ;;  %v4349_v28 = vmul.f32 %v4345_v5, %v10340_v21  ;;  %v4348_v33 = vmul.f32 %v4345_v5, %v10326_v15  ;;  %v10426_v51 = vadd.f32 %v3320_v42, %v10362_v9 }
  0x96   :  { %v10420_v24 = vadd.f32 %v3318_v62, %v10304_v61  ;;  %v10423_v34 = vadd.f32 %v3317_v63, %v10269_v43  ;;  %v10429_v20 = vadd.f32 %v3319_v3, %v10356_v6  ;;  %v10432_v55 = vadd.f32 %v4347_v7, %v10304_v61 }
  0x97   :  { %11808 = vst [vmem:[#allocation10_spill] sm:$0xff] %v10426_v51  ;;  %v10438_v5 = vadd.f32 %v4349_v28, %v10362_v9  ;;  %v10441_v62 = vadd.f32 %v4348_v33, %v10356_v6  ;;  %v4359_v63 = vmul.f32 %v4357_v14, %v10290_v56  ;;  %v4358_v42 = vmul.f32 %v4357_v14, %v10261_v40 }
  0x98   :  { %11809 = vst [vmem:[#allocation11_spill] sm:$0xff] %v10429_v20  ;;  %11810 = vst [vmem:[#allocation12_spill] sm:$0xff] %v10432_v55  ;;  %v4361_v51 = vmul.f32 %v4357_v14, %v10340_v21  ;;  %v4360_v3 = vmul.f32 %v4357_v14, %v10326_v15  ;;  %v5388_v7 = vmul.f32 %v5386_v45, %v10290_v56 }
  0x99   :  { %11812 = vst [vmem:[#allocation14_spill] sm:$0xff] %v10438_v5  ;;  %11813 = vst [vmem:[#allocation15_spill] sm:$0xff] %v10441_v62  ;;  %v5387_v55 = vmul.f32 %v5386_v45, %v10261_v40  ;;  %v5390_v60 = vmul.f32 %v5386_v45, %v10340_v21  ;;  %v5389_v28 = vmul.f32 %v5386_v45, %v10326_v15 }
  0x9a   :  { %v10452_v5 = vadd.f32 %v4359_v63, %v10304_v61  ;;  %v10455_v33 = vadd.f32 %v4358_v42, %v10269_v43  ;;  %v10458_v62 = vadd.f32 %v4361_v51, %v10362_v9  ;;  %v10461_v39 = vadd.f32 %v4360_v3, %v10356_v6 }
  0x9b   :  { %v10464_v14 = vadd.f32 %v5388_v7, %v10304_v61  ;;  %v10467_v20 = vadd.f32 %v5387_v55, %v10269_v43  ;;  %v10470_v45 = vadd.f32 %v5390_v60, %v10362_v9  ;;  %v10473_v63 = vadd.f32 %v5389_v28, %v10356_v6 }
  0x9c   :  { %11814 = vst [vmem:[#allocation16_spill] sm:$0xff] %v10458_v62  ;;  %11815 = vst [vmem:[#allocation17_spill] sm:$0xff] %v10461_v39  ;;  %v5400_v42 = vmul.f32 %v5398_v50, %v10290_v56  ;;  %v5399_v51 = vmul.f32 %v5398_v50, %v10261_v40  ;;  %v5402_v62 = vmul.f32 %v5398_v50, %v10340_v21 }
  0x9d   :  { %11816 = vst [vmem:[#allocation18_spill] sm:$0xff] %v10464_v14  ;;  %11817 = vst [vmem:[#allocation19_spill] sm:$0xff] %v10467_v20  ;;  %v5401_v3 = vmul.f32 %v5398_v50, %v10326_v15  ;;  %v6429_v7 = vmul.f32 %v6427_v25, %v10290_v56  ;;  %v6428_v14 = vmul.f32 %v6427_v25, %v10261_v40 }
  0x9e   :  { %11818 = vst [vmem:[#allocation20_spill] sm:$0xff] %v10470_v45  ;;  %11819 = vst [vmem:[#allocation21_spill] sm:$0xff] %v10473_v63  ;;  %v6431_v55 = vmul.f32 %v6427_v25, %v10340_v21  ;;  %v6430_v60 = vmul.f32 %v6427_v25, %v10326_v15  ;;  %v10484_v45 = vadd.f32 %v5400_v42, %v10304_v61 }
  0x9f   :  { %v10487_v28 = vadd.f32 %v5399_v51, %v10269_v43  ;;  %v10490_v63 = vadd.f32 %v5402_v62, %v10362_v9  ;;  %v10493_v20 = vadd.f32 %v5401_v3, %v10356_v6  ;;  %v10496_v50 = vadd.f32 %v6429_v7, %v10304_v61 }
  0xa0   :  { %11820 = vst [vmem:[#allocation22_spill] sm:$0xff] %v10484_v45  ;;  %v10499_v39 = vadd.f32 %v6428_v14, %v10269_v43  ;;  %v10502_v25 = vadd.f32 %v6431_v55, %v10362_v9  ;;  %v10505_v42 = vadd.f32 %v6430_v60, %v10356_v6  ;;  %v6441_v51 = vmul.f32 %v6439_v26, %v10290_v56 }
  0xa1   :  { %11821 = vst [vmem:[#allocation23_spill] sm:$0xff] %v10487_v28  ;;  %11822 = vst [vmem:[#allocation24_spill] sm:$0xff] %v10490_v63  ;;  %v6440_v62 = vmul.f32 %v6439_v26, %v10261_v40  ;;  %v6443_v63 = vmul.f32 %v6439_v26, %v10340_v21  ;;  %v6442_v3 = vmul.f32 %v6439_v26, %v10326_v15 }
  0xa2   :  { %11823 = vst [vmem:[#allocation25_spill] sm:$0xff] %v10493_v20  ;;  %11824 = vst [vmem:[#allocation26_spill] sm:$0xff] %v10496_v50  ;;  %v10512_v7 = vadd.f32 %v6441_v51, %v10304_v61 }
  0xa3   :  { %11825 = vst [vmem:[#allocation27_spill] sm:$0xff] %v10499_v39  ;;  %11826 = vst [vmem:[#allocation28_spill] sm:$0xff] %v10502_v25  ;;  %v10515_v14 = vadd.f32 %v6440_v62, %v10269_v43  ;;  %v10518_v55 = vadd.f32 %v6443_v63, %v10362_v9  ;;  %v10521_v60 = vadd.f32 %v6442_v3, %v10356_v6 }
  0xa4   :  { %11827 = vst [vmem:[#allocation29_spill] sm:$0xff] %v10505_v42  ;;  %11828 = vst [vmem:[#allocation30_spill] sm:$0xff] %v10512_v7  ;;  %v11832_v42 = vsub.s32 0, %v10217_v22 }
  0xa5   :  { %11829 = vst [vmem:[#allocation31_spill] sm:$0xff] %v10515_v14  ;;  %11830 = vst [vmem:[#allocation32_spill] sm:$0xff] %v10518_v55 }
  0xa6   :  { %11831 = vst [vmem:[#allocation33_spill] sm:$0xff] %v10521_v60  ;;  %v140_v25 = vrot.slane %v10214_v19, %v11832_v42 }
  0xa8   :  { %v142_v39 = vmul.f32 %v140_v25, %v10290_v56  ;;  %v141_v26 = vmul.f32 %v140_v25, %v10261_v40  ;;  %v144_v7 = vmul.f32 %v140_v25, %v10340_v21  ;;  %v143_v63 = vmul.f32 %v140_v25, %v10326_v15 }
  0xaa   :  { %v146_v51 = vadd.f32 %v142_v39, %v10304_v61  ;;  %v145_v14 = vadd.f32 %v141_v26, %v10269_v43  ;;  %v148_v50 = vadd.f32 %v144_v7, %v10362_v9  ;;  %v147_v56 = vadd.f32 %v143_v63, %v10356_v6  ;;  %v10537_v9 = vld [vmem:[%s11764_s5 + $0x8] sm:$0xff]  ;;  %v10542_v6 = vld [vmem:[%s11764_s5 + $0x10] sm:$0xff] }
  0xab   :  { %v11791_v7 = vmov 0.0|0.0  }
  0xac   :  { %9158 = vmatprep.subr.bf16.mxu0 %v11791_v7 }
  0xd7   :  { %v8230_v62 = vpop.f32.mrb[0].mxu0 }
  0xd8   :  { %v258_v55 = vadd.f32 %v8230_v62, %v146_v51  ;;  %v252_v3 = vpop.f32.mrb[1].mxu0 }
  0xd9   :  { %v253_v60 = vadd.f32 %v252_v3, %v145_v14  ;;  %v11794_v14 = vmov 0.0  }
  0xda   :  { %9548 = vtanh.f32 %v258_v55  ;;  %8256 = vmatprep.mubr.msk.f32.mxu0 %vm10081_vm2, %v11794_v14  ;;  %v10560_v55 = vpop.permute.xlu1 %100 }
  0xdb   :  { %9550 = vtanh.f32 %v253_v60  ;;  %v8233_v19 = vpop.f32.mrb[2].mxu0  ;;  %v10562_v60 = vpop.permute.xlu0 %95 }
  0xdc   :  { %v268_v40 = vadd.f32 %v8233_v19, %v148_v50  ;;  %v262_v42 = vpop.f32.mrb[3].mxu0  ;;  %v10551_v50 = vld [vmem:[%s11764_s5 + $0x18] sm:$0xff] }
  0xdd   :  { %v263_v39 = vadd.f32 %v262_v42, %v147_v56 }
  0xde   :  { %9552 = vtanh.f32 %v268_v40  ;;  %v10566_v19 = vpop.permute.xlu1 %110 }
  0xdf   :  { %9554 = vtanh.f32 %v263_v39  ;;  %v10568_v40 = vpop.permute.xlu0 %105 }
  0xe4   :  { %v9549_v61 = vpop.eup %9548 }
  0xe5   :  { %v9551_v21 = vpop.eup %9550 }
  0xe6   :  { %v9150_v43 = vpack.c.bf16 %v9549_v61, %v9551_v21 }
  0xe8   :  { %v9553_v26 = vpop.eup %9552  ;;  %9151 = vmatprep.subr.bf16.mxu1 %v9150_v43 }
  0xe9   :  { %v9555_v15 = vpop.eup %9554  ;;  %9153 = vmatpush3.bf16.msra.mxu1 %v9150_v43 }
  0xea   :  { %v9154_v25 = vpack.c.bf16 %v9553_v26, %v9555_v15 }
  0xec   :  { %9155 = vmatprep.subr.bf16.mxu1 %v9154_v25 }
  0xed   :  { %9157 = vmatpush3.bf16.msra.mxu1 %v9154_v25 }
  0xf0   :  { %8243 = vmatmul.mubr.msk.f32.vlgmr.msra.gmra.mrb[0].mxu1 %vm275_vm1, %v10537_v9 }
  0xf1   :  { %8245 = vmatprep.mubr.msk.f32.mxu1 %vm275_vm1, %v10542_v6 }
  0xf4   :  { %8246 = vmatmul.mubr.msk.f32.gmra.mrb[2].mxu1 %vm275_vm1, %v10551_v50 }
  0xf5   :  { %8275 = vmatprep.mubr.msk.f32.mxu1 %vm275_vm1, %v10233_v29 }
 0x1c3   :  { %v8244_v51 = vpop.f32.mrb[0].mxu1 }
 0x1c4   :  { %v360_v62 = vadd.f32 %v8244_v51, %v10560_v55  ;;  %v354_v63 = vpop.f32.mrb[1].mxu1 }
 0x1c5   :  { %v355_v3 = vadd.f32 %v354_v63, %v10562_v60  ;;  %v10582_v63 = vpop.permute.xlu0 %116 }
 0x1c6   :  { %9556 = vtanh.f32 %v360_v62  ;;  %v10576_v62 = vld [vmem:[%s11765_s7] sm:$0xff] }
 0x1c7   :  { %9558 = vtanh.f32 %v355_v3  ;;  %v8247_v56 = vpop.f32.mrb[2].mxu1 }
 0x1c8   :  { %v370_v42 = vadd.f32 %v8247_v56, %v10566_v19  ;;  %v364_v39 = vpop.f32.mrb[3].mxu1 }
 0x1c9   :  { %v365_v61 = vadd.f32 %v364_v39, %v10568_v40  ;;  %v10587_v39 = vrot.slane %v10220_v23, %v10238_v30 }
 0x1ca   :  { %9560 = vtanh.f32 %v370_v42 }
 0x1cb   :  { %9562 = vtanh.f32 %v365_v61  ;;  %v10590_v61 = vmul.f32 0.5, %v10587_v39 }
 0x1d0   :  { %v9557_v21 = vpop.eup %9556 }
 0x1d1   :  { %v9559_v43 = vpop.eup %9558 }
 0x1d2   :  { %v9159_v26 = vpack.c.bf16 %v9557_v21, %v9559_v43 }
 0x1d4   :  { %v9561_v15 = vpop.eup %9560  ;;  %9160 = vmatpush3.bf16.msra.mxu0 %v9159_v26 }
 0x1d5   :  { %v9563_v25 = vpop.eup %9562  ;;  %9161 = vmatprep.subr.bf16.mxu0 %v11791_v7 }
 0x1d6   :  { %v9162_v51 = vpack.c.bf16 %v9561_v15, %v9563_v25 }
 0x1d8   :  { %9163 = vmatpush3.bf16.msra.mxu0 %v9162_v51 }
 0x1db   :  { %8257 = vmatmul.mubr.msk.f32.vlgmr.msra.gmra.mrb[4].mxu0 %vm275_vm1, %v10576_v62 }
 0x1dc   :  { %8261 = vmatprep.mubr.msk.f32.mxu0 %vm173_vm0, %v10141_v1 }
 0x2ae   :  { %v446_v3 = vpop.f32.mrb[4].mxu0 }
 0x2af   :  { %v447_v56 = vadd.f32 %v446_v3, %v10582_v63  ;;  %v8258_v42 = vpop.f32.mrb[5].mxu0 }
 0x2b1   :  { %9564 = vtanh.f32 %v447_v56 }
 0x2bb   :  { %v10592_v21 = vpop.eup %9564 }
 0x2bc   :  { %v451_v43 = vmul.f32 %v10592_v21, %v10590_v61 }
 0x2be   :  { %v452_v26 = vadd.f32 %v451_v43, %v10136_v0 }
 0x2c0   :  { %8259 = vmatprep.subr.mxu0 %v452_v26 }
 0x2c1   :  { %8260 = vmatpush3.msra.mxu0 %v452_v26 }
 0x2c2   :  { %8262 = vmatmul.mubr.msk.f32.vlgmr.msra.gmra.mrb[6].mxu0 %vm173_vm0, %v10146_v2  ;;  %9172 = vmatprep.subr.bf16.mxu0 %v11791_v7 }
 0x2c3   :  { %8264 = vmatprep.mubr.msk.f32.mxu0 %vm173_vm0, %v10158_v4 }
 0x2c6   :  { %8265 = vmatmul.mubr.msk.f32.gmra.mrb[8].mxu0 %vm173_vm0, %v10177_v8 }
 0x2c7   :  { %8289 = vmatprep.mubr.msk.f32.mxu0 %vm10081_vm2, %v11794_v14 }
 0x395   :  { %v8263_v30 = vpop.f32.mrb[6].mxu0 }
 0x396   :  { %v525_v15 = vadd.f32 %v8263_v30, %v10316_v11  ;;  %v519_v25 = vpop.f32.mrb[7].mxu0 }
 0x397   :  { %v520_v51 = vadd.f32 %v519_v25, %v10280_v52 }
 0x398   :  { %9566 = vtanh.f32 %v525_v15 }
 0x399   :  { %9568 = vtanh.f32 %v520_v51  ;;  %v8266_v3 = vpop.f32.mrb[8].mxu0 }
 0x39a   :  { %v535_v56 = vadd.f32 %v8266_v3, %v10376_v37  ;;  %v529_v42 = vpop.f32.mrb[9].mxu0 }
 0x39b   :  { %v530_v43 = vadd.f32 %v529_v42, %v10365_v10 }
 0x39c   :  { %9570 = vtanh.f32 %v535_v56 }
 0x39d   :  { %9572 = vtanh.f32 %v530_v43 }
 0x3a2   :  { %v9567_v26 = vpop.eup %9566 }
 0x3a3   :  { %v9569_v7 = vpop.eup %9568 }
 0x3a4   :  { %v9164_v22 = vpack.c.bf16 %v9567_v26, %v9569_v7 }
 0x3a6   :  { %v9571_v14 = vpop.eup %9570  ;;  %9165 = vmatprep.subr.bf16.mxu1 %v9164_v22 }
 0x3a7   :  { %v9573_v20 = vpop.eup %9572  ;;  %9167 = vmatpush3.bf16.msra.mxu1 %v9164_v22 }
 0x3a8   :  { %v9168_v30 = vpack.c.bf16 %v9571_v14, %v9573_v20 }
 0x3aa   :  { %9169 = vmatprep.subr.bf16.mxu1 %v9168_v30 }
 0x3ab   :  { %9171 = vmatpush3.bf16.msra.mxu1 %v9168_v30 }
 0x3ae   :  { %8276 = vmatmul.mubr.msk.f32.vlgmr.msra.gmra.mrb[4].mxu1 %vm275_vm1, %v10537_v9 }
 0x3af   :  { %8278 = vmatprep.mubr.msk.f32.mxu1 %vm275_vm1, %v10542_v6 }
 0x3b2   :  { %8279 = vmatmul.mubr.msk.f32.gmra.mrb[6].mxu1 %vm275_vm1, %v10551_v50 }
 0x3b3   :  { %8294 = vmatprep.mubr.msk.f32.mxu1 %vm173_vm0, %v10141_v1 }
 0x481   :  { %v8277_v7 = vpop.f32.mrb[4].mxu1 }
 0x482   :  { %v614_v15 = vadd.f32 %v8277_v7, %v10560_v55  ;;  %v608_v25 = vpop.f32.mrb[5].mxu1  ;;  %v11833_v7 = vmov 0.0|0.0  }
 0x483   :  { %v609_v22 = vadd.f32 %v608_v25, %v10562_v60 }
 0x484   :  { %9574 = vtanh.f32 %v614_v15 }
 0x485   :  { %9576 = vtanh.f32 %v609_v22  ;;  %v8280_v20 = vpop.f32.mrb[6].mxu1 }
 0x486   :  { %v624_v14 = vadd.f32 %v8280_v20, %v10566_v19  ;;  %v618_v51 = vpop.f32.mrb[7].mxu1 }
 0x487   :  { %v619_v3 = vadd.f32 %v618_v51, %v10568_v40 }
 0x488   :  { %9578 = vtanh.f32 %v624_v14 }
 0x489   :  { %9580 = vtanh.f32 %v619_v3 }
 0x48e   :  { %v9575_v56 = vpop.eup %9574 }
 0x48f   :  { %v9577_v42 = vpop.eup %9576 }
 0x490   :  { %v9173_v43 = vpack.c.bf16 %v9575_v56, %v9577_v42 }
 0x492   :  { %v9579_v26 = vpop.eup %9578  ;;  %9174 = vmatpush3.bf16.msra.mxu0 %v9173_v43 }
 0x493   :  { %v9581_v30 = vpop.eup %9580  ;;  %9175 = vmatprep.subr.bf16.mxu0 %v11833_v7 }
 0x494   :  { %v9176_v28 = vpack.c.bf16 %v9579_v26, %v9581_v30 }
 0x496   :  { %9177 = vmatpush3.bf16.msra.mxu0 %v9176_v28  ;;  %v11834_v28 = vmov 0.0  }
 0x499   :  { %8290 = vmatmul.mubr.msk.f32.vlgmr.msra.gmra.mrb[10].mxu0 %vm275_vm1, %v10576_v62 }
 0x49a   :  { %8308 = vmatprep.mubr.msk.f32.mxu0 %vm275_vm1, %v10233_v29 }
 0x56c   :  { %v697_v15 = vpop.f32.mrb[10].mxu0 }
 0x56d   :  { %v698_v25 = vadd.f32 %v697_v15, %v10582_v63  ;;  %v8291_v22 = vpop.f32.mrb[11].mxu0 }
 0x56f   :  { %9582 = vtanh.f32 %v698_v25 }
 0x579   :  { %v9583_v20 = vpop.eup %9582 }
 0x57a   :  { %v702_v14 = vmul.f32 %v9583_v20, %v10590_v61 }
 0x57c   :  { %v703_v51 = vadd.f32 %v702_v14, %v10136_v0 }
 0x57e   :  { %8292 = vmatprep.subr.mxu1 %v703_v51 }
 0x57f   :  { %8293 = vmatpush3.msra.mxu1 %v703_v51 }
 0x580   :  { %8295 = vmatmul.mubr.msk.f32.vlgmr.msra.gmra.mrb[8].mxu1 %vm173_vm0, %v10146_v2  ;;  %9186 = vmatprep.subr.bf16.mxu1 %v11833_v7 }
 0x581   :  { %8297 = vmatprep.mubr.msk.f32.mxu1 %vm173_vm0, %v10158_v4 }
 0x584   :  { %8298 = vmatmul.mubr.msk.f32.gmra.mrb[10].mxu1 %vm173_vm0, %v10177_v8 }
 0x585   :  { %8322 = vmatprep.mubr.msk.f32.mxu1 %vm10081_vm2, %v11834_v28 }
 0x653   :  { %v8296_v3 = vpop.f32.mrb[8].mxu1 }
 0x654   :  { %v776_v61 = vadd.f32 %v8296_v3, %v10316_v11  ;;  %v770_v56 = vpop.f32.mrb[9].mxu1 }
 0x655   :  { %v771_v42 = vadd.f32 %v770_v56, %v10280_v52 }
 0x656   :  { %9584 = vtanh.f32 %v776_v61 }
 0x657   :  { %9586 = vtanh.f32 %v771_v42  ;;  %v8299_v43 = vpop.f32.mrb[10].mxu1 }
 0x658   :  { %v786_v26 = vadd.f32 %v8299_v43, %v10376_v37  ;;  %v780_v30 = vpop.f32.mrb[11].mxu1 }
 0x659   :  { %v781_v15 = vadd.f32 %v780_v30, %v10365_v10 }
 0x65a   :  { %9588 = vtanh.f32 %v786_v26 }
 0x65b   :  { %9590 = vtanh.f32 %v781_v15 }
 0x660   :  { %v9585_v25 = vpop.eup %9584 }
 0x661   :  { %v9587_v22 = vpop.eup %9586 }
 0x662   :  { %v9178_v14 = vpack.c.bf16 %v9585_v25, %v9587_v22 }
 0x664   :  { %v9589_v51 = vpop.eup %9588  ;;  %9179 = vmatprep.subr.bf16.mxu0 %v9178_v14 }
 0x665   :  { %v9591_v45 = vpop.eup %9590  ;;  %9181 = vmatpush3.bf16.msra.mxu0 %v9178_v14 }
 0x666   :  { %v9182_v11 = vpack.c.bf16 %v9589_v51, %v9591_v45 }
 0x668   :  { %9183 = vmatprep.subr.bf16.mxu0 %v9182_v11 }
 0x669   :  { %9185 = vmatpush3.bf16.msra.mxu0 %v9182_v11 }
 0x66c   :  { %8309 = vmatmul.mubr.msk.f32.vlgmr.msra.gmra.mrb[12].mxu0 %vm275_vm1, %v10537_v9 }
 0x66d   :  { %8311 = vmatprep.mubr.msk.f32.mxu0 %vm275_vm1, %v10542_v6 }
 0x670   :  { %8312 = vmatmul.mubr.msk.f32.gmra.mrb[14].mxu0 %vm275_vm1, %v10551_v50 }
 0x671   :  { %8341 = vmatprep.mubr.msk.f32.mxu0 %vm275_vm1, %v10233_v29 }
 0x73f   :  { %v8310_v52 = vpop.f32.mrb[12].mxu0 }
 0x740   :  { %v865_v10 = vadd.f32 %v8310_v52, %v10560_v55  ;;  %v859_v37 = vpop.f32.mrb[13].mxu0  ;;  %v1204_v52 = vmul.f32 2.0, %v9583_v20 }
 0x741   :  { %v860_v45 = vadd.f32 %v859_v37, %v10562_v60 }
 0x742   :  { %9592 = vtanh.f32 %v865_v10  ;;  %v1205_v37 = vadd.f32 %v10592_v21, %v1204_v52 }
 0x743   :  { %9594 = vtanh.f32 %v860_v45  ;;  %v8313_v3 = vpop.f32.mrb[14].mxu0 }
 0x744   :  { %v875_v61 = vadd.f32 %v8313_v3, %v10566_v19  ;;  %v869_v56 = vpop.f32.mrb[15].mxu0 }
 0x745   :  { %v870_v42 = vadd.f32 %v869_v56, %v10568_v40 }
 0x746   :  { %9596 = vtanh.f32 %v875_v61 }
 0x747   :  { %9598 = vtanh.f32 %v870_v42 }
 0x74c   :  { %v9593_v43 = vpop.eup %9592 }
 0x74d   :  { %v9595_v26 = vpop.eup %9594 }
 0x74e   :  { %v9187_v30 = vpack.c.bf16 %v9593_v43, %v9595_v26 }
 0x750   :  { %v9597_v15 = vpop.eup %9596  ;;  %9188 = vmatpush3.bf16.msra.mxu1 %v9187_v30 }
 0x751   :  { %v9599_v25 = vpop.eup %9598  ;;  %9189 = vmatprep.subr.bf16.mxu1 %v11833_v7 }
 0x752   :  { %v9190_v22 = vpack.c.bf16 %v9597_v15, %v9599_v25 }
 0x754   :  { %9191 = vmatpush3.bf16.msra.mxu1 %v9190_v22 }
 0x757   :  { %8323 = vmatmul.mubr.msk.f32.vlgmr.msra.gmra.mrb[12].mxu1 %vm275_vm1, %v10576_v62 }
 0x758   :  { %8327 = vmatprep.mubr.msk.f32.mxu1 %vm173_vm0, %v10141_v1 }
 0x82a   :  { %v948_v14 = vpop.f32.mrb[12].mxu1 }
 0x82b   :  { %v949_v51 = vadd.f32 %v948_v14, %v10582_v63  ;;  %v8324_v11 = vpop.f32.mrb[13].mxu1 }
 0x82d   :  { %9600 = vtanh.f32 %v949_v51 }
 0x837   :  { %v9601_v10 = vpop.eup %9600 }
 0x838   :  { %v1206_v45 = vmul.f32 2.0, %v9601_v10  ;;  %v953_v3 = vmul.f32 %v9601_v10, %v10587_v39 }
 0x83a   :  { %v954_v61 = vadd.f32 %v953_v3, %v10136_v0  ;;  %v10664_v56 = vadd.f32 %v1206_v45, %v1205_v37 }
 0x83c   :  { %8325 = vmatprep.subr.mxu1 %v954_v61 }
 0x83d   :  { %8326 = vmatpush3.msra.mxu1 %v954_v61 }
 0x83e   :  { %8328 = vmatmul.mubr.msk.f32.vlgmr.msra.gmra.mrb[14].mxu1 %vm173_vm0, %v10146_v2  ;;  %9200 = vmatprep.subr.bf16.mxu1 %v11833_v7 }
 0x83f   :  { %8330 = vmatprep.mubr.msk.f32.mxu1 %vm173_vm0, %v10158_v4 }
 0x842   :  { %8331 = vmatmul.mubr.msk.f32.gmra.mrb[16].mxu1 %vm173_vm0, %v10177_v8 }
 0x843   :  { %8355 = vmatprep.mubr.msk.f32.mxu1 %vm10081_vm2, %v11834_v28 }
 0x911   :  { %v8329_v21 = vpop.f32.mrb[14].mxu1 }
 0x912   :  { %v1027_v20 = vadd.f32 %v8329_v21, %v10319_v12  ;;  %v1021_v42 = vpop.f32.mrb[15].mxu1 }
 0x913   :  { %v1022_v43 = vadd.f32 %v1021_v42, %v10283_v53 }
 0x914   :  { %9602 = vtanh.f32 %v1027_v20 }
 0x915   :  { %9604 = vtanh.f32 %v1022_v43  ;;  %v8332_v26 = vpop.f32.mrb[16].mxu1 }
 0x916   :  { %v1037_v30 = vadd.f32 %v8332_v26, %v10379_v47  ;;  %v1031_v15 = vpop.f32.mrb[17].mxu1 }
 0x917   :  { %v1032_v25 = vadd.f32 %v1031_v15, %v10368_v35 }
 0x918   :  { %9606 = vtanh.f32 %v1037_v30 }
 0x919   :  { %9608 = vtanh.f32 %v1032_v25 }
 0x91e   :  { %v9603_v22 = vpop.eup %9602 }
 0x91f   :  { %v9605_v14 = vpop.eup %9604 }
 0x920   :  { %v9192_v51 = vpack.c.bf16 %v9603_v22, %v9605_v14 }
 0x922   :  { %v9607_v11 = vpop.eup %9606  ;;  %9193 = vmatprep.subr.bf16.mxu0 %v9192_v51 }
 0x923   :  { %v9609_v52 = vpop.eup %9608  ;;  %9195 = vmatpush3.bf16.msra.mxu0 %v9192_v51 }
 0x924   :  { %v9196_v10 = vpack.c.bf16 %v9607_v11, %v9609_v52  ;;  %v136_v52 = vmul.f32 0.16666667, %v10587_v39 }
 0x926   :  { %9197 = vmatprep.subr.bf16.mxu0 %v9196_v10 }
 0x927   :  { %9199 = vmatpush3.bf16.msra.mxu0 %v9196_v10 }
 0x92a   :  { %8342 = vmatmul.mubr.msk.f32.vlgmr.msra.gmra.mrb[16].mxu0 %vm275_vm1, %v10537_v9 }
 0x92b   :  { %8344 = vmatprep.mubr.msk.f32.mxu0 %vm275_vm1, %v10542_v6 }
 0x92e   :  { %8345 = vmatmul.mubr.msk.f32.gmra.mrb[18].mxu0 %vm275_vm1, %v10551_v50 }
 0x92f   :  { %8360 = vmatprep.mubr.msk.f32.mxu0 %vm173_vm0, %v10141_v1 }
 0x9fd   :  { %v8343_v37 = vpop.f32.mrb[16].mxu0 }
 0x9fe   :  { %v1116_v45 = vadd.f32 %v8343_v37, %v10560_v55  ;;  %v1110_v3 = vpop.f32.mrb[17].mxu0 }
 0x9ff   :  { %v1111_v61 = vadd.f32 %v1110_v3, %v10562_v60 }
 0xa00   :  { %9610 = vtanh.f32 %v1116_v45 }
 0xa01   :  { %9612 = vtanh.f32 %v1111_v61  ;;  %v8346_v21 = vpop.f32.mrb[18].mxu0 }
 0xa02   :  { %v1126_v20 = vadd.f32 %v8346_v21, %v10566_v19  ;;  %v1120_v42 = vpop.f32.mrb[19].mxu0 }
 0xa03   :  { %v1121_v43 = vadd.f32 %v1120_v42, %v10568_v40 }
 0xa04   :  { %9614 = vtanh.f32 %v1126_v20 }
 0xa05   :  { %9616 = vtanh.f32 %v1121_v43 }
 0xa0a   :  { %v9611_v26 = vpop.eup %9610 }
 0xa0b   :  { %v9613_v30 = vpop.eup %9612 }
 0xa0c   :  { %v9201_v15 = vpack.c.bf16 %v9611_v26, %v9613_v30 }
 0xa0e   :  { %v9615_v1 = vpop.eup %9614  ;;  %9202 = vmatpush3.bf16.msra.mxu1 %v9201_v15 }
 0xa0f   :  { %v9617_v25 = vpop.eup %9616  ;;  %9203 = vmatprep.subr.bf16.mxu1 %v11833_v7 }
 0xa10   :  { %v9204_v22 = vpack.c.bf16 %v9615_v1, %v9617_v25 }
 0xa12   :  { %9205 = vmatpush3.bf16.msra.mxu1 %v9204_v22 }
 0xa15   :  { %8356 = vmatmul.mubr.msk.f32.vlgmr.msra.gmra.mrb[18].mxu1 %vm275_vm1, %v10576_v62 }
 0xa16   :  { %8374 = vmatprep.mubr.msk.f32.mxu1 %vm275_vm1, %v10233_v29 }
 0xae8   :  { %v1199_v14 = vpop.f32.mrb[18].mxu1 }
 0xae9   :  { %v1200_v51 = vadd.f32 %v1199_v14, %v10582_v63  ;;  %v8357_v11 = vpop.f32.mrb[19].mxu1 }
 0xaeb   :  { %9618 = vtanh.f32 %v1200_v51 }
 0xaf5   :  { %v9619_v10 = vpop.eup %9618 }
 0xaf6   :  { %v1208_v37 = vadd.f32 %v9619_v10, %v10664_v56 }
 0xaf8   :  { %v1209_v45 = vmul.f32 %v1208_v37, %v136_v52 }
 0xafa   :  { %v10700_v3 = vadd.f32 %v1209_v45, %v10136_v0  ;;  %v10739_v45 = vld [vmem:[%s11757_s3] sm:$0xff] }
 0xafc   :  { %7499 = vst [vmem:[%s11760_s9 + $0x8] sm:$0xff] %v10700_v3  ;;  %8358 = vmatprep.subr.mxu0 %v10700_v3 }
 0xafd   :  { %8359 = vmatpush3.msra.mxu0 %v10700_v3 }
 0xafe   :  { %8361 = vmatmul.mubr.msk.f32.vlgmr.msra.gmra.mrb[20].mxu0 %vm173_vm0, %v10146_v2  ;;  %9214 = vmatprep.subr.bf16.mxu0 %v11833_v7 }
 0xaff   :  { %8363 = vmatprep.mubr.msk.f32.mxu0 %vm173_vm0, %v10158_v4 }
 0xb02   :  { %8364 = vmatmul.mubr.msk.f32.gmra.mrb[22].mxu0 %vm173_vm0, %v10177_v8 }
 0xb03   :  { %8388 = vmatprep.mubr.msk.f32.mxu0 %vm10081_vm2, %v11834_v28 }
 0xbd1   :  { %v8362_v0 = vpop.f32.mrb[20].mxu0 }
 0xbd2   :  { %v1315_v39 = vadd.f32 %v8362_v0, %v10319_v12  ;;  %v1309_v56 = vpop.f32.mrb[21].mxu0 }
 0xbd3   :  { %v1310_v61 = vadd.f32 %v1309_v56, %v10283_v53 }
 0xbd4   :  { %9620 = vtanh.f32 %v1315_v39 }
 0xbd5   :  { %9622 = vtanh.f32 %v1310_v61  ;;  %v8365_v2 = vpop.f32.mrb[22].mxu0  ;;  %v10746_v61 = vrot.slane %v10220_v23, %v10241_v31  ;;  %v10767_v31 = vld [vmem:[%s11757_s3 + $0x10] sm:$0xff] }
 0xbd6   :  { %v1325_v21 = vadd.f32 %v8365_v2, %v10379_v47  ;;  %v1319_v20 = vpop.f32.mrb[23].mxu0 }
 0xbd7   :  { %v1320_v4 = vadd.f32 %v1319_v20, %v10368_v35  ;;  %v10749_v2 = vmul.f32 0.5, %v10746_v61 }
 0xbd8   :  { %9624 = vtanh.f32 %v1325_v21 }
 0xbd9   :  { %9626 = vtanh.f32 %v1320_v4 }
 0xbde   :  { %v9621_v8 = vpop.eup %9620 }
 0xbdf   :  { %v9623_v42 = vpop.eup %9622 }
 0xbe0   :  { %v9206_v43 = vpack.c.bf16 %v9621_v8, %v9623_v42  ;;  %v10759_v8 = vld [vmem:[%s11757_s3 + $0x8] sm:$0xff]  ;;  %v10774_v42 = vld [vmem:[%s11757_s3 + $0x18] sm:$0xff] }
 0xbe2   :  { %v9625_v26 = vpop.eup %9624  ;;  %9207 = vmatprep.subr.bf16.mxu1 %v9206_v43 }
 0xbe3   :  { %v9627_v30 = vpop.eup %9626  ;;  %9209 = vmatpush3.bf16.msra.mxu1 %v9206_v43 }
 0xbe4   :  { %v9210_v12 = vpack.c.bf16 %v9625_v26, %v9627_v30 }
 0xbe6   :  { %9211 = vmatprep.subr.bf16.mxu1 %v9210_v12 }
 0xbe7   :  { %9213 = vmatpush3.bf16.msra.mxu1 %v9210_v12 }
 0xbea   :  { %8375 = vmatmul.mubr.msk.f32.vlgmr.msra.gmra.mrb[20].mxu1 %vm275_vm1, %v10537_v9 }
 0xbeb   :  { %8377 = vmatprep.mubr.msk.f32.mxu1 %vm275_vm1, %v10542_v6 }
 0xbee   :  { %8378 = vmatmul.mubr.msk.f32.gmra.mrb[22].mxu1 %vm275_vm1, %v10551_v50 }
 0xbef   :  { %8407 = vmatprep.mubr.msk.f32.mxu1 %vm275_vm1, %v10233_v29 }
 0xcbd   :  { %v8376_v47 = vpop.f32.mrb[20].mxu1 }
 0xcbe   :  { %v1404_v53 = vadd.f32 %v8376_v47, %v10560_v55  ;;  %v1398_v35 = vpop.f32.mrb[21].mxu1 }
 0xcbf   :  { %v1399_v15 = vadd.f32 %v1398_v35, %v10562_v60 }
 0xcc0   :  { %9628 = vtanh.f32 %v1404_v53 }
 0xcc1   :  { %9630 = vtanh.f32 %v1399_v15  ;;  %v8379_v1 = vpop.f32.mrb[22].mxu1 }
 0xcc2   :  { %v1414_v25 = vadd.f32 %v8379_v1, %v10566_v19  ;;  %v1408_v22 = vpop.f32.mrb[23].mxu1 }
 0xcc3   :  { %v1409_v14 = vadd.f32 %v1408_v22, %v10568_v40 }
 0xcc4   :  { %9632 = vtanh.f32 %v1414_v25 }
 0xcc5   :  { %9634 = vtanh.f32 %v1409_v14 }
 0xcca   :  { %v9629_v51 = vpop.eup %9628 }
 0xccb   :  { %v9631_v11 = vpop.eup %9630 }
 0xccc   :  { %v9215_v52 = vpack.c.bf16 %v9629_v51, %v9631_v11 }
 0xcce   :  { %v9633_v29 = vpop.eup %9632  ;;  %9216 = vmatpush3.bf16.msra.mxu0 %v9215_v52 }
 0xccf   :  { %v9635_v10 = vpop.eup %9634  ;;  %9217 = vmatprep.subr.bf16.mxu0 %v11833_v7 }
 0xcd0   :  { %v9218_v37 = vpack.c.bf16 %v9633_v29, %v9635_v10 }
 0xcd2   :  { %9219 = vmatpush3.bf16.msra.mxu0 %v9218_v37 }
 0xcd5   :  { %8389 = vmatmul.mubr.msk.f32.vlgmr.msra.gmra.mrb[24].mxu0 %vm275_vm1, %v10576_v62 }
 0xcd6   :  { %8393 = vmatprep.mubr.msk.f32.mxu0 %vm173_vm0, %v10739_v45 }
 0xda8   :  { %v1487_v0 = vpop.f32.mrb[24].mxu0 }
 0xda9   :  { %v1488_v39 = vadd.f32 %v1487_v0, %v10582_v63  ;;  %v8390_v56 = vpop.f32.mrb[25].mxu0 }
 0xdab   :  { %9636 = vtanh.f32 %v1488_v39 }
 0xdb5   :  { %v10751_v21 = vpop.eup %9636 }
 0xdb6   :  { %v1492_v20 = vmul.f32 %v10751_v21, %v10749_v2 }
 0xdb8   :  { %v1493_v4 = vadd.f32 %v1492_v20, %v10700_v3 }
 0xdba   :  { %8391 = vmatprep.subr.mxu0 %v1493_v4 }
 0xdbb   :  { %8392 = vmatpush3.msra.mxu0 %v1493_v4 }
 0xdbc   :  { %8394 = vmatmul.mubr.msk.f32.vlgmr.msra.gmra.mrb[26].mxu0 %vm173_vm0, %v10759_v8  ;;  %9228 = vmatprep.subr.bf16.mxu0 %v11833_v7 }
 0xdbd   :  { %8396 = vmatprep.mubr.msk.f32.mxu0 %vm173_vm0, %v10767_v31 }
 0xdc0   :  { %8397 = vmatmul.mubr.msk.f32.gmra.mrb[28].mxu0 %vm173_vm0, %v10774_v42 }
 0xdc1   :  { %8421 = vmatprep.mubr.msk.f32.mxu0 %vm10081_vm2, %v11834_v28 }
 0xe8f   :  { %v8395_v43 = vpop.f32.mrb[26].mxu0 }
 0xe90   :  { %v1566_v26 = vadd.f32 %v8395_v43, %v10322_v13  ;;  %v1560_v30 = vpop.f32.mrb[27].mxu0 }
 0xe91   :  { %v1561_v12 = vadd.f32 %v1560_v30, %v10286_v54 }
 0xe92   :  { %9638 = vtanh.f32 %v1566_v26 }
 0xe93   :  { %9640 = vtanh.f32 %v1561_v12  ;;  %v8398_v47 = vpop.f32.mrb[28].mxu0 }
 0xe94   :  { %v1576_v53 = vadd.f32 %v8398_v47, %v10382_v38  ;;  %v1570_v35 = vpop.f32.mrb[29].mxu0 }
 0xe95   :  { %v1571_v15 = vadd.f32 %v1570_v35, %v10371_v36 }
 0xe96   :  { %9642 = vtanh.f32 %v1576_v53  ;;  %v10802_v53 = vld [vmem:[%s11764_s5] sm:$0xff] }
 0xe97   :  { %9644 = vtanh.f32 %v1571_v15 }
 0xe9c   :  { %v9639_v1 = vpop.eup %9638 }
 0xe9d   :  { %v9641_v25 = vpop.eup %9640 }
 0xe9e   :  { %v9220_v22 = vpack.c.bf16 %v9639_v1, %v9641_v25 }
 0xea0   :  { %v9643_v14 = vpop.eup %9642  ;;  %9221 = vmatprep.subr.bf16.mxu1 %v9220_v22 }
 0xea1   :  { %v9645_v51 = vpop.eup %9644  ;;  %9223 = vmatpush3.bf16.msra.mxu1 %v9220_v22 }
 0xea2   :  { %v9224_v11 = vpack.c.bf16 %v9643_v14, %v9645_v51 }
 0xea4   :  { %9225 = vmatprep.subr.bf16.mxu1 %v9224_v11 }
 0xea5   :  { %9227 = vmatpush3.bf16.msra.mxu1 %v9224_v11 }
 0xea8   :  { %8408 = vmatmul.mubr.msk.f32.vlgmr.msra.gmra.mrb[24].mxu1 %vm275_vm1, %v10537_v9 }
 0xea9   :  { %8410 = vmatprep.mubr.msk.f32.mxu1 %vm275_vm1, %v10542_v6 }
 0xeac   :  { %8411 = vmatmul.mubr.msk.f32.gmra.mrb[26].mxu1 %vm275_vm1, %v10551_v50 }
 0xead   :  { %8426 = vmatprep.mubr.msk.f32.mxu1 %vm173_vm0, %v10739_v45 }
 0xf7b   :  { %v8409_v52 = vpop.f32.mrb[24].mxu1 }
 0xf7c   :  { %v1655_v29 = vadd.f32 %v8409_v52, %v10560_v55  ;;  %v1649_v10 = vpop.f32.mrb[25].mxu1 }
 0xf7d   :  { %v1650_v37 = vadd.f32 %v1649_v10, %v10562_v60 }
 0xf7e   :  { %9646 = vtanh.f32 %v1655_v29 }
 0xf7f   :  { %9648 = vtanh.f32 %v1650_v37  ;;  %v8412_v0 = vpop.f32.mrb[26].mxu1 }
 0xf80   :  { %v1665_v39 = vadd.f32 %v8412_v0, %v10566_v19  ;;  %v1659_v56 = vpop.f32.mrb[27].mxu1 }
 0xf81   :  { %v1660_v20 = vadd.f32 %v1659_v56, %v10568_v40 }
 0xf82   :  { %9650 = vtanh.f32 %v1665_v39 }
 0xf83   :  { %9652 = vtanh.f32 %v1660_v20 }
 0xf88   :  { %v9647_v4 = vpop.eup %9646 }
 0xf89   :  { %v9649_v43 = vpop.eup %9648 }
 0xf8a   :  { %v9229_v26 = vpack.c.bf16 %v9647_v4, %v9649_v43 }
 0xf8c   :  { %v9651_v30 = vpop.eup %9650  ;;  %9230 = vmatpush3.bf16.msra.mxu0 %v9229_v26 }
 0xf8d   :  { %v9653_v12 = vpop.eup %9652  ;;  %9231 = vmatprep.subr.bf16.mxu0 %v11833_v7 }
 0xf8e   :  { %v9232_v47 = vpack.c.bf16 %v9651_v30, %v9653_v12 }
 0xf90   :  { %9233 = vmatpush3.bf16.msra.mxu0 %v9232_v47 }
 0xf93   :  { %8422 = vmatmul.mubr.msk.f32.vlgmr.msra.gmra.mrb[30].mxu0 %vm275_vm1, %v10576_v62 }
 0xf94   :  { %8440 = vmatprep.mubr.msk.f32.mxu0 %vm275_vm1, %v10802_v53 }
0x1066   :  { %v1738_v35 = vpop.f32.mrb[30].mxu0 }
0x1067   :  { %v1739_v15 = vadd.f32 %v1738_v35, %v10582_v63  ;;  %v8423_v1 = vpop.f32.mrb[31].mxu0 }
0x1069   :  { %9654 = vtanh.f32 %v1739_v15 }
0x1073   :  { %v9655_v25 = vpop.eup %9654 }
0x1074   :  { %v1743_v22 = vmul.f32 %v9655_v25, %v10749_v2 }
0x1076   :  { %v1744_v14 = vadd.f32 %v1743_v22, %v10700_v3 }
0x1078   :  { %8424 = vmatprep.subr.mxu1 %v1744_v14 }
0x1079   :  { %8425 = vmatpush3.msra.mxu1 %v1744_v14 }
0x107a   :  { %8427 = vmatmul.mubr.msk.f32.vlgmr.msra.gmra.mrb[28].mxu1 %vm173_vm0, %v10759_v8  ;;  %9242 = vmatprep.subr.bf16.mxu1 %v11833_v7 }
0x107b   :  { %8429 = vmatprep.mubr.msk.f32.mxu1 %vm173_vm0, %v10767_v31 }
0x107e   :  { %8430 = vmatmul.mubr.msk.f32.gmra.mrb[30].mxu1 %vm173_vm0, %v10774_v42 }
0x107f   :  { %8454 = vmatprep.mubr.msk.f32.mxu1 %vm10081_vm2, %v11834_v28 }
0x114d   :  { %v8428_v51 = vpop.f32.mrb[28].mxu1 }
0x114e   :  { %v1817_v2 = vadd.f32 %v8428_v51, %v10322_v13  ;;  %v1811_v11 = vpop.f32.mrb[29].mxu1 }
0x114f   :  { %v1812_v52 = vadd.f32 %v1811_v11, %v10286_v54 }
0x1150   :  { %9656 = vtanh.f32 %v1817_v2 }
0x1151   :  { %9658 = vtanh.f32 %v1812_v52  ;;  %v8431_v29 = vpop.f32.mrb[30].mxu1 }
0x1152   :  { %v1827_v10 = vadd.f32 %v8431_v29, %v10382_v38  ;;  %v1821_v37 = vpop.f32.mrb[31].mxu1 }
0x1153   :  { %v1822_v0 = vadd.f32 %v1821_v37, %v10371_v36 }
0x1154   :  { %9660 = vtanh.f32 %v1827_v10  ;;  %v2245_v10 = vmul.f32 2.0, %v9655_v25 }
0x1155   :  { %9662 = vtanh.f32 %v1822_v0 }
0x1156   :  { %v2246_v0 = vadd.f32 %v10751_v21, %v2245_v10 }
0x115a   :  { %v9657_v39 = vpop.eup %9656 }
0x115b   :  { %v9659_v56 = vpop.eup %9658 }
0x115c   :  { %v9234_v20 = vpack.c.bf16 %v9657_v39, %v9659_v56 }
0x115e   :  { %v9661_v4 = vpop.eup %9660  ;;  %9235 = vmatprep.subr.bf16.mxu0 %v9234_v20 }
0x115f   :  { %v9663_v43 = vpop.eup %9662  ;;  %9237 = vmatpush3.bf16.msra.mxu0 %v9234_v20 }
0x1160   :  { %v9238_v13 = vpack.c.bf16 %v9661_v4, %v9663_v43 }
0x1162   :  { %9239 = vmatprep.subr.bf16.mxu0 %v9238_v13 }
0x1163   :  { %9241 = vmatpush3.bf16.msra.mxu0 %v9238_v13 }
0x1166   :  { %8441 = vmatmul.mubr.msk.f32.vlgmr.msra.gmra.mrb[32].mxu0 %vm275_vm1, %v10537_v9 }
0x1167   :  { %8443 = vmatprep.mubr.msk.f32.mxu0 %vm275_vm1, %v10542_v6 }
0x116a   :  { %8444 = vmatmul.mubr.msk.f32.gmra.mrb[34].mxu0 %vm275_vm1, %v10551_v50 }
0x116b   :  { %8473 = vmatprep.mubr.msk.f32.mxu0 %vm275_vm1, %v10802_v53 }
0x1239   :  { %v8442_v54 = vpop.f32.mrb[32].mxu0 }
0x123a   :  { %v1906_v36 = vadd.f32 %v8442_v54, %v10560_v55  ;;  %v1900_v38 = vpop.f32.mrb[33].mxu0 }
0x123b   :  { %v1901_v26 = vadd.f32 %v1900_v38, %v10562_v60 }
0x123c   :  { %9664 = vtanh.f32 %v1906_v36 }
0x123d   :  { %9666 = vtanh.f32 %v1901_v26  ;;  %v8445_v30 = vpop.f32.mrb[34].mxu0 }
0x123e   :  { %v1916_v12 = vadd.f32 %v8445_v30, %v10566_v19  ;;  %v1910_v47 = vpop.f32.mrb[35].mxu0 }
0x123f   :  { %v1911_v35 = vadd.f32 %v1910_v47, %v10568_v40 }
0x1240   :  { %9668 = vtanh.f32 %v1916_v12 }
0x1241   :  { %9670 = vtanh.f32 %v1911_v35 }
0x1246   :  { %v9665_v15 = vpop.eup %9664 }
0x1247   :  { %v9667_v1 = vpop.eup %9666 }
0x1248   :  { %v9243_v22 = vpack.c.bf16 %v9665_v15, %v9667_v1 }
0x124a   :  { %v9669_v14 = vpop.eup %9668  ;;  %9244 = vmatpush3.bf16.msra.mxu1 %v9243_v22 }
0x124b   :  { %v9671_v51 = vpop.eup %9670  ;;  %9245 = vmatprep.subr.bf16.mxu1 %v11833_v7 }
0x124c   :  { %v9246_v2 = vpack.c.bf16 %v9669_v14, %v9671_v51 }
0x124e   :  { %9247 = vmatpush3.bf16.msra.mxu1 %v9246_v2 }
0x1251   :  { %8455 = vmatmul.mubr.msk.f32.vlgmr.msra.gmra.mrb[32].mxu1 %vm275_vm1, %v10576_v62 }
0x1252   :  { %8459 = vmatprep.mubr.msk.f32.mxu1 %vm173_vm0, %v10739_v45 }
0x1324   :  { %v1989_v11 = vpop.f32.mrb[32].mxu1 }
0x1325   :  { %v1990_v52 = vadd.f32 %v1989_v11, %v10582_v63  ;;  %v8456_v29 = vpop.f32.mrb[33].mxu1 }
0x1327   :  { %9672 = vtanh.f32 %v1990_v52 }
0x1331   :  { %v9673_v37 = vpop.eup %9672 }
0x1332   :  { %v2247_v39 = vmul.f32 2.0, %v9673_v37  ;;  %v1994_v56 = vmul.f32 %v9673_v37, %v10746_v61 }
0x1334   :  { %v1995_v20 = vadd.f32 %v1994_v56, %v10700_v3  ;;  %v10843_v4 = vadd.f32 %v2247_v39, %v2246_v0 }
0x1336   :  { %8457 = vmatprep.subr.mxu1 %v1995_v20 }
0x1337   :  { %8458 = vmatpush3.msra.mxu1 %v1995_v20 }
0x1338   :  { %8460 = vmatmul.mubr.msk.f32.vlgmr.msra.gmra.mrb[34].mxu1 %vm173_vm0, %v10759_v8  ;;  %9256 = vmatprep.subr.bf16.mxu1 %v11833_v7 }
0x1339   :  { %8462 = vmatprep.mubr.msk.f32.mxu1 %vm173_vm0, %v10767_v31 }
0x133c   :  { %8463 = vmatmul.mubr.msk.f32.gmra.mrb[36].mxu1 %vm173_vm0, %v10774_v42 }
0x133d   :  { %8487 = vmatprep.mubr.msk.f32.mxu1 %vm10081_vm2, %v11834_v28 }
0x140b   :  { %v8461_v21 = vpop.f32.mrb[34].mxu1 }
0x140c   :  { %v2068_v25 = vadd.f32 %v8461_v21, %v10329_v16  ;;  %v2062_v43 = vpop.f32.mrb[35].mxu1 }
0x140d   :  { %v2063_v13 = vadd.f32 %v2062_v43, %v10293_v57 }
0x140e   :  { %9674 = vtanh.f32 %v2068_v25  ;;  %v1218_v25 = vmul.f32 0.16666667, %v10746_v61 }
0x140f   :  { %9676 = vtanh.f32 %v2063_v13  ;;  %v8464_v54 = vpop.f32.mrb[36].mxu1 }
0x1410   :  { %v2078_v36 = vadd.f32 %v8464_v54, %v10388_v41  ;;  %v2072_v38 = vpop.f32.mrb[37].mxu1 }
0x1411   :  { %v2073_v26 = vadd.f32 %v2072_v38, %v10391_v44 }
0x1412   :  { %9678 = vtanh.f32 %v2078_v36 }
0x1413   :  { %9680 = vtanh.f32 %v2073_v26 }
0x1418   :  { %v9675_v30 = vpop.eup %9674 }
0x1419   :  { %v9677_v12 = vpop.eup %9676 }
0x141a   :  { %v9248_v47 = vpack.c.bf16 %v9675_v30, %v9677_v12 }
0x141c   :  { %v9679_v35 = vpop.eup %9678  ;;  %9249 = vmatprep.subr.bf16.mxu0 %v9248_v47 }
0x141d   :  { %v9681_v15 = vpop.eup %9680  ;;  %9251 = vmatpush3.bf16.msra.mxu0 %v9248_v47 }
0x141e   :  { %v9252_v1 = vpack.c.bf16 %v9679_v35, %v9681_v15 }
0x1420   :  { %9253 = vmatprep.subr.bf16.mxu0 %v9252_v1 }
0x1421   :  { %9255 = vmatpush3.bf16.msra.mxu0 %v9252_v1 }
0x1424   :  { %8474 = vmatmul.mubr.msk.f32.vlgmr.msra.gmra.mrb[36].mxu0 %vm275_vm1, %v10537_v9 }
0x1425   :  { %8476 = vmatprep.mubr.msk.f32.mxu0 %vm275_vm1, %v10542_v6 }
0x1428   :  { %8477 = vmatmul.mubr.msk.f32.gmra.mrb[38].mxu0 %vm275_vm1, %v10551_v50 }
0x1429   :  { %8492 = vmatprep.mubr.msk.f32.mxu0 %vm173_vm0, %v10739_v45 }
0x14f7   :  { %v8475_v22 = vpop.f32.mrb[36].mxu0 }
0x14f8   :  { %v2157_v14 = vadd.f32 %v8475_v22, %v10560_v55  ;;  %v2151_v51 = vpop.f32.mrb[37].mxu0 }
0x14f9   :  { %v2152_v2 = vadd.f32 %v2151_v51, %v10562_v60 }
0x14fa   :  { %9682 = vtanh.f32 %v2157_v14 }
0x14fb   :  { %9684 = vtanh.f32 %v2152_v2  ;;  %v8478_v11 = vpop.f32.mrb[38].mxu0 }
0x14fc   :  { %v2167_v9 = vadd.f32 %v8478_v11, %v10566_v19  ;;  %v2161_v52 = vpop.f32.mrb[39].mxu0 }
0x14fd   :  { %v2162_v6 = vadd.f32 %v2161_v52, %v10568_v40 }
0x14fe   :  { %9686 = vtanh.f32 %v2167_v9 }
0x14ff   :  { %9688 = vtanh.f32 %v2162_v6 }
0x1504   :  { %v9683_v50 = vpop.eup %9682 }
0x1505   :  { %v9685_v29 = vpop.eup %9684 }
0x1506   :  { %v9257_v10 = vpack.c.bf16 %v9683_v50, %v9685_v29 }
0x1508   :  { %v9687_v37 = vpop.eup %9686  ;;  %9258 = vmatpush3.bf16.msra.mxu1 %v9257_v10 }
0x1509   :  { %v9689_v0 = vpop.eup %9688  ;;  %9259 = vmatprep.subr.bf16.mxu1 %v11833_v7 }
0x150a   :  { %v9260_v39 = vpack.c.bf16 %v9687_v37, %v9689_v0 }
0x150c   :  { %9261 = vmatpush3.bf16.msra.mxu1 %v9260_v39 }
0x150f   :  { %8488 = vmatmul.mubr.msk.f32.vlgmr.msra.gmra.mrb[38].mxu1 %vm275_vm1, %v10576_v62 }
0x1510   :  { %8506 = vmatprep.mubr.msk.f32.mxu1 %vm275_vm1, %v10802_v53 }
0x15e2   :  { %v2240_v56 = vpop.f32.mrb[38].mxu1 }
0x15e3   :  { %v2241_v20 = vadd.f32 %v2240_v56, %v10582_v63  ;;  %v8489_v21 = vpop.f32.mrb[39].mxu1 }
0x15e5   :  { %9690 = vtanh.f32 %v2241_v20  ;;  %v10931_v20 = vld [vmem:[%s11765_s7] sm:$0xff] }
0x15ef   :  { %v9691_v43 = vpop.eup %9690 }
0x15f0   :  { %v2249_v13 = vadd.f32 %v9691_v43, %v10843_v4 }
0x15f2   :  { %v2250_v54 = vmul.f32 %v2249_v13, %v1218_v25  ;;  %v10940_v13 = vrot.slane %v10220_v23, %v10244_v32 }
0x15f4   :  { %v10879_v36 = vadd.f32 %v2250_v54, %v10700_v3  ;;  %v10943_v54 = vmul.f32 0.5, %v10940_v13 }
0x15f6   :  { %7536 = vst [vmem:[%s11760_s9 + $0x10] sm:$0xff] %v10879_v36  ;;  %8490 = vmatprep.subr.mxu0 %v10879_v36 }
0x15f7   :  { %8491 = vmatpush3.msra.mxu0 %v10879_v36 }
0x15f8   :  { %8493 = vmatmul.mubr.msk.f32.vlgmr.msra.gmra.mrb[40].mxu0 %vm173_vm0, %v10759_v8  ;;  %9270 = vmatprep.subr.bf16.mxu0 %v11833_v7 }
0x15f9   :  { %8495 = vmatprep.mubr.msk.f32.mxu0 %vm173_vm0, %v10767_v31 }
0x15fc   :  { %8496 = vmatmul.mubr.msk.f32.gmra.mrb[42].mxu0 %vm173_vm0, %v10774_v42 }
0x15fd   :  { %8520 = vmatprep.mubr.msk.f32.mxu0 %vm10081_vm2, %v11834_v28 }
0x16cb   :  { %v8494_v62 = vpop.f32.mrb[40].mxu0 }
0x16cc   :  { %v2356_v3 = vadd.f32 %v8494_v62, %v10329_v16  ;;  %v2350_v61 = vpop.f32.mrb[41].mxu0 }
0x16cd   :  { %v2351_v4 = vadd.f32 %v2350_v61, %v10293_v57  ;;  %v10903_v57 = vld [vmem:[%s11764_s5 + $0x8] sm:$0xff] }
0x16ce   :  { %9692 = vtanh.f32 %v2356_v3 }
0x16cf   :  { %9694 = vtanh.f32 %v2351_v4  ;;  %v8497_v38 = vpop.f32.mrb[42].mxu0 }
0x16d0   :  { %v2366_v26 = vadd.f32 %v8497_v38, %v10388_v41  ;;  %v2360_v30 = vpop.f32.mrb[43].mxu0  ;;  %v10910_v41 = vld [vmem:[%s11764_s5 + $0x10] sm:$0xff] }
0x16d1   :  { %v2361_v12 = vadd.f32 %v2360_v30, %v10391_v44  ;;  %v10917_v44 = vld [vmem:[%s11764_s5 + $0x18] sm:$0xff] }
0x16d2   :  { %9696 = vtanh.f32 %v2366_v26 }
0x16d3   :  { %9698 = vtanh.f32 %v2361_v12 }
0x16d8   :  { %v9693_v47 = vpop.eup %9692 }
0x16d9   :  { %v9695_v35 = vpop.eup %9694 }
0x16da   :  { %v9262_v15 = vpack.c.bf16 %v9693_v47, %v9695_v35 }
0x16dc   :  { %v9697_v1 = vpop.eup %9696  ;;  %9263 = vmatprep.subr.bf16.mxu1 %v9262_v15 }
0x16dd   :  { %v9699_v22 = vpop.eup %9698  ;;  %9265 = vmatpush3.bf16.msra.mxu1 %v9262_v15 }
0x16de   :  { %v9266_v16 = vpack.c.bf16 %v9697_v1, %v9699_v22 }
0x16e0   :  { %9267 = vmatprep.subr.bf16.mxu1 %v9266_v16 }
0x16e1   :  { %9269 = vmatpush3.bf16.msra.mxu1 %v9266_v16 }
0x16e4   :  { %8507 = vmatmul.mubr.msk.f32.vlgmr.msra.gmra.mrb[40].mxu1 %vm275_vm1, %v10903_v57 }
0x16e5   :  { %8509 = vmatprep.mubr.msk.f32.mxu1 %vm275_vm1, %v10910_v41 }
0x16e8   :  { %8510 = vmatmul.mubr.msk.f32.gmra.mrb[42].mxu1 %vm275_vm1, %v10917_v44 }
0x16e9   :  { %8539 = vmatprep.mubr.msk.f32.mxu1 %vm275_vm1, %v10802_v53 }
0x17b7   :  { %v8508_v14 = vpop.f32.mrb[40].mxu1 }
0x17b8   :  { %v2445_v51 = vadd.f32 %v8508_v14, %v10560_v55  ;;  %v2439_v2 = vpop.f32.mrb[41].mxu1 }
0x17b9   :  { %v2440_v11 = vadd.f32 %v2439_v2, %v10562_v60 }
0x17ba   :  { %9700 = vtanh.f32 %v2445_v51 }
0x17bb   :  { %9702 = vtanh.f32 %v2440_v11  ;;  %v8511_v9 = vpop.f32.mrb[42].mxu1 }
0x17bc   :  { %v2455_v52 = vadd.f32 %v8511_v9, %v10566_v19  ;;  %v2449_v6 = vpop.f32.mrb[43].mxu1 }
0x17bd   :  { %v2450_v50 = vadd.f32 %v2449_v6, %v10568_v40 }
0x17be   :  { %9704 = vtanh.f32 %v2455_v52 }
0x17bf   :  { %9706 = vtanh.f32 %v2450_v50 }
0x17c4   :  { %v9701_v29 = vpop.eup %9700 }
0x17c5   :  { %v9703_v10 = vpop.eup %9702 }
0x17c6   :  { %v9271_v37 = vpack.c.bf16 %v9701_v29, %v9703_v10 }
0x17c8   :  { %v9705_v0 = vpop.eup %9704  ;;  %9272 = vmatpush3.bf16.msra.mxu0 %v9271_v37 }
0x17c9   :  { %v9707_v39 = vpop.eup %9706  ;;  %9273 = vmatprep.subr.bf16.mxu0 %v11833_v7 }
0x17ca   :  { %v9274_v56 = vpack.c.bf16 %v9705_v0, %v9707_v39 }
0x17cc   :  { %9275 = vmatpush3.bf16.msra.mxu0 %v9274_v56 }
0x17cf   :  { %8521 = vmatmul.mubr.msk.f32.vlgmr.msra.gmra.mrb[44].mxu0 %vm275_vm1, %v10931_v20 }
0x17d0   :  { %8525 = vmatprep.mubr.msk.f32.mxu0 %vm173_vm0, %v10739_v45 }
0x18a2   :  { %v2528_v21 = vpop.f32.mrb[44].mxu0 }
0x18a3   :  { %v2529_v25 = vadd.f32 %v2528_v21, %v10582_v63  ;;  %v8522_v43 = vpop.f32.mrb[45].mxu0 }
0x18a5   :  { %9708 = vtanh.f32 %v2529_v25 }
0x18af   :  { %v10945_v62 = vpop.eup %9708 }
0x18b0   :  { %v2533_v3 = vmul.f32 %v10945_v62, %v10943_v54 }
0x18b2   :  { %v2534_v61 = vadd.f32 %v2533_v3, %v10879_v36 }
0x18b4   :  { %8523 = vmatprep.subr.mxu0 %v2534_v61 }
0x18b5   :  { %8524 = vmatpush3.msra.mxu0 %v2534_v61 }
0x18b6   :  { %8526 = vmatmul.mubr.msk.f32.vlgmr.msra.gmra.mrb[46].mxu0 %vm173_vm0, %v10759_v8  ;;  %9284 = vmatprep.subr.bf16.mxu0 %v11833_v7 }
0x18b7   :  { %8528 = vmatprep.mubr.msk.f32.mxu0 %vm173_vm0, %v10767_v31 }
0x18ba   :  { %8529 = vmatmul.mubr.msk.f32.gmra.mrb[48].mxu0 %vm173_vm0, %v10774_v42 }
0x18bb   :  { %8553 = vmatprep.mubr.msk.f32.mxu0 %vm10081_vm2, %v11834_v28 }
0x1989   :  { %v8527_v32 = vpop.f32.mrb[46].mxu0 }
0x198a   :  { %v2607_v4 = vadd.f32 %v8527_v32, %v10332_v17  ;;  %v2601_v38 = vpop.f32.mrb[47].mxu0 }
0x198b   :  { %v2602_v26 = vadd.f32 %v2601_v38, %v10296_v58 }
0x198c   :  { %9710 = vtanh.f32 %v2607_v4 }
0x198d   :  { %9712 = vtanh.f32 %v2602_v26  ;;  %v8530_v30 = vpop.f32.mrb[48].mxu0 }
0x198e   :  { %v2617_v12 = vadd.f32 %v8530_v30, %v10394_v27  ;;  %v2611_v47 = vpop.f32.mrb[49].mxu0 }
0x198f   :  { %v2612_v35 = vadd.f32 %v2611_v47, %v10397_v46 }
0x1990   :  { %9714 = vtanh.f32 %v2617_v12 }
0x1991   :  { %9716 = vtanh.f32 %v2612_v35 }
0x1996   :  { %v9711_v15 = vpop.eup %9710 }
0x1997   :  { %v9713_v1 = vpop.eup %9712 }
0x1998   :  { %v9276_v22 = vpack.c.bf16 %v9711_v15, %v9713_v1 }
0x199a   :  { %v9715_v16 = vpop.eup %9714  ;;  %9277 = vmatprep.subr.bf16.mxu1 %v9276_v22 }
0x199b   :  { %v9717_v14 = vpop.eup %9716  ;;  %9279 = vmatpush3.bf16.msra.mxu1 %v9276_v22 }
0x199c   :  { %v9280_v51 = vpack.c.bf16 %v9715_v16, %v9717_v14 }
0x199e   :  { %9281 = vmatprep.subr.bf16.mxu1 %v9280_v51 }
0x199f   :  { %9283 = vmatpush3.bf16.msra.mxu1 %v9280_v51 }
0x19a2   :  { %8540 = vmatmul.mubr.msk.f32.vlgmr.msra.gmra.mrb[44].mxu1 %vm275_vm1, %v10903_v57 }
0x19a3   :  { %8542 = vmatprep.mubr.msk.f32.mxu1 %vm275_vm1, %v10910_v41 }
0x19a6   :  { %8543 = vmatmul.mubr.msk.f32.gmra.mrb[46].mxu1 %vm275_vm1, %v10917_v44 }
0x19a7   :  { %8558 = vmatprep.mubr.msk.f32.mxu1 %vm173_vm0, %v10739_v45 }
0x1a75   :  { %v8541_v2 = vpop.f32.mrb[44].mxu1 }
0x1a76   :  { %v2696_v11 = vadd.f32 %v8541_v2, %v10560_v55  ;;  %v2690_v9 = vpop.f32.mrb[45].mxu1 }
0x1a77   :  { %v2691_v52 = vadd.f32 %v2690_v9, %v10562_v60 }
0x1a78   :  { %9718 = vtanh.f32 %v2696_v11 }
0x1a79   :  { %9720 = vtanh.f32 %v2691_v52  ;;  %v8544_v6 = vpop.f32.mrb[46].mxu1 }
0x1a7a   :  { %v2706_v50 = vadd.f32 %v8544_v6, %v10566_v19  ;;  %v2700_v29 = vpop.f32.mrb[47].mxu1 }
0x1a7b   :  { %v2701_v10 = vadd.f32 %v2700_v29, %v10568_v40 }
0x1a7c   :  { %9722 = vtanh.f32 %v2706_v50 }
0x1a7d   :  { %9724 = vtanh.f32 %v2701_v10 }
0x1a82   :  { %v9719_v37 = vpop.eup %9718 }
0x1a83   :  { %v9721_v0 = vpop.eup %9720 }
0x1a84   :  { %v9285_v39 = vpack.c.bf16 %v9719_v37, %v9721_v0 }
0x1a86   :  { %v9723_v56 = vpop.eup %9722  ;;  %9286 = vmatpush3.bf16.msra.mxu0 %v9285_v39 }
0x1a87   :  { %v9725_v21 = vpop.eup %9724  ;;  %9287 = vmatprep.subr.bf16.mxu0 %v11833_v7 }
0x1a88   :  { %v9288_v25 = vpack.c.bf16 %v9723_v56, %v9725_v21 }
0x1a8a   :  { %9289 = vmatpush3.bf16.msra.mxu0 %v9288_v25 }
0x1a8d   :  { %8554 = vmatmul.mubr.msk.f32.vlgmr.msra.gmra.mrb[50].mxu0 %vm275_vm1, %v10931_v20 }
0x1a8e   :  { %8572 = vmatprep.mubr.msk.f32.mxu0 %vm275_vm1, %v10802_v53 }
0x1b60   :  { %v2779_v43 = vpop.f32.mrb[50].mxu0 }
0x1b61   :  { %v2780_v3 = vadd.f32 %v2779_v43, %v10582_v63  ;;  %v8555_v61 = vpop.f32.mrb[51].mxu0 }
0x1b63   :  { %9726 = vtanh.f32 %v2780_v3 }
0x1b6d   :  { %v9727_v32 = vpop.eup %9726 }
0x1b6e   :  { %v2784_v4 = vmul.f32 %v9727_v32, %v10943_v54  ;;  %v3286_v3 = vmul.f32 2.0, %v9727_v32 }
0x1b70   :  { %v2785_v38 = vadd.f32 %v2784_v4, %v10879_v36  ;;  %v3287_v4 = vadd.f32 %v10945_v62, %v3286_v3  ;;  %v2259_v3 = vmul.f32 0.16666667, %v10940_v13 }
0x1b72   :  { %8556 = vmatprep.subr.mxu1 %v2785_v38 }
0x1b73   :  { %8557 = vmatpush3.msra.mxu1 %v2785_v38 }
0x1b74   :  { %8559 = vmatmul.mubr.msk.f32.vlgmr.msra.gmra.mrb[48].mxu1 %vm173_vm0, %v10759_v8  ;;  %9298 = vmatprep.subr.bf16.mxu1 %v11833_v7 }
0x1b75   :  { %8561 = vmatprep.mubr.msk.f32.mxu1 %vm173_vm0, %v10767_v31 }
0x1b78   :  { %8562 = vmatmul.mubr.msk.f32.gmra.mrb[50].mxu1 %vm173_vm0, %v10774_v42 }
0x1b79   :  { %8586 = vmatprep.mubr.msk.f32.mxu1 %vm10081_vm2, %v11834_v28 }
0x1c47   :  { %v8560_v26 = vpop.f32.mrb[48].mxu1 }
0x1c48   :  { %v2858_v54 = vadd.f32 %v8560_v26, %v10332_v17  ;;  %v2852_v30 = vpop.f32.mrb[49].mxu1 }
0x1c49   :  { %v2853_v12 = vadd.f32 %v2852_v30, %v10296_v58 }
0x1c4a   :  { %9728 = vtanh.f32 %v2858_v54 }
0x1c4b   :  { %9730 = vtanh.f32 %v2853_v12  ;;  %v8563_v47 = vpop.f32.mrb[50].mxu1 }
0x1c4c   :  { %v2868_v35 = vadd.f32 %v8563_v47, %v10394_v27  ;;  %v2862_v15 = vpop.f32.mrb[51].mxu1 }
0x1c4d   :  { %v2863_v1 = vadd.f32 %v2862_v15, %v10397_v46 }
0x1c4e   :  { %9732 = vtanh.f32 %v2868_v35 }
0x1c4f   :  { %9734 = vtanh.f32 %v2863_v1 }
0x1c54   :  { %v9729_v22 = vpop.eup %9728 }
0x1c55   :  { %v9731_v16 = vpop.eup %9730 }
0x1c56   :  { %v9290_v14 = vpack.c.bf16 %v9729_v22, %v9731_v16 }
0x1c58   :  { %v9733_v51 = vpop.eup %9732  ;;  %9291 = vmatprep.subr.bf16.mxu0 %v9290_v14 }
0x1c59   :  { %v9735_v2 = vpop.eup %9734  ;;  %9293 = vmatpush3.bf16.msra.mxu0 %v9290_v14 }
0x1c5a   :  { %v9294_v17 = vpack.c.bf16 %v9733_v51, %v9735_v2 }
0x1c5c   :  { %9295 = vmatprep.subr.bf16.mxu0 %v9294_v17 }
0x1c5d   :  { %9297 = vmatpush3.bf16.msra.mxu0 %v9294_v17 }
0x1c60   :  { %8573 = vmatmul.mubr.msk.f32.vlgmr.msra.gmra.mrb[52].mxu0 %vm275_vm1, %v10903_v57 }
0x1c61   :  { %8575 = vmatprep.mubr.msk.f32.mxu0 %vm275_vm1, %v10910_v41 }
0x1c64   :  { %8576 = vmatmul.mubr.msk.f32.gmra.mrb[54].mxu0 %vm275_vm1, %v10917_v44 }
0x1c65   :  { %8605 = vmatprep.mubr.msk.f32.mxu0 %vm275_vm1, %v10802_v53 }
0x1d33   :  { %v8574_v58 = vpop.f32.mrb[52].mxu0 }
0x1d34   :  { %v2947_v27 = vadd.f32 %v8574_v58, %v10560_v55  ;;  %v2941_v46 = vpop.f32.mrb[53].mxu0 }
0x1d35   :  { %v2942_v11 = vadd.f32 %v2941_v46, %v10562_v60 }
0x1d36   :  { %9736 = vtanh.f32 %v2947_v27 }
0x1d37   :  { %9738 = vtanh.f32 %v2942_v11  ;;  %v8577_v9 = vpop.f32.mrb[54].mxu0 }
0x1d38   :  { %v2957_v52 = vadd.f32 %v8577_v9, %v10566_v19  ;;  %v2951_v6 = vpop.f32.mrb[55].mxu0 }
0x1d39   :  { %v2952_v50 = vadd.f32 %v2951_v6, %v10568_v40 }
0x1d3a   :  { %9740 = vtanh.f32 %v2957_v52 }
0x1d3b   :  { %9742 = vtanh.f32 %v2952_v50 }
0x1d40   :  { %v9737_v29 = vpop.eup %9736 }
0x1d41   :  { %v9739_v10 = vpop.eup %9738 }
0x1d42   :  { %v9299_v37 = vpack.c.bf16 %v9737_v29, %v9739_v10 }
0x1d44   :  { %v9741_v0 = vpop.eup %9740  ;;  %9300 = vmatpush3.bf16.msra.mxu1 %v9299_v37 }
0x1d45   :  { %v9743_v39 = vpop.eup %9742  ;;  %9301 = vmatprep.subr.bf16.mxu1 %v11833_v7 }
0x1d46   :  { %v9302_v56 = vpack.c.bf16 %v9741_v0, %v9743_v39 }
0x1d48   :  { %9303 = vmatpush3.bf16.msra.mxu1 %v9302_v56 }
0x1d4b   :  { %8587 = vmatmul.mubr.msk.f32.vlgmr.msra.gmra.mrb[52].mxu1 %vm275_vm1, %v10931_v20 }
0x1d4c   :  { %8591 = vmatprep.mubr.msk.f32.mxu1 %vm173_vm0, %v10739_v45 }
0x1e1e   :  { %v3030_v21 = vpop.f32.mrb[52].mxu1 }
0x1e1f   :  { %v3031_v25 = vadd.f32 %v3030_v21, %v10582_v63  ;;  %v8588_v43 = vpop.f32.mrb[53].mxu1 }
0x1e21   :  { %9744 = vtanh.f32 %v3031_v25 }
0x1e2b   :  { %v9745_v61 = vpop.eup %9744 }
0x1e2c   :  { %v3288_v38 = vmul.f32 2.0, %v9745_v61  ;;  %v3035_v26 = vmul.f32 %v9745_v61, %v10940_v13 }
0x1e2e   :  { %v3036_v54 = vadd.f32 %v3035_v26, %v10879_v36  ;;  %v11017_v30 = vadd.f32 %v3288_v38, %v3287_v4 }
0x1e30   :  { %8589 = vmatprep.subr.mxu1 %v3036_v54 }
0x1e31   :  { %8590 = vmatpush3.msra.mxu1 %v3036_v54 }
0x1e32   :  { %8592 = vmatmul.mubr.msk.f32.vlgmr.msra.gmra.mrb[54].mxu1 %vm173_vm0, %v10759_v8  ;;  %9312 = vmatprep.subr.bf16.mxu1 %v11833_v7 }
0x1e33   :  { %8594 = vmatprep.mubr.msk.f32.mxu1 %vm173_vm0, %v10767_v31 }
0x1e36   :  { %8595 = vmatmul.mubr.msk.f32.gmra.mrb[56].mxu1 %vm173_vm0, %v10774_v42 }
0x1e37   :  { %8619 = vmatprep.mubr.msk.f32.mxu1 %vm10081_vm2, %v11834_v28 }
0x1f05   :  { %v8593_v62 = vpop.f32.mrb[54].mxu1 }
0x1f06   :  { %v3109_v32 = vadd.f32 %v8593_v62, %v10335_v18  ;;  %v3103_v12 = vpop.f32.mrb[55].mxu1 }
0x1f07   :  { %v3104_v47 = vadd.f32 %v3103_v12, %v10299_v59 }
0x1f08   :  { %9746 = vtanh.f32 %v3109_v32 }
0x1f09   :  { %9748 = vtanh.f32 %v3104_v47  ;;  %v8596_v35 = vpop.f32.mrb[56].mxu1 }
0x1f0a   :  { %v3119_v15 = vadd.f32 %v8596_v35, %v10400_v48  ;;  %v3113_v1 = vpop.f32.mrb[57].mxu1 }
0x1f0b   :  { %v3114_v22 = vadd.f32 %v3113_v1, %v10403_v49 }
0x1f0c   :  { %9750 = vtanh.f32 %v3119_v15 }
0x1f0d   :  { %9752 = vtanh.f32 %v3114_v22 }
0x1f12   :  { %v9747_v16 = vpop.eup %9746 }
0x1f13   :  { %v9749_v14 = vpop.eup %9748 }
0x1f14   :  { %v9304_v51 = vpack.c.bf16 %v9747_v16, %v9749_v14 }
0x1f16   :  { %v9751_v2 = vpop.eup %9750  ;;  %9305 = vmatprep.subr.bf16.mxu0 %v9304_v51 }
0x1f17   :  { %v9753_v17 = vpop.eup %9752  ;;  %9307 = vmatpush3.bf16.msra.mxu0 %v9304_v51 }
0x1f18   :  { %v9308_v58 = vpack.c.bf16 %v9751_v2, %v9753_v17 }
0x1f1a   :  { %9309 = vmatprep.subr.bf16.mxu0 %v9308_v58 }
0x1f1b   :  { %9311 = vmatpush3.bf16.msra.mxu0 %v9308_v58 }
0x1f1e   :  { %8606 = vmatmul.mubr.msk.f32.vlgmr.msra.gmra.mrb[56].mxu0 %vm275_vm1, %v10903_v57 }
0x1f1f   :  { %8608 = vmatprep.mubr.msk.f32.mxu0 %vm275_vm1, %v10910_v41 }
0x1f22   :  { %8609 = vmatmul.mubr.msk.f32.gmra.mrb[58].mxu0 %vm275_vm1, %v10917_v44 }
0x1f23   :  { %8624 = vmatprep.mubr.msk.f32.mxu0 %vm173_vm0, %v10739_v45 }
0x1ff1   :  { %v8607_v27 = vpop.f32.mrb[56].mxu0 }
0x1ff2   :  { %v3198_v46 = vadd.f32 %v8607_v27, %v10560_v55  ;;  %v3192_v11 = vpop.f32.mrb[57].mxu0 }
0x1ff3   :  { %v3193_v9 = vadd.f32 %v3192_v11, %v10562_v60  ;;  %v11092_v11 = vld [vmem:[%s11757_s3] sm:$0xff] }
0x1ff4   :  { %9754 = vtanh.f32 %v3198_v46 }
0x1ff5   :  { %9756 = vtanh.f32 %v3193_v9  ;;  %v8610_v52 = vpop.f32.mrb[58].mxu0 }
0x1ff6   :  { %v3208_v6 = vadd.f32 %v8610_v52, %v10566_v19  ;;  %v3202_v50 = vpop.f32.mrb[59].mxu0 }
0x1ff7   :  { %v3203_v29 = vadd.f32 %v3202_v50, %v10568_v40  ;;  %v11835_v50 = vld [vmem:[#allocation3_spill] sm:$0xff] }
0x1ff8   :  { %9758 = vtanh.f32 %v3208_v6 }
0x1ff9   :  { %9760 = vtanh.f32 %v3203_v29  ;;  %v11099_v29 = vrot.slane %v10220_v23, %v11835_v50 }
0x1ffe   :  { %v9755_v10 = vpop.eup %9754 }
0x1fff   :  { %v9757_v37 = vpop.eup %9756 }
0x2000   :  { %v9313_v0 = vpack.c.bf16 %v9755_v10, %v9757_v37  ;;  %v11102_v10 = vmul.f32 0.5, %v11099_v29 }
0x2002   :  { %v9759_v45 = vpop.eup %9758  ;;  %9314 = vmatpush3.bf16.msra.mxu1 %v9313_v0 }
0x2003   :  { %v9761_v39 = vpop.eup %9760  ;;  %9315 = vmatprep.subr.bf16.mxu1 %v11833_v7 }
0x2004   :  { %v9316_v56 = vpack.c.bf16 %v9759_v45, %v9761_v39  ;;  %v11112_v39 = vld [vmem:[%s11757_s3 + $0x8] sm:$0xff] }
0x2006   :  { %9317 = vmatpush3.bf16.msra.mxu1 %v9316_v56  ;;  %v11120_v56 = vld [vmem:[%s11757_s3 + $0x10] sm:$0xff] }
0x2009   :  { %8620 = vmatmul.mubr.msk.f32.vlgmr.msra.gmra.mrb[58].mxu1 %vm275_vm1, %v10931_v20 }
0x200a   :  { %8638 = vmatprep.mubr.msk.f32.mxu1 %vm275_vm1, %v10802_v53 }
0x20dc   :  { %v3281_v21 = vpop.f32.mrb[58].mxu1 }
0x20dd   :  { %v3282_v25 = vadd.f32 %v3281_v21, %v10582_v63  ;;  %v8621_v43 = vpop.f32.mrb[59].mxu1  ;;  %v11127_v21 = vld [vmem:[%s11757_s3 + $0x18] sm:$0xff] }
0x20de   :  { %v11836_v43 = vld [vmem:[#allocation7_spill] sm:$0xff] }
0x20df   :  { %9762 = vtanh.f32 %v3282_v25 }
0x20e9   :  { %v9763_v61 = vpop.eup %9762 }
0x20ea   :  { %v3290_v4 = vadd.f32 %v9763_v61, %v11017_v30 }
0x20ec   :  { %v3291_v38 = vmul.f32 %v3290_v4, %v2259_v3  ;;  %v11837_v4 = vld [vmem:[#allocation6_spill] sm:$0xff] }
0x20ee   :  { %v11053_v26 = vadd.f32 %v3291_v38, %v10879_v36 }
0x20f0   :  { %7573 = vst [vmem:[%s11760_s9 + $0x18] sm:$0xff] %v11053_v26  ;;  %8622 = vmatprep.subr.mxu0 %v11053_v26 }
0x20f1   :  { %8623 = vmatpush3.msra.mxu0 %v11053_v26 }
0x20f2   :  { %8625 = vmatmul.mubr.msk.f32.vlgmr.msra.gmra.mrb[60].mxu0 %vm173_vm0, %v10759_v8  ;;  %9326 = vmatprep.subr.bf16.mxu0 %v11833_v7 }
0x20f3   :  { %8627 = vmatprep.mubr.msk.f32.mxu0 %vm173_vm0, %v10767_v31 }
0x20f6   :  { %8628 = vmatmul.mubr.msk.f32.gmra.mrb[62].mxu0 %vm173_vm0, %v10774_v42 }
0x20f7   :  { %8652 = vmatprep.mubr.msk.f32.mxu0 %vm10081_vm2, %v11834_v28 }
0x21c5   :  { %v8626_v36 = vpop.f32.mrb[60].mxu0 }
0x21c6   :  { %v3397_v13 = vadd.f32 %v8626_v36, %v10335_v18  ;;  %v3391_v54 = vpop.f32.mrb[61].mxu0 }
0x21c7   :  { %v3392_v30 = vadd.f32 %v3391_v54, %v10299_v59 }
0x21c8   :  { %9764 = vtanh.f32 %v3397_v13  ;;  %v11838_v13 = vld [vmem:[#allocation8_spill] sm:$0xff] }
0x21c9   :  { %9766 = vtanh.f32 %v3392_v30  ;;  %v8629_v8 = vpop.f32.mrb[62].mxu0 }
0x21ca   :  { %v3407_v62 = vadd.f32 %v8629_v8, %v10400_v48  ;;  %v3401_v32 = vpop.f32.mrb[63].mxu0  ;;  %v11839_v8 = vld [vmem:[#allocation9_spill] sm:$0xff] }
0x21cb   :  { %v3402_v31 = vadd.f32 %v3401_v32, %v10403_v49 }
0x21cc   :  { %9768 = vtanh.f32 %v3407_v62 }
0x21cd   :  { %9770 = vtanh.f32 %v3402_v31 }
0x21d2   :  { %v9765_v42 = vpop.eup %9764 }
0x21d3   :  { %v9767_v12 = vpop.eup %9766 }
0x21d4   :  { %v9318_v47 = vpack.c.bf16 %v9765_v42, %v9767_v12 }
0x21d6   :  { %v9769_v35 = vpop.eup %9768  ;;  %9319 = vmatprep.subr.bf16.mxu1 %v9318_v47 }
0x21d7   :  { %v9771_v15 = vpop.eup %9770  ;;  %9321 = vmatpush3.bf16.msra.mxu1 %v9318_v47 }
0x21d8   :  { %v9322_v18 = vpack.c.bf16 %v9769_v35, %v9771_v15 }
0x21da   :  { %9323 = vmatprep.subr.bf16.mxu1 %v9322_v18 }
0x21db   :  { %9325 = vmatpush3.bf16.msra.mxu1 %v9322_v18 }
0x21de   :  { %8639 = vmatmul.mubr.msk.f32.vlgmr.msra.gmra.mrb[60].mxu1 %vm275_vm1, %v10903_v57 }
0x21df   :  { %8641 = vmatprep.mubr.msk.f32.mxu1 %vm275_vm1, %v10910_v41 }
0x21e2   :  { %8642 = vmatmul.mubr.msk.f32.gmra.mrb[62].mxu1 %vm275_vm1, %v10917_v44 }
0x21e3   :  { %8671 = vmatprep.mubr.msk.f32.mxu1 %vm275_vm1, %v10802_v53 }
0x22b1   :  { %v8640_v59 = vpop.f32.mrb[60].mxu1 }
0x22b2   :  { %v3486_v48 = vadd.f32 %v8640_v59, %v10560_v55  ;;  %v3480_v49 = vpop.f32.mrb[61].mxu1 }
0x22b3   :  { %v3481_v1 = vadd.f32 %v3480_v49, %v10562_v60 }
0x22b4   :  { %9772 = vtanh.f32 %v3486_v48 }
0x22b5   :  { %9774 = vtanh.f32 %v3481_v1  ;;  %v8643_v22 = vpop.f32.mrb[62].mxu1 }
0x22b6   :  { %v3496_v16 = vadd.f32 %v8643_v22, %v10566_v19  ;;  %v3490_v14 = vpop.f32.mrb[63].mxu1 }
0x22b7   :  { %v3491_v51 = vadd.f32 %v3490_v14, %v10568_v40 }
0x22b8   :  { %9776 = vtanh.f32 %v3496_v16 }
0x22b9   :  { %9778 = vtanh.f32 %v3491_v51 }
0x22be   :  { %v9773_v2 = vpop.eup %9772 }
0x22bf   :  { %v9775_v17 = vpop.eup %9774 }
0x22c0   :  { %v9327_v58 = vpack.c.bf16 %v9773_v2, %v9775_v17 }
0x22c2   :  { %v9777_v53 = vpop.eup %9776  ;;  %9328 = vmatpush3.bf16.msra.mxu0 %v9327_v58 }
0x22c3   :  { %v9779_v27 = vpop.eup %9778  ;;  %9329 = vmatprep.subr.bf16.mxu0 %v11833_v7 }
0x22c4   :  { %v9330_v46 = vpack.c.bf16 %v9777_v53, %v9779_v27  ;;  %v11155_v27 = vld [vmem:[%s11764_s5] sm:$0xff] }
0x22c6   :  { %9331 = vmatpush3.bf16.msra.mxu0 %v9330_v46 }
0x22c9   :  { %8653 = vmatmul.mubr.msk.f32.vlgmr.msra.gmra.mrb[64].mxu0 %vm275_vm1, %v10931_v20 }
0x22ca   :  { %8657 = vmatprep.mubr.msk.f32.mxu0 %vm173_vm0, %v11092_v11 }
0x239c   :  { %v3569_v9 = vpop.f32.mrb[64].mxu0 }
0x239d   :  { %v3570_v52 = vadd.f32 %v3569_v9, %v10582_v63  ;;  %v8654_v6 = vpop.f32.mrb[65].mxu0 }
0x239f   :  { %9780 = vtanh.f32 %v3570_v52 }
0x23a9   :  { %v11104_v37 = vpop.eup %9780 }
0x23aa   :  { %v3574_v0 = vmul.f32 %v11104_v37, %v11102_v10 }
0x23ac   :  { %v3575_v45 = vadd.f32 %v3574_v0, %v11053_v26 }
0x23ae   :  { %8655 = vmatprep.subr.mxu0 %v3575_v45 }
0x23af   :  { %8656 = vmatpush3.msra.mxu0 %v3575_v45 }
0x23b0   :  { %8658 = vmatmul.mubr.msk.f32.vlgmr.msra.gmra.mrb[66].mxu0 %vm173_vm0, %v11112_v39  ;;  %9340 = vmatprep.subr.bf16.mxu0 %v11833_v7 }
0x23b1   :  { %8660 = vmatprep.mubr.msk.f32.mxu0 %vm173_vm0, %v11120_v56 }
0x23b4   :  { %8661 = vmatmul.mubr.msk.f32.gmra.mrb[68].mxu0 %vm173_vm0, %v11127_v21 }
0x23b5   :  { %8685 = vmatprep.mubr.msk.f32.mxu0 %vm10081_vm2, %v11834_v28 }
0x2483   :  { %v8659_v25 = vpop.f32.mrb[66].mxu0 }
0x2484   :  { %v3648_v3 = vadd.f32 %v8659_v25, %v11836_v43  ;;  %v3642_v61 = vpop.f32.mrb[67].mxu0 }
0x2485   :  { %v3643_v38 = vadd.f32 %v3642_v61, %v11837_v4 }
0x2486   :  { %9782 = vtanh.f32 %v3648_v3 }
0x2487   :  { %9784 = vtanh.f32 %v3643_v38  ;;  %v8662_v36 = vpop.f32.mrb[68].mxu0 }
0x2488   :  { %v3658_v54 = vadd.f32 %v8662_v36, %v11838_v13  ;;  %v3652_v30 = vpop.f32.mrb[69].mxu0 }
0x2489   :  { %v3653_v62 = vadd.f32 %v3652_v30, %v11839_v8 }
0x248a   :  { %9786 = vtanh.f32 %v3658_v54 }
0x248b   :  { %9788 = vtanh.f32 %v3653_v62 }
0x2490   :  { %v9783_v32 = vpop.eup %9782 }
0x2491   :  { %v9785_v31 = vpop.eup %9784 }
0x2492   :  { %v9332_v42 = vpack.c.bf16 %v9783_v32, %v9785_v31 }
0x2494   :  { %v9787_v12 = vpop.eup %9786  ;;  %9333 = vmatprep.subr.bf16.mxu1 %v9332_v42 }
0x2495   :  { %v9789_v47 = vpop.eup %9788  ;;  %9335 = vmatpush3.bf16.msra.mxu1 %v9332_v42 }
0x2496   :  { %v9336_v35 = vpack.c.bf16 %v9787_v12, %v9789_v47 }
0x2498   :  { %9337 = vmatprep.subr.bf16.mxu1 %v9336_v35 }
0x2499   :  { %9339 = vmatpush3.bf16.msra.mxu1 %v9336_v35 }
0x249c   :  { %8672 = vmatmul.mubr.msk.f32.vlgmr.msra.gmra.mrb[64].mxu1 %vm275_vm1, %v10903_v57 }
0x249d   :  { %8674 = vmatprep.mubr.msk.f32.mxu1 %vm275_vm1, %v10910_v41 }
0x24a0   :  { %8675 = vmatmul.mubr.msk.f32.gmra.mrb[66].mxu1 %vm275_vm1, %v10917_v44 }
0x24a1   :  { %8690 = vmatprep.mubr.msk.f32.mxu1 %vm173_vm0, %v11092_v11 }
0x256f   :  { %v8673_v15 = vpop.f32.mrb[64].mxu1 }
0x2570   :  { %v3737_v18 = vadd.f32 %v8673_v15, %v10560_v55  ;;  %v3731_v59 = vpop.f32.mrb[65].mxu1 }
0x2571   :  { %v3732_v48 = vadd.f32 %v3731_v59, %v10562_v60 }
0x2572   :  { %9790 = vtanh.f32 %v3737_v18 }
0x2573   :  { %9792 = vtanh.f32 %v3732_v48  ;;  %v8676_v49 = vpop.f32.mrb[66].mxu1 }
0x2574   :  { %v3747_v1 = vadd.f32 %v8676_v49, %v10566_v19  ;;  %v3741_v22 = vpop.f32.mrb[67].mxu1 }
0x2575   :  { %v3742_v16 = vadd.f32 %v3741_v22, %v10568_v40 }
0x2576   :  { %9794 = vtanh.f32 %v3747_v1 }
0x2577   :  { %9796 = vtanh.f32 %v3742_v16 }
0x257c   :  { %v9791_v14 = vpop.eup %9790 }
0x257d   :  { %v9793_v51 = vpop.eup %9792 }
0x257e   :  { %v9341_v2 = vpack.c.bf16 %v9791_v14, %v9793_v51 }
0x2580   :  { %v9795_v17 = vpop.eup %9794  ;;  %9342 = vmatpush3.bf16.msra.mxu0 %v9341_v2 }
0x2581   :  { %v9797_v58 = vpop.eup %9796  ;;  %9343 = vmatprep.subr.bf16.mxu0 %v11833_v7 }
0x2582   :  { %v9344_v53 = vpack.c.bf16 %v9795_v17, %v9797_v58 }
0x2584   :  { %9345 = vmatpush3.bf16.msra.mxu0 %v9344_v53 }
0x2587   :  { %8686 = vmatmul.mubr.msk.f32.vlgmr.msra.gmra.mrb[70].mxu0 %vm275_vm1, %v10931_v20 }
0x2588   :  { %8704 = vmatprep.mubr.msk.f32.mxu0 %vm275_vm1, %v11155_v27 }
0x265a   :  { %v3820_v46 = vpop.f32.mrb[70].mxu0 }
0x265b   :  { %v3821_v9 = vadd.f32 %v3820_v46, %v10582_v63  ;;  %v8687_v52 = vpop.f32.mrb[71].mxu0 }
0x265d   :  { %9798 = vtanh.f32 %v3821_v9 }
0x2667   :  { %v9799_v6 = vpop.eup %9798 }
0x2668   :  { %v3825_v50 = vmul.f32 %v9799_v6, %v11102_v10  ;;  %v4327_v17 = vmul.f32 2.0, %v9799_v6 }
0x266a   :  { %v3826_v0 = vadd.f32 %v3825_v50, %v11053_v26  ;;  %v4328_v53 = vadd.f32 %v11104_v37, %v4327_v17 }
0x266c   :  { %8688 = vmatprep.subr.mxu1 %v3826_v0 }
0x266d   :  { %8689 = vmatpush3.msra.mxu1 %v3826_v0 }
0x266e   :  { %8691 = vmatmul.mubr.msk.f32.vlgmr.msra.gmra.mrb[68].mxu1 %vm173_vm0, %v11112_v39  ;;  %9354 = vmatprep.subr.bf16.mxu1 %v11833_v7 }
0x266f   :  { %8693 = vmatprep.mubr.msk.f32.mxu1 %vm173_vm0, %v11120_v56 }
0x2672   :  { %8694 = vmatmul.mubr.msk.f32.gmra.mrb[70].mxu1 %vm173_vm0, %v11127_v21 }
0x2673   :  { %8718 = vmatprep.mubr.msk.f32.mxu1 %vm10081_vm2, %v11834_v28 }
0x2741   :  { %v8692_v45 = vpop.f32.mrb[68].mxu1 }
0x2742   :  { %v3899_v10 = vadd.f32 %v8692_v45, %v11836_v43  ;;  %v3893_v25 = vpop.f32.mrb[69].mxu1 }
0x2743   :  { %v3894_v3 = vadd.f32 %v3893_v25, %v11837_v4  ;;  %v11840_v25 = vld [vmem:[#allocation10_spill] sm:$0xff] }
0x2744   :  { %9800 = vtanh.f32 %v3899_v10 }
0x2745   :  { %9802 = vtanh.f32 %v3894_v3  ;;  %v8695_v61 = vpop.f32.mrb[70].mxu1 }
0x2746   :  { %v3909_v38 = vadd.f32 %v8695_v61, %v11838_v13  ;;  %v3903_v36 = vpop.f32.mrb[71].mxu1 }
0x2747   :  { %v3904_v54 = vadd.f32 %v3903_v36, %v11839_v8 }
0x2748   :  { %9804 = vtanh.f32 %v3909_v38  ;;  %v11841_v38 = vld [vmem:[#allocation11_spill] sm:$0xff] }
0x2749   :  { %9806 = vtanh.f32 %v3904_v54 }
0x274e   :  { %v9801_v30 = vpop.eup %9800 }
0x274f   :  { %v9803_v62 = vpop.eup %9802 }
0x2750   :  { %v9346_v32 = vpack.c.bf16 %v9801_v30, %v9803_v62 }
0x2752   :  { %v9805_v31 = vpop.eup %9804  ;;  %9347 = vmatprep.subr.bf16.mxu0 %v9346_v32 }
0x2753   :  { %v9807_v42 = vpop.eup %9806  ;;  %9349 = vmatpush3.bf16.msra.mxu0 %v9346_v32 }
0x2754   :  { %v9350_v43 = vpack.c.bf16 %v9805_v31, %v9807_v42 }
0x2756   :  { %9351 = vmatprep.subr.bf16.mxu0 %v9350_v43 }
0x2757   :  { %9353 = vmatpush3.bf16.msra.mxu0 %v9350_v43 }
0x275a   :  { %8705 = vmatmul.mubr.msk.f32.vlgmr.msra.gmra.mrb[72].mxu0 %vm275_vm1, %v10903_v57 }
0x275b   :  { %8707 = vmatprep.mubr.msk.f32.mxu0 %vm275_vm1, %v10910_v41 }
0x275e   :  { %8708 = vmatmul.mubr.msk.f32.gmra.mrb[74].mxu0 %vm275_vm1, %v10917_v44 }
0x275f   :  { %8737 = vmatprep.mubr.msk.f32.mxu0 %vm275_vm1, %v11155_v27 }
0x282d   :  { %v8706_v4 = vpop.f32.mrb[72].mxu0 }
0x282e   :  { %v3988_v13 = vadd.f32 %v8706_v4, %v10560_v55  ;;  %v3982_v8 = vpop.f32.mrb[73].mxu0 }
0x282f   :  { %v3983_v12 = vadd.f32 %v3982_v8, %v10562_v60 }
0x2830   :  { %9808 = vtanh.f32 %v3988_v13 }
0x2831   :  { %9810 = vtanh.f32 %v3983_v12  ;;  %v8709_v47 = vpop.f32.mrb[74].mxu0 }
0x2832   :  { %v3998_v35 = vadd.f32 %v8709_v47, %v10566_v19  ;;  %v3992_v15 = vpop.f32.mrb[75].mxu0 }
0x2833   :  { %v3993_v18 = vadd.f32 %v3992_v15, %v10568_v40 }
0x2834   :  { %9812 = vtanh.f32 %v3998_v35 }
0x2835   :  { %9814 = vtanh.f32 %v3993_v18 }
0x283a   :  { %v9809_v59 = vpop.eup %9808 }
0x283b   :  { %v9811_v48 = vpop.eup %9810 }
0x283c   :  { %v9355_v49 = vpack.c.bf16 %v9809_v59, %v9811_v48 }
0x283e   :  { %v9813_v1 = vpop.eup %9812  ;;  %9356 = vmatpush3.bf16.msra.mxu1 %v9355_v49 }
0x283f   :  { %v9815_v22 = vpop.eup %9814  ;;  %9357 = vmatprep.subr.bf16.mxu1 %v11833_v7 }
0x2840   :  { %v9358_v16 = vpack.c.bf16 %v9813_v1, %v9815_v22 }
0x2842   :  { %9359 = vmatpush3.bf16.msra.mxu1 %v9358_v16  ;;  %v3300_v16 = vmul.f32 0.16666667, %v11099_v29 }
0x2845   :  { %8719 = vmatmul.mubr.msk.f32.vlgmr.msra.gmra.mrb[72].mxu1 %vm275_vm1, %v10931_v20 }
0x2846   :  { %8723 = vmatprep.mubr.msk.f32.mxu1 %vm173_vm0, %v11092_v11 }
0x2918   :  { %v4071_v14 = vpop.f32.mrb[72].mxu1 }
0x2919   :  { %v4072_v51 = vadd.f32 %v4071_v14, %v10582_v63  ;;  %v8720_v2 = vpop.f32.mrb[73].mxu1 }
0x291b   :  { %9816 = vtanh.f32 %v4072_v51 }
0x2925   :  { %v9817_v58 = vpop.eup %9816 }
0x2926   :  { %v4329_v46 = vmul.f32 2.0, %v9817_v58  ;;  %v4076_v9 = vmul.f32 %v9817_v58, %v11099_v29 }
0x2928   :  { %v4077_v52 = vadd.f32 %v4076_v9, %v11053_v26  ;;  %v11196_v50 = vadd.f32 %v4329_v46, %v4328_v53 }
0x292a   :  { %8721 = vmatprep.subr.mxu1 %v4077_v52 }
0x292b   :  { %8722 = vmatpush3.msra.mxu1 %v4077_v52 }
0x292c   :  { %8724 = vmatmul.mubr.msk.f32.vlgmr.msra.gmra.mrb[74].mxu1 %vm173_vm0, %v11112_v39  ;;  %9368 = vmatprep.subr.bf16.mxu1 %v11833_v7 }
0x292d   :  { %8726 = vmatprep.mubr.msk.f32.mxu1 %vm173_vm0, %v11120_v56 }
0x2930   :  { %8727 = vmatmul.mubr.msk.f32.gmra.mrb[76].mxu1 %vm173_vm0, %v11127_v21 }
0x2931   :  { %8751 = vmatprep.mubr.msk.f32.mxu1 %vm10081_vm2, %v11834_v28 }
0x29ff   :  { %v8725_v37 = vpop.f32.mrb[74].mxu1 }
0x2a00   :  { %v4150_v6 = vadd.f32 %v8725_v37, %v10420_v24  ;;  %v4144_v0 = vpop.f32.mrb[75].mxu1 }
0x2a01   :  { %v4145_v45 = vadd.f32 %v4144_v0, %v10423_v34 }
0x2a02   :  { %9818 = vtanh.f32 %v4150_v6 }
0x2a03   :  { %9820 = vtanh.f32 %v4145_v45  ;;  %v8728_v10 = vpop.f32.mrb[76].mxu1 }
0x2a04   :  { %v4160_v3 = vadd.f32 %v8728_v10, %v11840_v25  ;;  %v4154_v61 = vpop.f32.mrb[77].mxu1  ;;  %v11263_v10 = vld [vmem:[%s11764_s5 + $0x10] sm:$0xff] }
0x2a05   :  { %v4155_v36 = vadd.f32 %v4154_v61, %v11841_v38 }
0x2a06   :  { %9822 = vtanh.f32 %v4160_v3 }
0x2a07   :  { %9824 = vtanh.f32 %v4155_v36 }
0x2a0c   :  { %v9819_v54 = vpop.eup %9818 }
0x2a0d   :  { %v9821_v30 = vpop.eup %9820 }
0x2a0e   :  { %v9360_v62 = vpack.c.bf16 %v9819_v54, %v9821_v30 }
0x2a10   :  { %v9823_v32 = vpop.eup %9822  ;;  %9361 = vmatprep.subr.bf16.mxu0 %v9360_v62 }
0x2a11   :  { %v9825_v31 = vpop.eup %9824  ;;  %9363 = vmatpush3.bf16.msra.mxu0 %v9360_v62 }
0x2a12   :  { %v9364_v42 = vpack.c.bf16 %v9823_v32, %v9825_v31 }
0x2a14   :  { %9365 = vmatprep.subr.bf16.mxu0 %v9364_v42 }
0x2a15   :  { %9367 = vmatpush3.bf16.msra.mxu0 %v9364_v42 }
0x2a18   :  { %8738 = vmatmul.mubr.msk.f32.vlgmr.msra.gmra.mrb[76].mxu0 %vm275_vm1, %v10903_v57 }
0x2a19   :  { %8740 = vmatprep.mubr.msk.f32.mxu0 %vm275_vm1, %v10910_v41 }
0x2a1c   :  { %8741 = vmatmul.mubr.msk.f32.gmra.mrb[78].mxu0 %vm275_vm1, %v10917_v44 }
0x2a1d   :  { %8756 = vmatprep.mubr.msk.f32.mxu0 %vm173_vm0, %v11092_v11 }
0x2aeb   :  { %v8739_v43 = vpop.f32.mrb[76].mxu0 }
0x2aec   :  { %v4239_v4 = vadd.f32 %v8739_v43, %v10560_v55  ;;  %v4233_v13 = vpop.f32.mrb[77].mxu0 }
0x2aed   :  { %v4234_v8 = vadd.f32 %v4233_v13, %v10562_v60 }
0x2aee   :  { %9826 = vtanh.f32 %v4239_v4 }
0x2aef   :  { %9828 = vtanh.f32 %v4234_v8  ;;  %v8742_v12 = vpop.f32.mrb[78].mxu0 }
0x2af0   :  { %v4249_v57 = vadd.f32 %v8742_v12, %v10566_v19  ;;  %v4243_v47 = vpop.f32.mrb[79].mxu0  ;;  %v11284_v12 = vld [vmem:[%s11765_s7] sm:$0xff] }
0x2af1   :  { %v4244_v41 = vadd.f32 %v4243_v47, %v10568_v40 }
0x2af2   :  { %9830 = vtanh.f32 %v4249_v57 }
0x2af3   :  { %9832 = vtanh.f32 %v4244_v41 }
0x2af8   :  { %v9827_v44 = vpop.eup %9826 }
0x2af9   :  { %v9829_v35 = vpop.eup %9828 }
0x2afa   :  { %v9369_v15 = vpack.c.bf16 %v9827_v44, %v9829_v35  ;;  %v11842_v44 = vld [vmem:[#allocation4_spill] sm:$0xff] }
0x2afb   :  { %v11293_v35 = vrot.slane %v10220_v23, %v11842_v44 }
0x2afc   :  { %v9831_v18 = vpop.eup %9830  ;;  %9370 = vmatpush3.bf16.msra.mxu1 %v9369_v15 }
0x2afd   :  { %v9833_v59 = vpop.eup %9832  ;;  %9371 = vmatprep.subr.bf16.mxu1 %v11833_v7  ;;  %v11296_v15 = vmul.f32 0.5, %v11293_v35 }
0x2afe   :  { %v9372_v48 = vpack.c.bf16 %v9831_v18, %v9833_v59 }
0x2b00   :  { %9373 = vmatpush3.bf16.msra.mxu1 %v9372_v48 }
0x2b03   :  { %8752 = vmatmul.mubr.msk.f32.vlgmr.msra.gmra.mrb[78].mxu1 %vm275_vm1, %v10931_v20 }
0x2b04   :  { %8770 = vmatprep.mubr.msk.f32.mxu1 %vm275_vm1, %v11155_v27 }
0x2bd6   :  { %v4322_v49 = vpop.f32.mrb[78].mxu1 }
0x2bd7   :  { %v4323_v1 = vadd.f32 %v4322_v49, %v10582_v63  ;;  %v8753_v22 = vpop.f32.mrb[79].mxu1 }
0x2bd9   :  { %9834 = vtanh.f32 %v4323_v1  ;;  %v11843_v1 = vld [vmem:[#allocation12_spill] sm:$0xff] }
0x2be3   :  { %v9835_v14 = vpop.eup %9834 }
0x2be4   :  { %v4331_v51 = vadd.f32 %v9835_v14, %v11196_v50  ;;  %v11844_v14 = vld [vmem:[#allocation13_spill] sm:$0xff] }
0x2be6   :  { %v4332_v2 = vmul.f32 %v4331_v51, %v3300_v16 }
0x2be8   :  { %v11232_v17 = vadd.f32 %v4332_v2, %v11053_v26 }
0x2bea   :  { %7610 = vst [vmem:[%s11760_s9 + $0x20] sm:$0xff] %v11232_v17  ;;  %8754 = vmatprep.subr.mxu0 %v11232_v17 }
0x2beb   :  { %8755 = vmatpush3.msra.mxu0 %v11232_v17 }
0x2bec   :  { %8757 = vmatmul.mubr.msk.f32.vlgmr.msra.gmra.mrb[80].mxu0 %vm173_vm0, %v11112_v39  ;;  %9382 = vmatprep.subr.bf16.mxu0 %v11833_v7 }
0x2bed   :  { %8759 = vmatprep.mubr.msk.f32.mxu0 %vm173_vm0, %v11120_v56 }
0x2bf0   :  { %8760 = vmatmul.mubr.msk.f32.gmra.mrb[82].mxu0 %vm173_vm0, %v11127_v21 }
0x2bf1   :  { %8784 = vmatprep.mubr.msk.f32.mxu0 %vm10081_vm2, %v11834_v28 }
0x2cbf   :  { %v8758_v20 = vpop.f32.mrb[80].mxu0 }
0x2cc0   :  { %v4438_v26 = vadd.f32 %v8758_v20, %v10420_v24  ;;  %v4432_v29 = vpop.f32.mrb[81].mxu0  ;;  %v11845_v20 = vld [vmem:[#allocation14_spill] sm:$0xff] }
0x2cc1   :  { %v4433_v58 = vadd.f32 %v4432_v29, %v10423_v34  ;;  %v11256_v34 = vld [vmem:[%s11764_s5 + $0x8] sm:$0xff] }
0x2cc2   :  { %9836 = vtanh.f32 %v4438_v26 }
0x2cc3   :  { %9838 = vtanh.f32 %v4433_v58  ;;  %v8761_v53 = vpop.f32.mrb[82].mxu0  ;;  %v11846_v58 = vld [vmem:[#allocation15_spill] sm:$0xff] }
0x2cc4   :  { %v4448_v46 = vadd.f32 %v8761_v53, %v11840_v25  ;;  %v4442_v9 = vpop.f32.mrb[83].mxu0  ;;  %v11270_v25 = vld [vmem:[%s11764_s5 + $0x18] sm:$0xff] }
0x2cc5   :  { %v4443_v52 = vadd.f32 %v4442_v9, %v11841_v38 }
0x2cc6   :  { %9840 = vtanh.f32 %v4448_v46 }
0x2cc7   :  { %9842 = vtanh.f32 %v4443_v52 }
0x2ccc   :  { %v9837_v50 = vpop.eup %9836 }
0x2ccd   :  { %v9839_v37 = vpop.eup %9838 }
0x2cce   :  { %v9374_v6 = vpack.c.bf16 %v9837_v50, %v9839_v37 }
0x2cd0   :  { %v9841_v0 = vpop.eup %9840  ;;  %9375 = vmatprep.subr.bf16.mxu1 %v9374_v6 }
0x2cd1   :  { %v9843_v45 = vpop.eup %9842  ;;  %9377 = vmatpush3.bf16.msra.mxu1 %v9374_v6 }
0x2cd2   :  { %v9378_v24 = vpack.c.bf16 %v9841_v0, %v9843_v45 }
0x2cd4   :  { %9379 = vmatprep.subr.bf16.mxu1 %v9378_v24 }
0x2cd5   :  { %9381 = vmatpush3.bf16.msra.mxu1 %v9378_v24 }
0x2cd8   :  { %8771 = vmatmul.mubr.msk.f32.vlgmr.msra.gmra.mrb[80].mxu1 %vm275_vm1, %v11256_v34 }
0x2cd9   :  { %8773 = vmatprep.mubr.msk.f32.mxu1 %vm275_vm1, %v11263_v10 }
0x2cdc   :  { %8774 = vmatmul.mubr.msk.f32.gmra.mrb[82].mxu1 %vm275_vm1, %v11270_v25 }
0x2cdd   :  { %8803 = vmatprep.mubr.msk.f32.mxu1 %vm275_vm1, %v11155_v27 }
0x2dab   :  { %v8772_v3 = vpop.f32.mrb[80].mxu1 }
0x2dac   :  { %v4527_v61 = vadd.f32 %v8772_v3, %v10560_v55  ;;  %v4521_v38 = vpop.f32.mrb[81].mxu1 }
0x2dad   :  { %v4522_v36 = vadd.f32 %v4521_v38, %v10562_v60 }
0x2dae   :  { %9844 = vtanh.f32 %v4527_v61 }
0x2daf   :  { %9846 = vtanh.f32 %v4522_v36  ;;  %v8775_v54 = vpop.f32.mrb[82].mxu1 }
0x2db0   :  { %v4537_v30 = vadd.f32 %v8775_v54, %v10566_v19  ;;  %v4531_v62 = vpop.f32.mrb[83].mxu1 }
0x2db1   :  { %v4532_v32 = vadd.f32 %v4531_v62, %v10568_v40 }
0x2db2   :  { %9848 = vtanh.f32 %v4537_v30 }
0x2db3   :  { %9850 = vtanh.f32 %v4532_v32 }
0x2db8   :  { %v9845_v31 = vpop.eup %9844 }
0x2db9   :  { %v9847_v42 = vpop.eup %9846 }
0x2dba   :  { %v9383_v43 = vpack.c.bf16 %v9845_v31, %v9847_v42 }
0x2dbc   :  { %v9849_v4 = vpop.eup %9848  ;;  %9384 = vmatpush3.bf16.msra.mxu0 %v9383_v43 }
0x2dbd   :  { %v9851_v13 = vpop.eup %9850  ;;  %9385 = vmatprep.subr.bf16.mxu0 %v11833_v7 }
0x2dbe   :  { %v9386_v8 = vpack.c.bf16 %v9849_v4, %v9851_v13 }
0x2dc0   :  { %9387 = vmatpush3.bf16.msra.mxu0 %v9386_v8 }
0x2dc3   :  { %8785 = vmatmul.mubr.msk.f32.vlgmr.msra.gmra.mrb[84].mxu0 %vm275_vm1, %v11284_v12 }
0x2dc4   :  { %8789 = vmatprep.mubr.msk.f32.mxu0 %vm173_vm0, %v11092_v11 }
0x2e96   :  { %v4610_v57 = vpop.f32.mrb[84].mxu0 }
0x2e97   :  { %v4611_v47 = vadd.f32 %v4610_v57, %v10582_v63  ;;  %v8786_v41 = vpop.f32.mrb[85].mxu0 }
0x2e99   :  { %9852 = vtanh.f32 %v4611_v47 }
0x2ea3   :  { %v11298_v18 = vpop.eup %9852 }
0x2ea4   :  { %v4615_v59 = vmul.f32 %v11298_v18, %v11296_v15 }
0x2ea6   :  { %v4616_v48 = vadd.f32 %v4615_v59, %v11232_v17 }
0x2ea8   :  { %8787 = vmatprep.subr.mxu0 %v4616_v48 }
0x2ea9   :  { %8788 = vmatpush3.msra.mxu0 %v4616_v48 }
0x2eaa   :  { %8790 = vmatmul.mubr.msk.f32.vlgmr.msra.gmra.mrb[86].mxu0 %vm173_vm0, %v11112_v39  ;;  %9396 = vmatprep.subr.bf16.mxu0 %v11833_v7 }
0x2eab   :  { %8792 = vmatprep.mubr.msk.f32.mxu0 %vm173_vm0, %v11120_v56 }
0x2eae   :  { %8793 = vmatmul.mubr.msk.f32.gmra.mrb[88].mxu0 %vm173_vm0, %v11127_v21 }
0x2eaf   :  { %8817 = vmatprep.mubr.msk.f32.mxu0 %vm10081_vm2, %v11834_v28 }
0x2f7d   :  { %v8791_v49 = vpop.f32.mrb[86].mxu0 }
0x2f7e   :  { %v4689_v22 = vadd.f32 %v8791_v49, %v11843_v1  ;;  %v4683_v16 = vpop.f32.mrb[87].mxu0 }
0x2f7f   :  { %v4684_v51 = vadd.f32 %v4683_v16, %v11844_v14 }
0x2f80   :  { %9854 = vtanh.f32 %v4689_v22 }
0x2f81   :  { %9856 = vtanh.f32 %v4684_v51  ;;  %v8794_v2 = vpop.f32.mrb[88].mxu0 }
0x2f82   :  { %v4699_v26 = vadd.f32 %v8794_v2, %v11845_v20  ;;  %v4693_v29 = vpop.f32.mrb[89].mxu0 }
0x2f83   :  { %v4694_v53 = vadd.f32 %v4693_v29, %v11846_v58 }
0x2f84   :  { %9858 = vtanh.f32 %v4699_v26 }
0x2f85   :  { %9860 = vtanh.f32 %v4694_v53 }
0x2f8a   :  { %v9855_v46 = vpop.eup %9854 }
0x2f8b   :  { %v9857_v9 = vpop.eup %9856 }
0x2f8c   :  { %v9388_v52 = vpack.c.bf16 %v9855_v46, %v9857_v9 }
0x2f8e   :  { %v9859_v50 = vpop.eup %9858  ;;  %9389 = vmatprep.subr.bf16.mxu1 %v9388_v52 }
0x2f8f   :  { %v9861_v37 = vpop.eup %9860  ;;  %9391 = vmatpush3.bf16.msra.mxu1 %v9388_v52 }
0x2f90   :  { %v9392_v6 = vpack.c.bf16 %v9859_v50, %v9861_v37 }
0x2f92   :  { %9393 = vmatprep.subr.bf16.mxu1 %v9392_v6 }
0x2f93   :  { %9395 = vmatpush3.bf16.msra.mxu1 %v9392_v6 }
0x2f96   :  { %8804 = vmatmul.mubr.msk.f32.vlgmr.msra.gmra.mrb[84].mxu1 %vm275_vm1, %v11256_v34 }
0x2f97   :  { %8806 = vmatprep.mubr.msk.f32.mxu1 %vm275_vm1, %v11263_v10 }
0x2f9a   :  { %8807 = vmatmul.mubr.msk.f32.gmra.mrb[86].mxu1 %vm275_vm1, %v11270_v25 }
0x2f9b   :  { %8822 = vmatprep.mubr.msk.f32.mxu1 %vm173_vm0, %v11092_v11 }
0x3069   :  { %v8805_v0 = vpop.f32.mrb[84].mxu1 }
0x306a   :  { %v4778_v45 = vadd.f32 %v8805_v0, %v10560_v55  ;;  %v4772_v24 = vpop.f32.mrb[85].mxu1 }
0x306b   :  { %v4773_v3 = vadd.f32 %v4772_v24, %v10562_v60 }
0x306c   :  { %9862 = vtanh.f32 %v4778_v45 }
0x306d   :  { %9864 = vtanh.f32 %v4773_v3  ;;  %v8808_v61 = vpop.f32.mrb[86].mxu1 }
0x306e   :  { %v4788_v38 = vadd.f32 %v8808_v61, %v10566_v19  ;;  %v4782_v36 = vpop.f32.mrb[87].mxu1 }
0x306f   :  { %v4783_v54 = vadd.f32 %v4782_v36, %v10568_v40 }
0x3070   :  { %9866 = vtanh.f32 %v4788_v38 }
0x3071   :  { %9868 = vtanh.f32 %v4783_v54 }
0x3076   :  { %v9863_v30 = vpop.eup %9862 }
0x3077   :  { %v9865_v62 = vpop.eup %9864 }
0x3078   :  { %v9397_v32 = vpack.c.bf16 %v9863_v30, %v9865_v62 }
0x307a   :  { %v9867_v31 = vpop.eup %9866  ;;  %9398 = vmatpush3.bf16.msra.mxu0 %v9397_v32 }
0x307b   :  { %v9869_v42 = vpop.eup %9868  ;;  %9399 = vmatprep.subr.bf16.mxu0 %v11833_v7 }
0x307c   :  { %v9400_v43 = vpack.c.bf16 %v9867_v31, %v9869_v42 }
0x307e   :  { %9401 = vmatpush3.bf16.msra.mxu0 %v9400_v43 }
0x3081   :  { %8818 = vmatmul.mubr.msk.f32.vlgmr.msra.gmra.mrb[90].mxu0 %vm275_vm1, %v11284_v12 }
0x3082   :  { %8836 = vmatprep.mubr.msk.f32.mxu0 %vm275_vm1, %v11155_v27 }
0x3154   :  { %v4861_v4 = vpop.f32.mrb[90].mxu0 }
0x3155   :  { %v4862_v13 = vadd.f32 %v4861_v4, %v10582_v63  ;;  %v8819_v8 = vpop.f32.mrb[91].mxu0 }
0x3157   :  { %9870 = vtanh.f32 %v4862_v13 }
0x3161   :  { %v9871_v57 = vpop.eup %9870 }
0x3162   :  { %v4866_v47 = vmul.f32 %v9871_v57, %v11296_v15  ;;  %v5368_v62 = vmul.f32 2.0, %v9871_v57 }
0x3164   :  { %v4867_v41 = vadd.f32 %v4866_v47, %v11232_v17  ;;  %v5369_v31 = vadd.f32 %v11298_v18, %v5368_v62 }
0x3166   :  { %8820 = vmatprep.subr.mxu1 %v4867_v41 }
0x3167   :  { %8821 = vmatpush3.msra.mxu1 %v4867_v41 }
0x3168   :  { %8823 = vmatmul.mubr.msk.f32.vlgmr.msra.gmra.mrb[88].mxu1 %vm173_vm0, %v11112_v39  ;;  %9410 = vmatprep.subr.bf16.mxu1 %v11833_v7 }
0x3169   :  { %8825 = vmatprep.mubr.msk.f32.mxu1 %vm173_vm0, %v11120_v56 }
0x316c   :  { %8826 = vmatmul.mubr.msk.f32.gmra.mrb[90].mxu1 %vm173_vm0, %v11127_v21 }
0x316d   :  { %8850 = vmatprep.mubr.msk.f32.mxu1 %vm10081_vm2, %v11834_v28 }
0x323b   :  { %v8824_v44 = vpop.f32.mrb[88].mxu1 }
0x323c   :  { %v4940_v15 = vadd.f32 %v8824_v44, %v11843_v1  ;;  %v4934_v59 = vpop.f32.mrb[89].mxu1  ;;  %v11847_v44 = vld [vmem:[#allocation16_spill] sm:$0xff] }
0x323d   :  { %v4935_v48 = vadd.f32 %v4934_v59, %v11844_v14 }
0x323e   :  { %9872 = vtanh.f32 %v4940_v15 }
0x323f   :  { %9874 = vtanh.f32 %v4935_v48  ;;  %v8827_v49 = vpop.f32.mrb[90].mxu1  ;;  %v11848_v48 = vld [vmem:[#allocation17_spill] sm:$0xff] }
0x3240   :  { %v4950_v22 = vadd.f32 %v8827_v49, %v11845_v20  ;;  %v4944_v16 = vpop.f32.mrb[91].mxu1 }
0x3241   :  { %v4945_v51 = vadd.f32 %v4944_v16, %v11846_v58 }
0x3242   :  { %9876 = vtanh.f32 %v4950_v22 }
0x3243   :  { %9878 = vtanh.f32 %v4945_v51 }
0x3248   :  { %v9873_v2 = vpop.eup %9872 }
0x3249   :  { %v9875_v26 = vpop.eup %9874 }
0x324a   :  { %v9402_v29 = vpack.c.bf16 %v9873_v2, %v9875_v26 }
0x324c   :  { %v9877_v53 = vpop.eup %9876  ;;  %9403 = vmatprep.subr.bf16.mxu0 %v9402_v29 }
0x324d   :  { %v9879_v46 = vpop.eup %9878  ;;  %9405 = vmatpush3.bf16.msra.mxu0 %v9402_v29 }
0x324e   :  { %v9406_v1 = vpack.c.bf16 %v9877_v53, %v9879_v46 }
0x3250   :  { %9407 = vmatprep.subr.bf16.mxu0 %v9406_v1 }
0x3251   :  { %9409 = vmatpush3.bf16.msra.mxu0 %v9406_v1 }
0x3254   :  { %8837 = vmatmul.mubr.msk.f32.vlgmr.msra.gmra.mrb[92].mxu0 %vm275_vm1, %v11256_v34 }
0x3255   :  { %8839 = vmatprep.mubr.msk.f32.mxu0 %vm275_vm1, %v11263_v10 }
0x3258   :  { %8840 = vmatmul.mubr.msk.f32.gmra.mrb[94].mxu0 %vm275_vm1, %v11270_v25 }
0x3259   :  { %8869 = vmatprep.mubr.msk.f32.mxu0 %vm275_vm1, %v11155_v27 }
0x3327   :  { %v8838_v14 = vpop.f32.mrb[92].mxu0 }
0x3328   :  { %v5029_v20 = vadd.f32 %v8838_v14, %v10560_v55  ;;  %v5023_v58 = vpop.f32.mrb[93].mxu0 }
0x3329   :  { %v5024_v9 = vadd.f32 %v5023_v58, %v10562_v60 }
0x332a   :  { %9880 = vtanh.f32 %v5029_v20 }
0x332b   :  { %9882 = vtanh.f32 %v5024_v9  ;;  %v8841_v52 = vpop.f32.mrb[94].mxu0 }
0x332c   :  { %v5039_v50 = vadd.f32 %v8841_v52, %v10566_v19  ;;  %v5033_v37 = vpop.f32.mrb[95].mxu0 }
0x332d   :  { %v5034_v6 = vadd.f32 %v5033_v37, %v10568_v40 }
0x332e   :  { %9884 = vtanh.f32 %v5039_v50 }
0x332f   :  { %9886 = vtanh.f32 %v5034_v6 }
0x3334   :  { %v9881_v0 = vpop.eup %9880 }
0x3335   :  { %v9883_v45 = vpop.eup %9882 }
0x3336   :  { %v9411_v24 = vpack.c.bf16 %v9881_v0, %v9883_v45 }
0x3338   :  { %v9885_v3 = vpop.eup %9884  ;;  %9412 = vmatpush3.bf16.msra.mxu1 %v9411_v24 }
0x3339   :  { %v9887_v61 = vpop.eup %9886  ;;  %9413 = vmatprep.subr.bf16.mxu1 %v11833_v7 }
0x333a   :  { %v9414_v38 = vpack.c.bf16 %v9885_v3, %v9887_v61 }
0x333c   :  { %9415 = vmatpush3.bf16.msra.mxu1 %v9414_v38  ;;  %v4341_v38 = vmul.f32 0.16666667, %v11293_v35 }
0x333f   :  { %8851 = vmatmul.mubr.msk.f32.vlgmr.msra.gmra.mrb[92].mxu1 %vm275_vm1, %v11284_v12 }
0x3340   :  { %8855 = vmatprep.mubr.msk.f32.mxu1 %vm173_vm0, %v11092_v11 }
0x3412   :  { %v5112_v36 = vpop.f32.mrb[92].mxu1 }
0x3413   :  { %v5113_v54 = vadd.f32 %v5112_v36, %v10582_v63  ;;  %v8852_v30 = vpop.f32.mrb[93].mxu1 }
0x3415   :  { %9888 = vtanh.f32 %v5113_v54 }
0x341f   :  { %v9889_v32 = vpop.eup %9888 }
0x3420   :  { %v5370_v42 = vmul.f32 2.0, %v9889_v32  ;;  %v5117_v43 = vmul.f32 %v9889_v32, %v11293_v35 }
0x3422   :  { %v5118_v4 = vadd.f32 %v5117_v43, %v11232_v17  ;;  %v11370_v13 = vadd.f32 %v5370_v42, %v5369_v31 }
0x3424   :  { %8853 = vmatprep.subr.mxu1 %v5118_v4 }
0x3425   :  { %8854 = vmatpush3.msra.mxu1 %v5118_v4 }
0x3426   :  { %8856 = vmatmul.mubr.msk.f32.vlgmr.msra.gmra.mrb[94].mxu1 %vm173_vm0, %v11112_v39  ;;  %9424 = vmatprep.subr.bf16.mxu1 %v11833_v7 }
0x3427   :  { %8858 = vmatprep.mubr.msk.f32.mxu1 %vm173_vm0, %v11120_v56 }
0x342a   :  { %8859 = vmatmul.mubr.msk.f32.gmra.mrb[96].mxu1 %vm173_vm0, %v11127_v21 }
0x342b   :  { %8883 = vmatprep.mubr.msk.f32.mxu1 %vm10081_vm2, %v11834_v28 }
0x34f9   :  { %v8857_v18 = vpop.f32.mrb[94].mxu1 }
0x34fa   :  { %v5191_v8 = vadd.f32 %v8857_v18, %v10452_v5  ;;  %v5185_v57 = vpop.f32.mrb[95].mxu1 }
0x34fb   :  { %v5186_v47 = vadd.f32 %v5185_v57, %v10455_v33 }
0x34fc   :  { %9890 = vtanh.f32 %v5191_v8 }
0x34fd   :  { %9892 = vtanh.f32 %v5186_v47  ;;  %v8860_v41 = vpop.f32.mrb[96].mxu1 }
0x34fe   :  { %v5201_v15 = vadd.f32 %v8860_v41, %v11847_v44  ;;  %v5195_v59 = vpop.f32.mrb[97].mxu1 }
0x34ff   :  { %v5196_v49 = vadd.f32 %v5195_v59, %v11848_v48 }
0x3500   :  { %9894 = vtanh.f32 %v5201_v15 }
0x3501   :  { %9896 = vtanh.f32 %v5196_v49 }
0x3506   :  { %v9891_v22 = vpop.eup %9890 }
0x3507   :  { %v9893_v16 = vpop.eup %9892 }
0x3508   :  { %v9416_v51 = vpack.c.bf16 %v9891_v22, %v9893_v16 }
0x350a   :  { %v9895_v2 = vpop.eup %9894  ;;  %9417 = vmatprep.subr.bf16.mxu0 %v9416_v51 }
0x350b   :  { %v9897_v26 = vpop.eup %9896  ;;  %9419 = vmatpush3.bf16.msra.mxu0 %v9416_v51 }
0x350c   :  { %v9420_v29 = vpack.c.bf16 %v9895_v2, %v9897_v26  ;;  %v11445_v26 = vld [vmem:[%s11757_s3] sm:$0xff] }
0x350e   :  { %9421 = vmatprep.subr.bf16.mxu0 %v9420_v29 }
0x350f   :  { %9423 = vmatpush3.bf16.msra.mxu0 %v9420_v29 }
0x3512   :  { %8870 = vmatmul.mubr.msk.f32.vlgmr.msra.gmra.mrb[96].mxu0 %vm275_vm1, %v11256_v34 }
0x3513   :  { %8872 = vmatprep.mubr.msk.f32.mxu0 %vm275_vm1, %v11263_v10 }
0x3516   :  { %8873 = vmatmul.mubr.msk.f32.gmra.mrb[98].mxu0 %vm275_vm1, %v11270_v25 }
0x3517   :  { %8888 = vmatprep.mubr.msk.f32.mxu0 %vm173_vm0, %v11092_v11 }
0x35e5   :  { %v8871_v53 = vpop.f32.mrb[96].mxu0 }
0x35e6   :  { %v5280_v46 = vadd.f32 %v8871_v53, %v10560_v55  ;;  %v5274_v1 = vpop.f32.mrb[97].mxu0 }
0x35e7   :  { %v5275_v14 = vadd.f32 %v5274_v1, %v10562_v60  ;;  %v11849_v1 = vld [vmem:[#allocation5_spill] sm:$0xff] }
0x35e8   :  { %9898 = vtanh.f32 %v5280_v46 }
0x35e9   :  { %9900 = vtanh.f32 %v5275_v14  ;;  %v8874_v20 = vpop.f32.mrb[98].mxu0  ;;  %v11452_v14 = vrot.slane %v10220_v23, %v11849_v1 }
0x35ea   :  { %v5290_v58 = vadd.f32 %v8874_v20, %v10566_v19  ;;  %v5284_v9 = vpop.f32.mrb[99].mxu0 }
0x35eb   :  { %v5285_v52 = vadd.f32 %v5284_v9, %v10568_v40  ;;  %v11455_v20 = vmul.f32 0.5, %v11452_v14 }
0x35ec   :  { %9902 = vtanh.f32 %v5290_v58 }
0x35ed   :  { %9904 = vtanh.f32 %v5285_v52 }
0x35f2   :  { %v9899_v50 = vpop.eup %9898 }
0x35f3   :  { %v9901_v37 = vpop.eup %9900 }
0x35f4   :  { %v9425_v6 = vpack.c.bf16 %v9899_v50, %v9901_v37  ;;  %v11465_v50 = vld [vmem:[%s11757_s3 + $0x8] sm:$0xff]  ;;  %v11473_v37 = vld [vmem:[%s11757_s3 + $0x10] sm:$0xff] }
0x35f6   :  { %v9903_v11 = vpop.eup %9902  ;;  %9426 = vmatpush3.bf16.msra.mxu1 %v9425_v6  ;;  %v11480_v6 = vld [vmem:[%s11757_s3 + $0x18] sm:$0xff] }
0x35f7   :  { %v9905_v0 = vpop.eup %9904  ;;  %9427 = vmatprep.subr.bf16.mxu1 %v11833_v7 }
0x35f8   :  { %v9428_v45 = vpack.c.bf16 %v9903_v11, %v9905_v0  ;;  %v11850_v0 = vld [vmem:[#allocation18_spill] sm:$0xff] }
0x35fa   :  { %9429 = vmatpush3.bf16.msra.mxu1 %v9428_v45 }
0x35fd   :  { %8884 = vmatmul.mubr.msk.f32.vlgmr.msra.gmra.mrb[98].mxu1 %vm275_vm1, %v11284_v12 }
0x35fe   :  { %8902 = vmatprep.mubr.msk.f32.mxu1 %vm275_vm1, %v11155_v27 }
0x36d0   :  { %v5363_v24 = vpop.f32.mrb[98].mxu1 }
0x36d1   :  { %v5364_v3 = vadd.f32 %v5363_v24, %v10582_v63  ;;  %v8885_v61 = vpop.f32.mrb[99].mxu1 }
0x36d3   :  { %9906 = vtanh.f32 %v5364_v3  ;;  %v11851_v3 = vld [vmem:[#allocation19_spill] sm:$0xff] }
0x36dd   :  { %v9907_v36 = vpop.eup %9906 }
0x36de   :  { %v5372_v54 = vadd.f32 %v9907_v36, %v11370_v13  ;;  %v11852_v36 = vld [vmem:[#allocation20_spill] sm:$0xff] }
0x36e0   :  { %v5373_v30 = vmul.f32 %v5372_v54, %v4341_v38 }
0x36e2   :  { %v11406_v62 = vadd.f32 %v5373_v30, %v11232_v17 }
0x36e4   :  { %7647 = vst [vmem:[%s11760_s9 + $0x28] sm:$0xff] %v11406_v62  ;;  %8886 = vmatprep.subr.mxu0 %v11406_v62 }
0x36e5   :  { %8887 = vmatpush3.msra.mxu0 %v11406_v62 }
0x36e6   :  { %8889 = vmatmul.mubr.msk.f32.vlgmr.msra.gmra.mrb[100].mxu0 %vm173_vm0, %v11112_v39  ;;  %9438 = vmatprep.subr.bf16.mxu0 %v11833_v7 }
0x36e7   :  { %8891 = vmatprep.mubr.msk.f32.mxu0 %vm173_vm0, %v11120_v56 }
0x36ea   :  { %8892 = vmatmul.mubr.msk.f32.gmra.mrb[102].mxu0 %vm173_vm0, %v11127_v21 }
0x36eb   :  { %8916 = vmatprep.mubr.msk.f32.mxu0 %vm10081_vm2, %v11834_v28 }
0x37b9   :  { %v8890_v17 = vpop.f32.mrb[100].mxu0 }
0x37ba   :  { %v5479_v35 = vadd.f32 %v8890_v17, %v10452_v5  ;;  %v5473_v32 = vpop.f32.mrb[101].mxu0  ;;  %v11853_v17 = vld [vmem:[#allocation21_spill] sm:$0xff] }
0x37bb   :  { %v5474_v31 = vadd.f32 %v5473_v32, %v10455_v33 }
0x37bc   :  { %9908 = vtanh.f32 %v5479_v35 }
0x37bd   :  { %9910 = vtanh.f32 %v5474_v31  ;;  %v8893_v39 = vpop.f32.mrb[102].mxu0 }
0x37be   :  { %v5489_v42 = vadd.f32 %v8893_v39, %v11847_v44  ;;  %v5483_v43 = vpop.f32.mrb[103].mxu0 }
0x37bf   :  { %v5484_v56 = vadd.f32 %v5483_v43, %v11848_v48 }
0x37c0   :  { %9912 = vtanh.f32 %v5489_v42 }
0x37c1   :  { %9914 = vtanh.f32 %v5484_v56 }
0x37c6   :  { %v9909_v21 = vpop.eup %9908 }
0x37c7   :  { %v9911_v4 = vpop.eup %9910 }
0x37c8   :  { %v9430_v13 = vpack.c.bf16 %v9909_v21, %v9911_v4 }
0x37ca   :  { %v9913_v18 = vpop.eup %9912  ;;  %9431 = vmatprep.subr.bf16.mxu1 %v9430_v13 }
0x37cb   :  { %v9915_v8 = vpop.eup %9914  ;;  %9433 = vmatpush3.bf16.msra.mxu1 %v9430_v13 }
0x37cc   :  { %v9434_v5 = vpack.c.bf16 %v9913_v18, %v9915_v8 }
0x37ce   :  { %9435 = vmatprep.subr.bf16.mxu1 %v9434_v5 }
0x37cf   :  { %9437 = vmatpush3.bf16.msra.mxu1 %v9434_v5 }
0x37d2   :  { %8903 = vmatmul.mubr.msk.f32.vlgmr.msra.gmra.mrb[100].mxu1 %vm275_vm1, %v11256_v34 }
0x37d3   :  { %8905 = vmatprep.mubr.msk.f32.mxu1 %vm275_vm1, %v11263_v10 }
0x37d6   :  { %8906 = vmatmul.mubr.msk.f32.gmra.mrb[102].mxu1 %vm275_vm1, %v11270_v25 }
0x37d7   :  { %8935 = vmatprep.mubr.msk.f32.mxu1 %vm275_vm1, %v11155_v27 }
0x38a5   :  { %v8904_v33 = vpop.f32.mrb[100].mxu1 }
0x38a6   :  { %v5568_v57 = vadd.f32 %v8904_v33, %v10560_v55  ;;  %v5562_v47 = vpop.f32.mrb[101].mxu1 }
0x38a7   :  { %v5563_v41 = vadd.f32 %v5562_v47, %v10562_v60 }
0x38a8   :  { %9916 = vtanh.f32 %v5568_v57 }
0x38a9   :  { %9918 = vtanh.f32 %v5563_v41  ;;  %v8907_v44 = vpop.f32.mrb[102].mxu1 }
0x38aa   :  { %v5578_v15 = vadd.f32 %v8907_v44, %v10566_v19  ;;  %v5572_v59 = vpop.f32.mrb[103].mxu1 }
0x38ab   :  { %v5573_v48 = vadd.f32 %v5572_v59, %v10568_v40 }
0x38ac   :  { %9920 = vtanh.f32 %v5578_v15 }
0x38ad   :  { %9922 = vtanh.f32 %v5573_v48 }
0x38b2   :  { %v9917_v49 = vpop.eup %9916 }
0x38b3   :  { %v9919_v22 = vpop.eup %9918 }
0x38b4   :  { %v9439_v16 = vpack.c.bf16 %v9917_v49, %v9919_v22  ;;  %v11508_v49 = vld [vmem:[%s11764_s5] sm:$0xff] }
0x38b6   :  { %v9921_v27 = vpop.eup %9920  ;;  %9440 = vmatpush3.bf16.msra.mxu0 %v9439_v16 }
0x38b7   :  { %v9923_v51 = vpop.eup %9922  ;;  %9441 = vmatprep.subr.bf16.mxu0 %v11833_v7 }
0x38b8   :  { %v9442_v2 = vpack.c.bf16 %v9921_v27, %v9923_v51 }
0x38ba   :  { %9443 = vmatpush3.bf16.msra.mxu0 %v9442_v2 }
0x38bd   :  { %8917 = vmatmul.mubr.msk.f32.vlgmr.msra.gmra.mrb[104].mxu0 %vm275_vm1, %v11284_v12 }
0x38be   :  { %8921 = vmatprep.mubr.msk.f32.mxu0 %vm173_vm0, %v11445_v26 }
0x3990   :  { %v5651_v29 = vpop.f32.mrb[104].mxu0 }
0x3991   :  { %v5652_v53 = vadd.f32 %v5651_v29, %v10582_v63  ;;  %v8918_v46 = vpop.f32.mrb[105].mxu0 }
0x3993   :  { %9924 = vtanh.f32 %v5652_v53 }
0x399d   :  { %v11457_v58 = vpop.eup %9924 }
0x399e   :  { %v5656_v9 = vmul.f32 %v11457_v58, %v11455_v20 }
0x39a0   :  { %v5657_v52 = vadd.f32 %v5656_v9, %v11406_v62 }
0x39a2   :  { %8919 = vmatprep.subr.mxu0 %v5657_v52 }
0x39a3   :  { %8920 = vmatpush3.msra.mxu0 %v5657_v52 }
0x39a4   :  { %8922 = vmatmul.mubr.msk.f32.vlgmr.msra.gmra.mrb[106].mxu0 %vm173_vm0, %v11465_v50  ;;  %9452 = vmatprep.subr.bf16.mxu0 %v11833_v7 }
0x39a5   :  { %8924 = vmatprep.mubr.msk.f32.mxu0 %vm173_vm0, %v11473_v37 }
0x39a8   :  { %8925 = vmatmul.mubr.msk.f32.gmra.mrb[108].mxu0 %vm173_vm0, %v11480_v6 }
0x39a9   :  { %8949 = vmatprep.mubr.msk.f32.mxu0 %vm10081_vm2, %v11834_v28 }
0x3a77   :  { %v8923_v11 = vpop.f32.mrb[106].mxu0 }
0x3a78   :  { %v5730_v45 = vadd.f32 %v8923_v11, %v11850_v0  ;;  %v5724_v24 = vpop.f32.mrb[107].mxu0 }
0x3a79   :  { %v5725_v61 = vadd.f32 %v5724_v24, %v11851_v3 }
0x3a7a   :  { %9926 = vtanh.f32 %v5730_v45 }
0x3a7b   :  { %9928 = vtanh.f32 %v5725_v61  ;;  %v8926_v38 = vpop.f32.mrb[108].mxu0 }
0x3a7c   :  { %v5740_v54 = vadd.f32 %v8926_v38, %v11852_v36  ;;  %v5734_v30 = vpop.f32.mrb[109].mxu0 }
0x3a7d   :  { %v5735_v35 = vadd.f32 %v5734_v30, %v11853_v17 }
0x3a7e   :  { %9930 = vtanh.f32 %v5740_v54 }
0x3a7f   :  { %9932 = vtanh.f32 %v5735_v35 }
0x3a84   :  { %v9927_v32 = vpop.eup %9926 }
0x3a85   :  { %v9929_v31 = vpop.eup %9928 }
0x3a86   :  { %v9444_v39 = vpack.c.bf16 %v9927_v32, %v9929_v31 }
0x3a88   :  { %v9931_v42 = vpop.eup %9930  ;;  %9445 = vmatprep.subr.bf16.mxu1 %v9444_v39 }
0x3a89   :  { %v9933_v43 = vpop.eup %9932  ;;  %9447 = vmatpush3.bf16.msra.mxu1 %v9444_v39 }
0x3a8a   :  { %v9448_v56 = vpack.c.bf16 %v9931_v42, %v9933_v43 }
0x3a8c   :  { %9449 = vmatprep.subr.bf16.mxu1 %v9448_v56 }
0x3a8d   :  { %9451 = vmatpush3.bf16.msra.mxu1 %v9448_v56 }
0x3a90   :  { %8936 = vmatmul.mubr.msk.f32.vlgmr.msra.gmra.mrb[104].mxu1 %vm275_vm1, %v11256_v34 }
0x3a91   :  { %8938 = vmatprep.mubr.msk.f32.mxu1 %vm275_vm1, %v11263_v10 }
0x3a94   :  { %8939 = vmatmul.mubr.msk.f32.gmra.mrb[106].mxu1 %vm275_vm1, %v11270_v25 }
0x3a95   :  { %8954 = vmatprep.mubr.msk.f32.mxu1 %vm173_vm0, %v11445_v26 }
0x3b63   :  { %v8937_v21 = vpop.f32.mrb[104].mxu1 }
0x3b64   :  { %v5819_v4 = vadd.f32 %v8937_v21, %v10560_v55  ;;  %v5813_v13 = vpop.f32.mrb[105].mxu1 }
0x3b65   :  { %v5814_v18 = vadd.f32 %v5813_v13, %v10562_v60 }
0x3b66   :  { %9934 = vtanh.f32 %v5819_v4 }
0x3b67   :  { %9936 = vtanh.f32 %v5814_v18  ;;  %v8940_v8 = vpop.f32.mrb[106].mxu1 }
0x3b68   :  { %v5829_v5 = vadd.f32 %v8940_v8, %v10566_v19  ;;  %v5823_v33 = vpop.f32.mrb[107].mxu1 }
0x3b69   :  { %v5824_v57 = vadd.f32 %v5823_v33, %v10568_v40 }
0x3b6a   :  { %9938 = vtanh.f32 %v5829_v5 }
0x3b6b   :  { %9940 = vtanh.f32 %v5824_v57 }
0x3b70   :  { %v9935_v47 = vpop.eup %9934 }
0x3b71   :  { %v9937_v41 = vpop.eup %9936 }
0x3b72   :  { %v9453_v44 = vpack.c.bf16 %v9935_v47, %v9937_v41 }
0x3b74   :  { %v9939_v15 = vpop.eup %9938  ;;  %9454 = vmatpush3.bf16.msra.mxu0 %v9453_v44 }
0x3b75   :  { %v9941_v59 = vpop.eup %9940  ;;  %9455 = vmatprep.subr.bf16.mxu0 %v11833_v7 }
0x3b76   :  { %v9456_v48 = vpack.c.bf16 %v9939_v15, %v9941_v59 }
0x3b78   :  { %9457 = vmatpush3.bf16.msra.mxu0 %v9456_v48 }
0x3b7b   :  { %8950 = vmatmul.mubr.msk.f32.vlgmr.msra.gmra.mrb[110].mxu0 %vm275_vm1, %v11284_v12 }
0x3b7c   :  { %8968 = vmatprep.mubr.msk.f32.mxu0 %vm275_vm1, %v11508_v49 }
0x3c4e   :  { %v5902_v22 = vpop.f32.mrb[110].mxu0 }
0x3c4f   :  { %v5903_v16 = vadd.f32 %v5902_v22, %v10582_v63  ;;  %v8951_v27 = vpop.f32.mrb[111].mxu0  ;;  %v11854_v22 = vld [vmem:[#allocation22_spill] sm:$0xff] }
0x3c51   :  { %9942 = vtanh.f32 %v5903_v16 }
0x3c5b   :  { %v9943_v51 = vpop.eup %9942 }
0x3c5c   :  { %v5907_v2 = vmul.f32 %v9943_v51, %v11455_v20  ;;  %v6409_v57 = vmul.f32 2.0, %v9943_v51  ;;  %v11855_v51 = vld [vmem:[#allocation23_spill] sm:$0xff] }
0x3c5e   :  { %v5908_v29 = vadd.f32 %v5907_v2, %v11406_v62  ;;  %v6410_v41 = vadd.f32 %v11457_v58, %v6409_v57 }
0x3c60   :  { %8952 = vmatprep.subr.mxu1 %v5908_v29 }
0x3c61   :  { %8953 = vmatpush3.msra.mxu1 %v5908_v29 }
0x3c62   :  { %8955 = vmatmul.mubr.msk.f32.vlgmr.msra.gmra.mrb[108].mxu1 %vm173_vm0, %v11465_v50  ;;  %9466 = vmatprep.subr.bf16.mxu1 %v11833_v7 }
0x3c63   :  { %8957 = vmatprep.mubr.msk.f32.mxu1 %vm173_vm0, %v11473_v37 }
0x3c66   :  { %8958 = vmatmul.mubr.msk.f32.gmra.mrb[110].mxu1 %vm173_vm0, %v11480_v6 }
0x3c67   :  { %8982 = vmatprep.mubr.msk.f32.mxu1 %vm10081_vm2, %v11834_v28 }
0x3d35   :  { %v8956_v53 = vpop.f32.mrb[108].mxu1 }
0x3d36   :  { %v5981_v46 = vadd.f32 %v8956_v53, %v11850_v0  ;;  %v5975_v1 = vpop.f32.mrb[109].mxu1  ;;  %v11856_v53 = vld [vmem:[#allocation24_spill] sm:$0xff] }
0x3d37   :  { %v5976_v20 = vadd.f32 %v5975_v1, %v11851_v3 }
0x3d38   :  { %9944 = vtanh.f32 %v5981_v46 }
0x3d39   :  { %9946 = vtanh.f32 %v5976_v20  ;;  %v8959_v9 = vpop.f32.mrb[110].mxu1  ;;  %v11857_v20 = vld [vmem:[#allocation25_spill] sm:$0xff] }
0x3d3a   :  { %v5991_v52 = vadd.f32 %v8959_v9, %v11852_v36  ;;  %v5985_v11 = vpop.f32.mrb[111].mxu1 }
0x3d3b   :  { %v5986_v45 = vadd.f32 %v5985_v11, %v11853_v17 }
0x3d3c   :  { %9948 = vtanh.f32 %v5991_v52 }
0x3d3d   :  { %9950 = vtanh.f32 %v5986_v45 }
0x3d42   :  { %v9945_v24 = vpop.eup %9944 }
0x3d43   :  { %v9947_v61 = vpop.eup %9946 }
0x3d44   :  { %v9458_v38 = vpack.c.bf16 %v9945_v24, %v9947_v61 }
0x3d46   :  { %v9949_v54 = vpop.eup %9948  ;;  %9459 = vmatprep.subr.bf16.mxu0 %v9458_v38 }
0x3d47   :  { %v9951_v30 = vpop.eup %9950  ;;  %9461 = vmatpush3.bf16.msra.mxu0 %v9458_v38 }
0x3d48   :  { %v9462_v0 = vpack.c.bf16 %v9949_v54, %v9951_v30 }
0x3d4a   :  { %9463 = vmatprep.subr.bf16.mxu0 %v9462_v0 }
0x3d4b   :  { %9465 = vmatpush3.bf16.msra.mxu0 %v9462_v0 }
0x3d4e   :  { %8969 = vmatmul.mubr.msk.f32.vlgmr.msra.gmra.mrb[112].mxu0 %vm275_vm1, %v11256_v34 }
0x3d4f   :  { %8971 = vmatprep.mubr.msk.f32.mxu0 %vm275_vm1, %v11263_v10 }
0x3d52   :  { %8972 = vmatmul.mubr.msk.f32.gmra.mrb[114].mxu0 %vm275_vm1, %v11270_v25 }
0x3d53   :  { %9001 = vmatprep.mubr.msk.f32.mxu0 %vm275_vm1, %v11508_v49 }
0x3e21   :  { %v8970_v3 = vpop.f32.mrb[112].mxu0 }
0x3e22   :  { %v6070_v36 = vadd.f32 %v8970_v3, %v10560_v55  ;;  %v6064_v17 = vpop.f32.mrb[113].mxu0 }
0x3e23   :  { %v6065_v35 = vadd.f32 %v6064_v17, %v10562_v60 }
0x3e24   :  { %9952 = vtanh.f32 %v6070_v36 }
0x3e25   :  { %9954 = vtanh.f32 %v6065_v35  ;;  %v8973_v32 = vpop.f32.mrb[114].mxu0 }
0x3e26   :  { %v6080_v31 = vadd.f32 %v8973_v32, %v10566_v19  ;;  %v6074_v39 = vpop.f32.mrb[115].mxu0 }
0x3e27   :  { %v6075_v42 = vadd.f32 %v6074_v39, %v10568_v40 }
0x3e28   :  { %9956 = vtanh.f32 %v6080_v31 }
0x3e29   :  { %9958 = vtanh.f32 %v6075_v42 }
0x3e2e   :  { %v9953_v43 = vpop.eup %9952 }
0x3e2f   :  { %v9955_v56 = vpop.eup %9954 }
0x3e30   :  { %v9467_v21 = vpack.c.bf16 %v9953_v43, %v9955_v56 }
0x3e32   :  { %v9957_v4 = vpop.eup %9956  ;;  %9468 = vmatpush3.bf16.msra.mxu1 %v9467_v21 }
0x3e33   :  { %v9959_v13 = vpop.eup %9958  ;;  %9469 = vmatprep.subr.bf16.mxu1 %v11833_v7 }
0x3e34   :  { %v9470_v18 = vpack.c.bf16 %v9957_v4, %v9959_v13  ;;  %v5382_v4 = vmul.f32 0.16666667, %v11452_v14 }
0x3e36   :  { %9471 = vmatpush3.bf16.msra.mxu1 %v9470_v18 }
0x3e39   :  { %8983 = vmatmul.mubr.msk.f32.vlgmr.msra.gmra.mrb[112].mxu1 %vm275_vm1, %v11284_v12 }
0x3e3a   :  { %8987 = vmatprep.mubr.msk.f32.mxu1 %vm173_vm0, %v11445_v26 }
0x3f0c   :  { %v6153_v8 = vpop.f32.mrb[112].mxu1 }
0x3f0d   :  { %v6154_v5 = vadd.f32 %v6153_v8, %v10582_v63  ;;  %v8984_v33 = vpop.f32.mrb[113].mxu1 }
0x3f0f   :  { %9960 = vtanh.f32 %v6154_v5 }
0x3f19   :  { %v9961_v47 = vpop.eup %9960 }
0x3f1a   :  { %v6411_v44 = vmul.f32 2.0, %v9961_v47  ;;  %v6158_v15 = vmul.f32 %v9961_v47, %v11452_v14 }
0x3f1c   :  { %v6159_v59 = vadd.f32 %v6158_v15, %v11406_v62  ;;  %v11549_v48 = vadd.f32 %v6411_v44, %v6410_v41 }
0x3f1e   :  { %8985 = vmatprep.subr.mxu1 %v6159_v59 }
0x3f1f   :  { %8986 = vmatpush3.msra.mxu1 %v6159_v59 }
0x3f20   :  { %8988 = vmatmul.mubr.msk.f32.vlgmr.msra.gmra.mrb[114].mxu1 %vm173_vm0, %v11465_v50  ;;  %9480 = vmatprep.subr.bf16.mxu1 %v11833_v7 }
0x3f21   :  { %8990 = vmatprep.mubr.msk.f32.mxu1 %vm173_vm0, %v11473_v37 }
0x3f24   :  { %8991 = vmatmul.mubr.msk.f32.gmra.mrb[116].mxu1 %vm173_vm0, %v11480_v6 }
0x3f25   :  { %9015 = vmatprep.mubr.msk.f32.mxu1 %vm10081_vm2, %v11834_v28 }
0x3ff3   :  { %v8989_v58 = vpop.f32.mrb[114].mxu1 }
0x3ff4   :  { %v6232_v16 = vadd.f32 %v8989_v58, %v11854_v22  ;;  %v6226_v27 = vpop.f32.mrb[115].mxu1 }
0x3ff5   :  { %v6227_v2 = vadd.f32 %v6226_v27, %v11855_v51  ;;  %v11609_v27 = vld [vmem:[%s11764_s5 + $0x8] sm:$0xff] }
0x3ff6   :  { %9962 = vtanh.f32 %v6232_v16 }
0x3ff7   :  { %9964 = vtanh.f32 %v6227_v2  ;;  %v8992_v29 = vpop.f32.mrb[116].mxu1  ;;  %v11623_v2 = vld [vmem:[%s11764_s5 + $0x18] sm:$0xff] }
0x3ff8   :  { %v6242_v46 = vadd.f32 %v8992_v29, %v11856_v53  ;;  %v6236_v1 = vpop.f32.mrb[117].mxu1 }
0x3ff9   :  { %v6237_v9 = vadd.f32 %v6236_v1, %v11857_v20 }
0x3ffa   :  { %9966 = vtanh.f32 %v6242_v46 }
0x3ffb   :  { %9968 = vtanh.f32 %v6237_v9 }
0x4000   :  { %v9963_v52 = vpop.eup %9962 }
0x4001   :  { %v9965_v11 = vpop.eup %9964 }
0x4002   :  { %v9472_v45 = vpack.c.bf16 %v9963_v52, %v9965_v11 }
0x4004   :  { %v9967_v24 = vpop.eup %9966  ;;  %9473 = vmatprep.subr.bf16.mxu0 %v9472_v45 }
0x4005   :  { %v9969_v61 = vpop.eup %9968  ;;  %9475 = vmatpush3.bf16.msra.mxu0 %v9472_v45 }
0x4006   :  { %v9476_v38 = vpack.c.bf16 %v9967_v24, %v9969_v61 }
0x4008   :  { %9477 = vmatprep.subr.bf16.mxu0 %v9476_v38 }
0x4009   :  { %9479 = vmatpush3.bf16.msra.mxu0 %v9476_v38 }
0x400c   :  { %9002 = vmatmul.mubr.msk.f32.vlgmr.msra.gmra.mrb[116].mxu0 %vm275_vm1, %v11256_v34 }
0x400d   :  { %9004 = vmatprep.mubr.msk.f32.mxu0 %vm275_vm1, %v11263_v10 }
0x4010   :  { %9005 = vmatmul.mubr.msk.f32.gmra.mrb[118].mxu0 %vm275_vm1, %v11270_v25 }
0x4011   :  { %9020 = vmatprep.mubr.msk.f32.mxu0 %vm173_vm0, %v11445_v26 }
0x40df   :  { %v9003_v54 = vpop.f32.mrb[116].mxu0 }
0x40e0   :  { %v6321_v30 = vadd.f32 %v9003_v54, %v10560_v55  ;;  %v6315_v0 = vpop.f32.mrb[117].mxu0 }
0x40e1   :  { %v6316_v3 = vadd.f32 %v6315_v0, %v10562_v60  ;;  %v11637_v0 = vld [vmem:[%s11765_s7] sm:$0xff] }
0x40e2   :  { %9970 = vtanh.f32 %v6321_v30 }
0x40e3   :  { %9972 = vtanh.f32 %v6316_v3  ;;  %v9006_v36 = vpop.f32.mrb[118].mxu0 }
0x40e4   :  { %v6331_v34 = vadd.f32 %v9006_v36, %v10566_v19  ;;  %v6325_v17 = vpop.f32.mrb[119].mxu0 }
0x40e5   :  { %v6326_v10 = vadd.f32 %v6325_v17, %v10568_v40  ;;  %v11858_v17 = vld [vmem:[#allocation2_spill] sm:$0xff] }
0x40e6   :  { %9974 = vtanh.f32 %v6331_v34 }
0x40e7   :  { %9976 = vtanh.f32 %v6326_v10  ;;  %v11859_v10 = vsub.s32 7, %v11858_v17 }
0x40ec   :  { %v9971_v25 = vpop.eup %9970 }
0x40ed   :  { %v9973_v35 = vpop.eup %9972 }
0x40ee   :  { %v9481_v32 = vpack.c.bf16 %v9971_v25, %v9973_v35  ;;  %v11647_v25 = vrot.slane %v10220_v23, %v11859_v10 }
0x40f0   :  { %v9975_v31 = vpop.eup %9974  ;;  %9482 = vmatpush3.bf16.msra.mxu1 %v9481_v32  ;;  %v11650_v35 = vmul.f32 0.5, %v11647_v25 }
0x40f1   :  { %v9977_v39 = vpop.eup %9976  ;;  %9483 = vmatprep.subr.bf16.mxu1 %v11833_v7 }
0x40f2   :  { %v9484_v42 = vpack.c.bf16 %v9975_v31, %v9977_v39 }
0x40f4   :  { %9485 = vmatpush3.bf16.msra.mxu1 %v9484_v42  ;;  %v11860_v42 = vld [vmem:[#allocation26_spill] sm:$0xff] }
0x40f7   :  { %9016 = vmatmul.mubr.msk.f32.vlgmr.msra.gmra.mrb[118].mxu1 %vm275_vm1, %v11284_v12 }
0x40f8   :  { %9034 = vmatprep.mubr.msk.f32.mxu1 %vm275_vm1, %v11508_v49 }
0x41ca   :  { %v6404_v43 = vpop.f32.mrb[118].mxu1 }
0x41cb   :  { %v6405_v56 = vadd.f32 %v6404_v43, %v10582_v63  ;;  %v9017_v21 = vpop.f32.mrb[119].mxu1 }
0x41cc   :  { %v11861_v21 = vld [vmem:[#allocation27_spill] sm:$0xff] }
0x41cd   :  { %9978 = vtanh.f32 %v6405_v56 }
0x41d7   :  { %v9979_v13 = vpop.eup %9978 }
0x41d8   :  { %v6413_v18 = vadd.f32 %v9979_v13, %v11549_v48 }
0x41da   :  { %v6414_v8 = vmul.f32 %v6413_v18, %v5382_v4  ;;  %v11862_v18 = vld [vmem:[#allocation28_spill] sm:$0xff] }
0x41dc   :  { %v11585_v5 = vadd.f32 %v6414_v8, %v11406_v62 }
0x41de   :  { %7684 = vst [vmem:[%s11760_s9 + $0x30] sm:$0xff] %v11585_v5  ;;  %9018 = vmatprep.subr.mxu0 %v11585_v5 }
0x41df   :  { %9019 = vmatpush3.msra.mxu0 %v11585_v5 }
0x41e0   :  { %9021 = vmatmul.mubr.msk.f32.vlgmr.msra.gmra.mrb[120].mxu0 %vm173_vm0, %v11465_v50  ;;  %9494 = vmatprep.subr.bf16.mxu0 %v11833_v7 }
0x41e1   :  { %9023 = vmatprep.mubr.msk.f32.mxu0 %vm173_vm0, %v11473_v37 }
0x41e4   :  { %9024 = vmatmul.mubr.msk.f32.gmra.mrb[122].mxu0 %vm173_vm0, %v11480_v6 }
0x41e5   :  { %9048 = vmatprep.mubr.msk.f32.mxu0 %vm10081_vm2, %v11834_v28 }
0x42b3   :  { %v9022_v12 = vpop.f32.mrb[120].mxu0 }
0x42b4   :  { %v6520_v62 = vadd.f32 %v9022_v12, %v11854_v22  ;;  %v6514_v14 = vpop.f32.mrb[121].mxu0 }
0x42b5   :  { %v6515_v33 = vadd.f32 %v6514_v14, %v11855_v51  ;;  %v11616_v51 = vld [vmem:[%s11764_s5 + $0x10] sm:$0xff] }
0x42b6   :  { %9980 = vtanh.f32 %v6520_v62  ;;  %v11863_v62 = vld [vmem:[#allocation29_spill] sm:$0xff] }
0x42b7   :  { %9982 = vtanh.f32 %v6515_v33  ;;  %v9025_v57 = vpop.f32.mrb[122].mxu0 }
0x42b8   :  { %v6530_v47 = vadd.f32 %v9025_v57, %v11856_v53  ;;  %v6524_v41 = vpop.f32.mrb[123].mxu0 }
0x42b9   :  { %v6525_v44 = vadd.f32 %v6524_v41, %v11857_v20 }
0x42ba   :  { %9984 = vtanh.f32 %v6530_v47 }
0x42bb   :  { %9986 = vtanh.f32 %v6525_v44 }
0x42c0   :  { %v9981_v15 = vpop.eup %9980 }
0x42c1   :  { %v9983_v59 = vpop.eup %9982 }
0x42c2   :  { %v9486_v48 = vpack.c.bf16 %v9981_v15, %v9983_v59 }
0x42c4   :  { %v9985_v58 = vpop.eup %9984  ;;  %9487 = vmatprep.subr.bf16.mxu1 %v9486_v48 }
0x42c5   :  { %v9987_v16 = vpop.eup %9986  ;;  %9489 = vmatpush3.bf16.msra.mxu1 %v9486_v48 }
0x42c6   :  { %v9490_v22 = vpack.c.bf16 %v9985_v58, %v9987_v16 }
0x42c8   :  { %9491 = vmatprep.subr.bf16.mxu1 %v9490_v22 }
0x42c9   :  { %9493 = vmatpush3.bf16.msra.mxu1 %v9490_v22 }
0x42cc   :  { %9035 = vmatmul.mubr.msk.f32.vlgmr.msra.gmra.mrb[120].mxu1 %vm275_vm1, %v11609_v27 }
0x42cd   :  { %9037 = vmatprep.mubr.msk.f32.mxu1 %vm275_vm1, %v11616_v51 }
0x42d0   :  { %9038 = vmatmul.mubr.msk.f32.gmra.mrb[122].mxu1 %vm275_vm1, %v11623_v2 }
0x42d1   :  { %9067 = vmatprep.mubr.msk.f32.mxu1 %vm275_vm1, %v11508_v49 }
0x439f   :  { %v9036_v29 = vpop.f32.mrb[120].mxu1 }
0x43a0   :  { %v6609_v53 = vadd.f32 %v9036_v29, %v10560_v55  ;;  %v6603_v46 = vpop.f32.mrb[121].mxu1 }
0x43a1   :  { %v6604_v1 = vadd.f32 %v6603_v46, %v10562_v60 }
0x43a2   :  { %9988 = vtanh.f32 %v6609_v53 }
0x43a3   :  { %9990 = vtanh.f32 %v6604_v1  ;;  %v9039_v20 = vpop.f32.mrb[122].mxu1 }
0x43a4   :  { %v6619_v9 = vadd.f32 %v9039_v20, %v10566_v19  ;;  %v6613_v52 = vpop.f32.mrb[123].mxu1 }
0x43a5   :  { %v6614_v11 = vadd.f32 %v6613_v52, %v10568_v40 }
0x43a6   :  { %9992 = vtanh.f32 %v6619_v9 }
0x43a7   :  { %9994 = vtanh.f32 %v6614_v11 }
0x43ac   :  { %v9989_v45 = vpop.eup %9988 }
0x43ad   :  { %v9991_v24 = vpop.eup %9990 }
0x43ae   :  { %v9495_v61 = vpack.c.bf16 %v9989_v45, %v9991_v24 }
0x43b0   :  { %v9993_v38 = vpop.eup %9992  ;;  %9496 = vmatpush3.bf16.msra.mxu0 %v9495_v61 }
0x43b1   :  { %v9995_v54 = vpop.eup %9994  ;;  %9497 = vmatprep.subr.bf16.mxu0 %v11833_v7 }
0x43b2   :  { %v9498_v30 = vpack.c.bf16 %v9993_v38, %v9995_v54 }
0x43b4   :  { %9499 = vmatpush3.bf16.msra.mxu0 %v9498_v30 }
0x43b7   :  { %9049 = vmatmul.mubr.msk.f32.vlgmr.msra.gmra.mrb[124].mxu0 %vm275_vm1, %v11637_v0 }
0x43b8   :  { %9053 = vmatprep.mubr.msk.f32.mxu0 %vm173_vm0, %v11445_v26 }
0x448a   :  { %v6692_v3 = vpop.f32.mrb[124].mxu0 }
0x448b   :  { %v6693_v36 = vadd.f32 %v6692_v3, %v10582_v63  ;;  %v9050_v34 = vpop.f32.mrb[125].mxu0 }
0x448d   :  { %9996 = vtanh.f32 %v6693_v36 }
0x4497   :  { %v11652_v32 = vpop.eup %9996 }
0x4498   :  { %v6697_v31 = vmul.f32 %v11652_v32, %v11650_v35 }
0x449a   :  { %v6698_v39 = vadd.f32 %v6697_v31, %v11585_v5 }
0x449c   :  { %9051 = vmatprep.subr.mxu0 %v6698_v39 }
0x449d   :  { %9052 = vmatpush3.msra.mxu0 %v6698_v39 }
0x449e   :  { %9054 = vmatmul.mubr.msk.f32.vlgmr.msra.gmra.mrb[126].mxu0 %vm173_vm0, %v11465_v50  ;;  %9508 = vmatprep.subr.bf16.mxu0 %v11833_v7 }
0x449f   :  { %9056 = vmatprep.mubr.msk.f32.mxu0 %vm173_vm0, %v11473_v37 }
0x44a2   :  { %9057 = vmatmul.mubr.msk.f32.gmra.mrb[128].mxu0 %vm173_vm0, %v11480_v6 }
0x44a3   :  { %9081 = vmatprep.mubr.msk.f32.mxu0 %vm10081_vm2, %v11834_v28 }
0x4571   :  { %v9055_v23 = vpop.f32.mrb[126].mxu0 }
0x4572   :  { %v6771_v43 = vadd.f32 %v9055_v23, %v11860_v42  ;;  %v6765_v56 = vpop.f32.mrb[127].mxu0 }
0x4573   :  { %v6766_v4 = vadd.f32 %v6765_v56, %v11861_v21 }
0x4574   :  { %9998 = vtanh.f32 %v6771_v43 }
0x4575   :  { %10000 = vtanh.f32 %v6766_v4  ;;  %v9058_v13 = vpop.f32.mrb[128].mxu0 }
0x4576   :  { %v6781_v8 = vadd.f32 %v9058_v13, %v11862_v18  ;;  %v6775_v12 = vpop.f32.mrb[129].mxu0 }
0x4577   :  { %v6776_v14 = vadd.f32 %v6775_v12, %v11863_v62 }
0x4578   :  { %10002 = vtanh.f32 %v6781_v8 }
0x4579   :  { %10004 = vtanh.f32 %v6776_v14 }
0x457e   :  { %v9999_v33 = vpop.eup %9998 }
0x457f   :  { %v10001_v57 = vpop.eup %10000 }
0x4580   :  { %v9500_v47 = vpack.c.bf16 %v9999_v33, %v10001_v57 }
0x4582   :  { %v10003_v41 = vpop.eup %10002  ;;  %9501 = vmatprep.subr.bf16.mxu1 %v9500_v47 }
0x4583   :  { %v10005_v44 = vpop.eup %10004  ;;  %9503 = vmatpush3.bf16.msra.mxu1 %v9500_v47 }
0x4584   :  { %v9504_v15 = vpack.c.bf16 %v10003_v41, %v10005_v44 }
0x4586   :  { %9505 = vmatprep.subr.bf16.mxu1 %v9504_v15 }
0x4587   :  { %9507 = vmatpush3.bf16.msra.mxu1 %v9504_v15 }
0x458a   :  { %9068 = vmatmul.mubr.msk.f32.vlgmr.msra.gmra.mrb[124].mxu1 %vm275_vm1, %v11609_v27 }
0x458b   :  { %9070 = vmatprep.mubr.msk.f32.mxu1 %vm275_vm1, %v11616_v51 }
0x458e   :  { %9071 = vmatmul.mubr.msk.f32.gmra.mrb[126].mxu1 %vm275_vm1, %v11623_v2 }
0x458f   :  { %9086 = vmatprep.mubr.msk.f32.mxu1 %vm173_vm0, %v11445_v26 }
0x465d   :  { %v9069_v59 = vpop.f32.mrb[124].mxu1 }
0x465e   :  { %v6860_v48 = vadd.f32 %v9069_v59, %v10560_v55  ;;  %v6854_v58 = vpop.f32.mrb[125].mxu1 }
0x465f   :  { %v6855_v16 = vadd.f32 %v6854_v58, %v10562_v60 }
0x4660   :  { %10006 = vtanh.f32 %v6860_v48 }
0x4661   :  { %10008 = vtanh.f32 %v6855_v16  ;;  %v9072_v22 = vpop.f32.mrb[126].mxu1 }
0x4662   :  { %v6870_v29 = vadd.f32 %v9072_v22, %v10566_v19  ;;  %v6864_v53 = vpop.f32.mrb[127].mxu1 }
0x4663   :  { %v6865_v46 = vadd.f32 %v6864_v53, %v10568_v40 }
0x4664   :  { %10010 = vtanh.f32 %v6870_v29 }
0x4665   :  { %10012 = vtanh.f32 %v6865_v46 }
0x466a   :  { %v10007_v1 = vpop.eup %10006 }
0x466b   :  { %v10009_v20 = vpop.eup %10008 }
0x466c   :  { %v9509_v9 = vpack.c.bf16 %v10007_v1, %v10009_v20 }
0x466e   :  { %v10011_v52 = vpop.eup %10010  ;;  %9510 = vmatpush3.bf16.msra.mxu0 %v9509_v9 }
0x466f   :  { %v10013_v11 = vpop.eup %10012  ;;  %9511 = vmatprep.subr.bf16.mxu0 %v11833_v7 }
0x4670   :  { %v9512_v45 = vpack.c.bf16 %v10011_v52, %v10013_v11 }
0x4672   :  { %9513 = vmatpush3.bf16.msra.mxu0 %v9512_v45 }
0x4675   :  { %9082 = vmatmul.mubr.msk.f32.vlgmr.msra.gmra.mrb[130].mxu0 %vm275_vm1, %v11637_v0 }
0x4676   :  { %9100 = vmatprep.mubr.msk.f32.mxu0 %vm275_vm1, %v11508_v49 }
0x4748   :  { %v6943_v24 = vpop.f32.mrb[130].mxu0 }
0x4749   :  { %v6944_v61 = vadd.f32 %v6943_v24, %v10582_v63  ;;  %v9083_v38 = vpop.f32.mrb[131].mxu0  ;;  %v11865_v24 = vld [vmem:[#allocation31_spill] sm:$0xff] }
0x474a   :  { %v11866_v38 = vld [vmem:[#allocation32_spill] sm:$0xff] }
0x474b   :  { %10014 = vtanh.f32 %v6944_v61 }
0x4755   :  { %v10015_v54 = vpop.eup %10014 }
0x4756   :  { %v6948_v30 = vmul.f32 %v10015_v54, %v11650_v35  ;;  %v7450_v29 = vmul.f32 2.0, %v10015_v54 }
0x4758   :  { %v6949_v3 = vadd.f32 %v6948_v30, %v11585_v5  ;;  %v7451_v46 = vadd.f32 %v11652_v32, %v7450_v29  ;;  %v11864_v32 = vld [vmem:[#allocation30_spill] sm:$0xff] }
0x475a   :  { %9084 = vmatprep.subr.mxu1 %v6949_v3 }
0x475b   :  { %9085 = vmatpush3.msra.mxu1 %v6949_v3  ;;  %v11867_v3 = vld [vmem:[#allocation33_spill] sm:$0xff] }
0x475c   :  { %9087 = vmatmul.mubr.msk.f32.vlgmr.msra.gmra.mrb[128].mxu1 %vm173_vm0, %v11465_v50  ;;  %9522 = vmatprep.subr.bf16.mxu1 %v11833_v7 }
0x475d   :  { %9089 = vmatprep.mubr.msk.f32.mxu1 %vm173_vm0, %v11473_v37 }
0x4760   :  { %9090 = vmatmul.mubr.msk.f32.gmra.mrb[130].mxu1 %vm173_vm0, %v11480_v6 }
0x4761   :  { %9114 = vmatprep.mubr.msk.f32.mxu1 %vm10081_vm2, %v11834_v28 }
0x482f   :  { %v9088_v36 = vpop.f32.mrb[128].mxu1 }
0x4830   :  { %v7022_v34 = vadd.f32 %v9088_v36, %v11860_v42  ;;  %v7016_v17 = vpop.f32.mrb[129].mxu1 }
0x4831   :  { %v7017_v10 = vadd.f32 %v7016_v17, %v11861_v21 }
0x4832   :  { %10016 = vtanh.f32 %v7022_v34 }
0x4833   :  { %10018 = vtanh.f32 %v7017_v10  ;;  %v9091_v35 = vpop.f32.mrb[130].mxu1 }
0x4834   :  { %v7032_v31 = vadd.f32 %v9091_v35, %v11862_v18  ;;  %v7026_v39 = vpop.f32.mrb[131].mxu1 }
0x4835   :  { %v7027_v23 = vadd.f32 %v7026_v39, %v11863_v62 }
0x4836   :  { %10020 = vtanh.f32 %v7032_v31 }
0x4837   :  { %10022 = vtanh.f32 %v7027_v23 }
0x483c   :  { %v10017_v43 = vpop.eup %10016 }
0x483d   :  { %v10019_v56 = vpop.eup %10018 }
0x483e   :  { %v9514_v4 = vpack.c.bf16 %v10017_v43, %v10019_v56 }
0x4840   :  { %v10021_v13 = vpop.eup %10020  ;;  %9515 = vmatprep.subr.bf16.mxu0 %v9514_v4 }
0x4841   :  { %v10023_v8 = vpop.eup %10022  ;;  %9517 = vmatpush3.bf16.msra.mxu0 %v9514_v4 }
0x4842   :  { %v9518_v42 = vpack.c.bf16 %v10021_v13, %v10023_v8 }
0x4844   :  { %9519 = vmatprep.subr.bf16.mxu0 %v9518_v42 }
0x4845   :  { %9521 = vmatpush3.bf16.msra.mxu0 %v9518_v42 }
0x4848   :  { %9101 = vmatmul.mubr.msk.f32.vlgmr.msra.gmra.mrb[132].mxu0 %vm275_vm1, %v11609_v27 }
0x4849   :  { %9103 = vmatprep.mubr.msk.f32.mxu0 %vm275_vm1, %v11616_v51 }
0x484c   :  { %9104 = vmatmul.mubr.msk.f32.gmra.mrb[134].mxu0 %vm275_vm1, %v11623_v2 }
0x484d   :  { %9133 = vmatprep.mubr.msk.f32.mxu0 %vm275_vm1, %v11508_v49 }
0x491b   :  { %v9102_v21 = vpop.f32.mrb[132].mxu0 }
0x491c   :  { %v7111_v18 = vadd.f32 %v9102_v21, %v10560_v55  ;;  %v7105_v12 = vpop.f32.mrb[133].mxu0 }
0x491d   :  { %v7106_v62 = vadd.f32 %v7105_v12, %v10562_v60 }
0x491e   :  { %10024 = vtanh.f32 %v7111_v18 }
0x491f   :  { %10026 = vtanh.f32 %v7106_v62  ;;  %v9105_v14 = vpop.f32.mrb[134].mxu0 }
0x4920   :  { %v7121_v33 = vadd.f32 %v9105_v14, %v10566_v19  ;;  %v7115_v57 = vpop.f32.mrb[135].mxu0 }
0x4921   :  { %v7116_v47 = vadd.f32 %v7115_v57, %v10568_v40 }
0x4922   :  { %10028 = vtanh.f32 %v7121_v33 }
0x4923   :  { %10030 = vtanh.f32 %v7116_v47 }
0x4928   :  { %v10025_v41 = vpop.eup %10024 }
0x4929   :  { %v10027_v44 = vpop.eup %10026 }
0x492a   :  { %v9523_v15 = vpack.c.bf16 %v10025_v41, %v10027_v44 }
0x492c   :  { %v10029_v49 = vpop.eup %10028  ;;  %9524 = vmatpush3.bf16.msra.mxu1 %v9523_v15 }
0x492d   :  { %v10031_v59 = vpop.eup %10030  ;;  %9525 = vmatprep.subr.bf16.mxu1 %v11833_v7 }
0x492e   :  { %v9526_v48 = vpack.c.bf16 %v10029_v49, %v10031_v59 }
0x4930   :  { %9527 = vmatpush3.bf16.msra.mxu1 %v9526_v48 }
0x4933   :  { %9115 = vmatmul.mubr.msk.f32.vlgmr.msra.gmra.mrb[132].mxu1 %vm275_vm1, %v11637_v0 }
0x4934   :  { %9119 = vmatprep.mubr.msk.f32.mxu1 %vm173_vm0, %v11445_v26 }
0x4a06   :  { %v7194_v58 = vpop.f32.mrb[132].mxu1 }
0x4a07   :  { %v7195_v16 = vadd.f32 %v7194_v58, %v10582_v63  ;;  %v9116_v22 = vpop.f32.mrb[133].mxu1 }
0x4a09   :  { %10032 = vtanh.f32 %v7195_v16 }
0x4a13   :  { %v10033_v53 = vpop.eup %10032 }
0x4a14   :  { %v7452_v1 = vmul.f32 2.0, %v10033_v53  ;;  %v7199_v20 = vmul.f32 %v10033_v53, %v11647_v25 }
0x4a16   :  { %v7200_v9 = vadd.f32 %v7199_v20, %v11585_v5  ;;  %v7453_v52 = vadd.f32 %v7452_v1, %v7451_v46 }
0x4a18   :  { %9117 = vmatprep.subr.mxu1 %v7200_v9 }
0x4a19   :  { %9118 = vmatpush3.msra.mxu1 %v7200_v9 }
0x4a1a   :  { %9120 = vmatmul.mubr.msk.f32.vlgmr.msra.gmra.mrb[134].mxu1 %vm173_vm0, %v11465_v50  ;;  %9536 = vmatprep.subr.bf16.mxu1 %v11833_v7 }
0x4a1b   :  { %9122 = vmatprep.mubr.msk.f32.mxu1 %vm173_vm0, %v11473_v37 }
0x4a1e   :  { %9123 = vmatmul.mubr.msk.f32.gmra.mrb[136].mxu1 %vm173_vm0, %v11480_v6 }
0x4a1f   :  { %9147 = vmatprep.mubr.msk.f32.mxu1 %vm10081_vm2, %v11834_v28 }
0x4aed   :  { %v9121_v26 = vpop.f32.mrb[134].mxu1 }
0x4aee   :  { %v7273_v11 = vadd.f32 %v9121_v26, %v11864_v32  ;;  %v7267_v45 = vpop.f32.mrb[135].mxu1 }
0x4aef   :  { %v7268_v61 = vadd.f32 %v7267_v45, %v11865_v24 }
0x4af0   :  { %10034 = vtanh.f32 %v7273_v11 }
0x4af1   :  { %10036 = vtanh.f32 %v7268_v61  ;;  %v9124_v50 = vpop.f32.mrb[136].mxu1 }
0x4af2   :  { %v7283_v54 = vadd.f32 %v9124_v50, %v11866_v38  ;;  %v7277_v30 = vpop.f32.mrb[137].mxu1 }
0x4af3   :  { %v7278_v37 = vadd.f32 %v7277_v30, %v11867_v3 }
0x4af4   :  { %10038 = vtanh.f32 %v7283_v54 }
0x4af5   :  { %10040 = vtanh.f32 %v7278_v37 }
0x4afa   :  { %v10035_v6 = vpop.eup %10034 }
0x4afb   :  { %v10037_v36 = vpop.eup %10036 }
0x4afc   :  { %v9528_v34 = vpack.c.bf16 %v10035_v6, %v10037_v36 }
0x4afe   :  { %v10039_v28 = vpop.eup %10038  ;;  %9529 = vmatprep.subr.bf16.mxu0 %v9528_v34 }
0x4aff   :  { %v10041_v17 = vpop.eup %10040  ;;  %9531 = vmatpush3.bf16.msra.mxu0 %v9528_v34 }
0x4b00   :  { %v9532_v10 = vpack.c.bf16 %v10039_v28, %v10041_v17 }
0x4b02   :  { %9533 = vmatprep.subr.bf16.mxu0 %v9532_v10 }
0x4b03   :  { %9535 = vmatpush3.bf16.msra.mxu0 %v9532_v10 }
0x4b06   :  { %9134 = vmatmul.mubr.msk.f32.vlgmr.msra.gmra.mrb[136].mxu0 %vm275_vm1, %v11609_v27 }
0x4b07   :  { %9136 = vmatprep.mubr.msk.f32.mxu0 %vm275_vm1, %v11616_v51 }
0x4b0a   :  { %9137 = vmatmul.mubr.msk.f32.gmra.mrb[138].mxu0 %vm275_vm1, %v11623_v2 }
0x4bd9   :  { %v9135_v35 = vpop.f32.mrb[136].mxu0 }
0x4bda   :  { %v7362_v31 = vadd.f32 %v9135_v35, %v10560_v55  ;;  %v7356_v39 = vpop.f32.mrb[137].mxu0 }
0x4bdb   :  { %v7357_v23 = vadd.f32 %v7356_v39, %v10562_v60 }
0x4bdc   :  { %10042 = vtanh.f32 %v7362_v31 }
0x4bdd   :  { %10044 = vtanh.f32 %v7357_v23  ;;  %v9138_v43 = vpop.f32.mrb[138].mxu0 }
0x4bde   :  { %v7372_v56 = vadd.f32 %v9138_v43, %v10566_v19  ;;  %v7366_v4 = vpop.f32.mrb[139].mxu0 }
0x4bdf   :  { %v7367_v27 = vadd.f32 %v7366_v4, %v10568_v40  ;;  %v6423_v40 = vmul.f32 0.16666667, %v11647_v25 }
0x4be0   :  { %10046 = vtanh.f32 %v7372_v56 }
0x4be1   :  { %10048 = vtanh.f32 %v7367_v27 }
0x4be6   :  { %v10043_v51 = vpop.eup %10042 }
0x4be7   :  { %v10045_v13 = vpop.eup %10044 }
0x4be8   :  { %v9537_v8 = vpack.c.bf16 %v10043_v51, %v10045_v13 }
0x4bea   :  { %v10047_v2 = vpop.eup %10046  ;;  %9538 = vmatpush3.bf16.msra.mxu1 %v9537_v8 }
0x4beb   :  { %v10049_v42 = vpop.eup %10048  ;;  %9539 = vmatprep.subr.bf16.mxu1 %v11833_v7 }
0x4bec   :  { %v9540_v55 = vpack.c.bf16 %v10047_v2, %v10049_v42 }
0x4bee   :  { %9541 = vmatpush3.bf16.msra.mxu1 %v9540_v55 }
0x4bf1   :  { %9148 = vmatmul.mubr.msk.f32.vlgmr.msra.gmra.mrb[138].mxu1 %vm275_vm1, %v11637_v0 }
0x4cc4   :  { %v7445_v60 = vpop.f32.mrb[138].mxu1 }
0x4cc5   :  { %v7446_v19 = vadd.f32 %v7445_v60, %v10582_v63  ;;  %v9149_v21 = vpop.f32.mrb[139].mxu1 }
0x4cc7   :  { %10050 = vtanh.f32 %v7446_v19 }
0x4cd1   :  { %v10051_v18 = vpop.eup %10050 }
0x4cd2   :  { %v7454_v12 = vadd.f32 %v10051_v18, %v7453_v52 }
0x4cd4   :  { %v7455_v62 = vmul.f32 %v7454_v12, %v6423_v40 }
0x4cd6   :  { %v7456_v14 = vadd.f32 %v7455_v62, %v11585_v5 }
0x4cd8   :  { %7721 = vst [vmem:[%s11760_s9 + $0x38] sm:$0xff] %v7456_v14 }

</bundles_post_ra>
